<compile_context>
chip_gen: v6e
topology: v6e:2x2x1
jax: 0.10.0
libtpu: 0.0.40
codegen_flags: <defaults>
</compile_context>

<pallas_src>
import jax
import jax.numpy as jnp
from jax import lax
from jax.experimental import pallas as pl
from jax.experimental.pallas import tpu as pltpu

NEG_SLOPE = 0.2    # GATv2Conv default negative_slope
GN_EPS = 1e-5      # GraphNorm default eps
MASK_NEG = -1e30   # additive mask for non-edges


def _gatv2_dense(x, neg_bias, Wl, Wr, vecs):
    """Dense GATv2 layer. Wl/Wr pre-transposed [in, C]. vecs: [4, C] = (bias_l, bias_r, att, bias_out)."""
    bl = vecs[0:1, :]
    br = vecs[1:2, :]
    att = vecs[2:3, :]
    bo = vecs[3:4, :]
    xl = jnp.dot(x, Wl, preferred_element_type=jnp.float32) + bl      # [N, C] source (lin_l)
    xr = jnp.dot(x, Wr, preferred_element_type=jnp.float32) + br      # [N, C] target (lin_r)
    # e[i, j] = att . LeakyReLU(xl[j] + xr[i])    (edge j -> i)
    s = xr[:, None, :] + xl[None, :, :]                               # [N, N, C]
    s = jnp.where(s > 0, s, NEG_SLOPE * s)                            # LeakyReLU
    e = jnp.sum(s * att, axis=-1) + neg_bias                          # [N, N]; non-edges -> ~-1e30
    m = jnp.max(e, axis=-1, keepdims=True)                            # finite (self-loops exist)
    p = jnp.exp(e - m)                                                # masked entries underflow to 0
    denom_inv = pl.reciprocal(jnp.sum(p, axis=-1, keepdims=True), approx=True)  # EUP
    alpha = p * denom_inv                                             # softmax over sources j
    return jnp.dot(alpha, xl, preferred_element_type=jnp.float32) + bo


def _graphnorm(x, P, gvecs):
    """GraphNorm with precomputed pooling matrix P = M^T diag(1/counts) M.
    gvecs: [3, C] = (weight, bias, mean_scale)."""
    w = gvecs[0:1, :]
    b = gvecs[1:2, :]
    ms = gvecs[2:3, :]
    mean_n = jnp.dot(P, x, preferred_element_type=jnp.float32)        # [N, C] per-graph mean
    xc = x - mean_n * ms
    var_n = jnp.dot(P, xc * xc, preferred_element_type=jnp.float32)   # [N, C] per-graph var
    return xc * lax.rsqrt(var_n + GN_EPS) * w + b                     # EUP rsqrt


def gat_meta_kernel(x_ref, nb_ref, P_ref, Mw_ref,
                    Wl1_ref, Wr1_ref, v1_ref,
                    Wl2_ref, Wr2_ref, v2_ref,
                    Wl3_ref, Wr3_ref, v3_ref,
                    g1_ref, g2_ref, g3_ref,
                    Wlin_ref, blin_ref,
                    o_ref, pooled_ref):
    x = x_ref[...]
    neg_bias = nb_ref[...]
    P = P_ref[...]
    Mw = Mw_ref[...]

    w1 = _gatv2_dense(x, neg_bias, Wl1_ref[...], Wr1_ref[...], v1_ref[...])
    w1 = _graphnorm(jnp.maximum(w1, 0.0), P, g1_ref[...])

    w2 = _gatv2_dense(w1, neg_bias, Wl2_ref[...], Wr2_ref[...], v2_ref[...])
    w2 = _graphnorm(jnp.maximum(w2, 0.0), P, g2_ref[...])

    w3 = _gatv2_dense(w2, neg_bias, Wl3_ref[...], Wr3_ref[...], v3_ref[...])
    w3 = _graphnorm(w3, P, g3_ref[...])

    pooled = jnp.dot(Mw, w3, preferred_element_type=jnp.float32)      # [B, C] global_mean_pool
    # F.dropout(p=0.5) is identity in eval mode.
    o = jnp.dot(pooled, Wlin_ref[...], preferred_element_type=jnp.float32) + blin_ref[...]

    o_ref[...] = o
    pooled_ref[...] = pooled


def gat_meta_forward(x, adj, M, params):
    """x: [N, F], adj: [N, N] dense adjacency (adj[target, source], self-loops included),
    M: [B, N] one-hot graph membership."""
    B = M.shape[0]
    C = params["Wl1"].shape[1]

    # Wrapper-side precompute (free relative to the kernel; removes in-kernel transposes/divides).
    counts = jnp.maximum(jnp.sum(M, axis=-1, keepdims=True), 1.0)     # guard empty graphs
    Mw = (M / counts).astype(jnp.float32)                             # [B, N] weighted pooling
    P = jnp.dot(M.T, Mw).astype(jnp.float32)                          # [N, N] GraphNorm broadcast
    neg_bias = jnp.where(adj > 0, 0.0, MASK_NEG).astype(jnp.float32)  # [N, N] additive mask

    args = (x, neg_bias, P, Mw,
            params["Wl1"], params["Wr1"], params["v1"],
            params["Wl2"], params["Wr2"], params["v2"],
            params["Wl3"], params["Wr3"], params["v3"],
            params["g1"], params["g2"], params["g3"],
            params["Wlin"], params["blin"])
    vmem = pl.BlockSpec(memory_space=pltpu.MemorySpace.VMEM)
    return pl.pallas_call(
        gat_meta_kernel,
        out_shape=(jax.ShapeDtypeStruct((B, 2), jnp.float32),
                   jax.ShapeDtypeStruct((B, C), jnp.float32)),
        in_specs=[vmem] * len(args),
        out_specs=(vmem, vmem),
    )(*args)


def _glorot(key, shape):
    fan_out, fan_in = shape
    lim = (6.0 / (fan_in + fan_out)) ** 0.5
    return jax.random.uniform(key, shape, jnp.float32, -lim, lim)


def make_params(key, in_features, hidden_channels):
    C = hidden_channels
    ks = jax.random.split(key, 12)
    zeros = jnp.zeros((1, C), jnp.float32)
    ones = jnp.ones((1, C), jnp.float32)

    def conv_params(kw_l, kw_r, k_att, in_dim):
        # Stored pre-transposed as [in_dim, C] so the kernel never transposes.
        Wl = _glorot(kw_l, (C, in_dim)).T
        Wr = _glorot(kw_r, (C, in_dim)).T
        att = _glorot(k_att, (1, C))
        # rows: bias_l, bias_r, att, bias_out   (biases init to 0 as in PyG)
        v = jnp.concatenate([zeros, zeros, att, zeros], axis=0)
        return Wl, Wr, v

    Wl1, Wr1, v1 = conv_params(ks[0], ks[1], ks[2], in_features)
    Wl2, Wr2, v2 = conv_params(ks[3], ks[4], ks[5], C)
    Wl3, Wr3, v3 = conv_params(ks[6], ks[7], ks[8], C)
    # GraphNorm: weight=1, bias=0, mean_scale=1
    g = jnp.concatenate([ones, zeros, ones], axis=0)
    lim = 1.0 / (C ** 0.5)
    Wlin = jax.random.uniform(ks[9], (2, C), jnp.float32, -lim, lim).T   # [C, 2] pre-transposed
    blin = jax.random.uniform(ks[10], (1, 2), jnp.float32, -lim, lim)
    return dict(Wl1=Wl1, Wr1=Wr1, v1=v1, Wl2=Wl2, Wr2=Wr2, v2=v2,
                Wl3=Wl3, Wr3=Wr3, v3=v3, g1=g, g2=g, g3=g,
                Wlin=Wlin, blin=blin)


if __name__ == "__main__":
    key = jax.random.PRNGKey(0)
    N, B = 16, 2                 # 16 nodes, 2 graphs (8 nodes each)
    IN_F = 22                    # GATMeta input feature dim
    hidden_channels, heads = 32, 1
    C = hidden_channels * heads

    k_x, k_p = jax.random.split(key)
    x = jax.random.normal(k_x, (N, IN_F), jnp.float32)

    # Build a simple bidirectional ring inside each graph -> edge_index [2, E]
    nodes_per_graph = N // B
    src, dst = [], []
    for g in range(B):
        base = g * nodes_per_graph
        for i in range(nodes_per_graph):
            a = base + i
            b = base + (i + 1) % nodes_per_graph
            src += [a, b]
            dst += [b, a]
    edge_index = jnp.array([src, dst], dtype=jnp.int32)     # [2, E]

    # Dense adjacency mask adj[target, source] + self loops (add_self_loops=True)
    adj = jnp.zeros((N, N), jnp.float32)
    adj = adj.at[edge_index[1], edge_index[0]].set(1.0)
    adj = adj.at[jnp.arange(N), jnp.arange(N)].set(1.0)

    batch = jnp.repeat(jnp.arange(B, dtype=jnp.int32), nodes_per_graph)   # [N]
    M = (batch[None, :] == jnp.arange(B, dtype=jnp.int32)[:, None]).astype(jnp.float32)  # [B, N]

    params = make_params(k_p, IN_F, C)

    o, pooled = gat_meta_forward(x, adj, M, params)
    jax.block_until_ready((o, pooled))
    assert o.shape == (B, 2) and pooled.shape == (B, C)
    assert bool(jnp.all(jnp.isfinite(o))) and bool(jnp.all(jnp.isfinite(pooled)))
    print("KERNEL_OK")
</pallas_src>

<mosaic_0001>
module attributes {stable_mosaic.version = 11 : i64} {
  func.func @gat_meta_kernel(%arg0: memref<16x22xf32, #tpu.memory_space<vmem>>, %arg1: memref<16x16xf32, #tpu.memory_space<vmem>>, %arg2: memref<16x16xf32, #tpu.memory_space<vmem>>, %arg3: memref<2x16xf32, #tpu.memory_space<vmem>>, %arg4: memref<22x32xf32, #tpu.memory_space<vmem>>, %arg5: memref<22x32xf32, #tpu.memory_space<vmem>>, %arg6: memref<4x32xf32, #tpu.memory_space<vmem>>, %arg7: memref<32x32xf32, #tpu.memory_space<vmem>>, %arg8: memref<32x32xf32, #tpu.memory_space<vmem>>, %arg9: memref<4x32xf32, #tpu.memory_space<vmem>>, %arg10: memref<32x32xf32, #tpu.memory_space<vmem>>, %arg11: memref<32x32xf32, #tpu.memory_space<vmem>>, %arg12: memref<4x32xf32, #tpu.memory_space<vmem>>, %arg13: memref<3x32xf32, #tpu.memory_space<vmem>>, %arg14: memref<3x32xf32, #tpu.memory_space<vmem>>, %arg15: memref<3x32xf32, #tpu.memory_space<vmem>>, %arg16: memref<32x2xf32, #tpu.memory_space<vmem>>, %arg17: memref<1x2xf32, #tpu.memory_space<vmem>>, %arg18: memref<2x2xf32, #tpu.memory_space<vmem>>, %arg19: memref<2x32xf32, #tpu.memory_space<vmem>>) attributes {dimension_semantics = [], scalar_prefetch = 0 : i64, scratch_operands = 0 : i64, tpu.core_type = #tpu.core_type<tc>} {
    %c0 = arith.constant 0 : index
    %c0_0 = arith.constant 0 : index
    %0 = vector.load %arg0[%c0, %c0_0] : memref<16x22xf32, #tpu.memory_space<vmem>>, vector<16x22xf32>
    %c0_1 = arith.constant 0 : index
    %c0_2 = arith.constant 0 : index
    %1 = vector.load %arg1[%c0_1, %c0_2] : memref<16x16xf32, #tpu.memory_space<vmem>>, vector<16x16xf32>
    %c0_3 = arith.constant 0 : index
    %c0_4 = arith.constant 0 : index
    %2 = vector.load %arg2[%c0_3, %c0_4] : memref<16x16xf32, #tpu.memory_space<vmem>>, vector<16x16xf32>
    %c0_5 = arith.constant 0 : index
    %c0_6 = arith.constant 0 : index
    %3 = vector.load %arg3[%c0_5, %c0_6] : memref<2x16xf32, #tpu.memory_space<vmem>>, vector<2x16xf32>
    %c0_7 = arith.constant 0 : index
    %c0_8 = arith.constant 0 : index
    %4 = vector.load %arg4[%c0_7, %c0_8] : memref<22x32xf32, #tpu.memory_space<vmem>>, vector<22x32xf32>
    %c0_9 = arith.constant 0 : index
    %c0_10 = arith.constant 0 : index
    %5 = vector.load %arg5[%c0_9, %c0_10] : memref<22x32xf32, #tpu.memory_space<vmem>>, vector<22x32xf32>
    %c0_11 = arith.constant 0 : index
    %c0_12 = arith.constant 0 : index
    %6 = vector.load %arg6[%c0_11, %c0_12] : memref<4x32xf32, #tpu.memory_space<vmem>>, vector<4x32xf32>
    %7 = vector.extract_strided_slice %6 {offsets = [0, 0], sizes = [1, 32], strides = [1, 1]} : vector<4x32xf32> to vector<1x32xf32>
    %8 = vector.extract_strided_slice %6 {offsets = [1, 0], sizes = [1, 32], strides = [1, 1]} : vector<4x32xf32> to vector<1x32xf32>
    %9 = vector.extract_strided_slice %6 {offsets = [2, 0], sizes = [1, 32], strides = [1, 1]} : vector<4x32xf32> to vector<1x32xf32>
    %10 = vector.extract_strided_slice %6 {offsets = [3, 0], sizes = [1, 32], strides = [1, 1]} : vector<4x32xf32> to vector<1x32xf32>
    %cst = arith.constant dense<0.000000e+00> : vector<16x32xf32>
    %11 = tpu.matmul %0, %4, %cst {dimension_numbers = #tpu.dot_dimension_numbers<[1], [0], [0], [1], [0, 0, 1, 1], [], []>} : vector<16x22xf32>, vector<22x32xf32>, vector<16x32xf32> -> vector<16x32xf32>
    %12 = vector.broadcast %7 : vector<1x32xf32> to vector<16x32xf32>
    %13 = arith.addf %11, %12 : vector<16x32xf32>
    %cst_13 = arith.constant dense<0.000000e+00> : vector<16x32xf32>
    %14 = tpu.matmul %0, %5, %cst_13 {dimension_numbers = #tpu.dot_dimension_numbers<[1], [0], [0], [1], [0, 0, 1, 1], [], []>} : vector<16x22xf32>, vector<22x32xf32>, vector<16x32xf32> -> vector<16x32xf32>
    %15 = vector.broadcast %8 : vector<1x32xf32> to vector<16x32xf32>
    %16 = arith.addf %14, %15 : vector<16x32xf32>
    %17 = vector.shape_cast %16 : vector<16x32xf32> to vector<16x1x32xf32>
    %18 = vector.shape_cast %13 : vector<16x32xf32> to vector<1x16x32xf32>
    %19 = vector.broadcast %17 : vector<16x1x32xf32> to vector<16x16x32xf32>
    %20 = vector.broadcast %18 : vector<1x16x32xf32> to vector<16x16x32xf32>
    %21 = arith.addf %19, %20 : vector<16x16x32xf32>
    %cst_14 = arith.constant 0.000000e+00 : f32
    %22 = vector.broadcast %cst_14 : f32 to vector<16x16x32xf32>
    %23 = arith.cmpf ogt, %21, %22 : vector<16x16x32xf32>
    %cst_15 = arith.constant 2.000000e-01 : f32
    %24 = vector.broadcast %cst_15 : f32 to vector<16x16x32xf32>
    %25 = arith.mulf %24, %21 : vector<16x16x32xf32>
    %26 = arith.select %23, %21, %25 : vector<16x16x32xi1>, vector<16x16x32xf32>
    %27 = vector.shape_cast %9 : vector<1x32xf32> to vector<1x1x32xf32>
    %28 = vector.broadcast %27 : vector<1x1x32xf32> to vector<16x16x32xf32>
    %29 = arith.mulf %26, %28 : vector<16x16x32xf32>
    %cst_16 = arith.constant dense<0.000000e+00> : vector<16x16xf32>
    %30 = vector.multi_reduction <add>, %29, %cst_16 [2] : vector<16x16x32xf32> to vector<16x16xf32>
    %31 = arith.addf %30, %1 : vector<16x16xf32>
    %cst_17 = arith.constant dense<0xFF800000> : vector<16xf32>
    %32 = vector.multi_reduction <maximumf>, %31, %cst_17 [1] : vector<16x16xf32> to vector<16xf32>
    %33 = vector.shape_cast %32 : vector<16xf32> to vector<16x1xf32>
    %34 = vector.broadcast %33 : vector<16x1xf32> to vector<16x16xf32>
    %35 = arith.subf %31, %34 : vector<16x16xf32>
    %36 = math.exp %35 : vector<16x16xf32>
    %cst_18 = arith.constant dense<0.000000e+00> : vector<16xf32>
    %37 = vector.multi_reduction <add>, %36, %cst_18 [1] : vector<16x16xf32> to vector<16xf32>
    %38 = vector.shape_cast %37 : vector<16xf32> to vector<16x1xf32>
    %39 = tpu.reciprocal %38 {approx = true} : vector<16x1xf32> -> vector<16x1xf32>
    %40 = vector.broadcast %39 : vector<16x1xf32> to vector<16x16xf32>
    %41 = arith.mulf %36, %40 : vector<16x16xf32>
    %cst_19 = arith.constant dense<0.000000e+00> : vector<16x32xf32>
    %42 = tpu.matmul %41, %13, %cst_19 {dimension_numbers = #tpu.dot_dimension_numbers<[1], [0], [0], [1], [0, 0, 1, 1], [], []>} : vector<16x16xf32>, vector<16x32xf32>, vector<16x32xf32> -> vector<16x32xf32>
    %43 = vector.broadcast %10 : vector<1x32xf32> to vector<16x32xf32>
    %44 = arith.addf %42, %43 : vector<16x32xf32>
    %cst_20 = arith.constant 0.000000e+00 : f32
    %45 = vector.broadcast %cst_20 : f32 to vector<16x32xf32>
    %46 = arith.maximumf %44, %45 : vector<16x32xf32>
    %c0_21 = arith.constant 0 : index
    %c0_22 = arith.constant 0 : index
    %47 = vector.load %arg13[%c0_21, %c0_22] : memref<3x32xf32, #tpu.memory_space<vmem>>, vector<3x32xf32>
    %48 = vector.extract_strided_slice %47 {offsets = [0, 0], sizes = [1, 32], strides = [1, 1]} : vector<3x32xf32> to vector<1x32xf32>
    %49 = vector.extract_strided_slice %47 {offsets = [1, 0], sizes = [1, 32], strides = [1, 1]} : vector<3x32xf32> to vector<1x32xf32>
    %50 = vector.extract_strided_slice %47 {offsets = [2, 0], sizes = [1, 32], strides = [1, 1]} : vector<3x32xf32> to vector<1x32xf32>
    %cst_23 = arith.constant dense<0.000000e+00> : vector<16x32xf32>
    %51 = tpu.matmul %2, %46, %cst_23 {dimension_numbers = #tpu.dot_dimension_numbers<[1], [0], [0], [1], [0, 0, 1, 1], [], []>} : vector<16x16xf32>, vector<16x32xf32>, vector<16x32xf32> -> vector<16x32xf32>
    %52 = vector.broadcast %50 : vector<1x32xf32> to vector<16x32xf32>
    %53 = arith.mulf %51, %52 : vector<16x32xf32>
    %54 = arith.subf %46, %53 : vector<16x32xf32>
    %55 = arith.mulf %54, %54 : vector<16x32xf32>
    %cst_24 = arith.constant dense<0.000000e+00> : vector<16x32xf32>
    %56 = tpu.matmul %2, %55, %cst_24 {dimension_numbers = #tpu.dot_dimension_numbers<[1], [0], [0], [1], [0, 0, 1, 1], [], []>} : vector<16x16xf32>, vector<16x32xf32>, vector<16x32xf32> -> vector<16x32xf32>
    %cst_25 = arith.constant 9.99999974E-6 : f32
    %57 = vector.broadcast %cst_25 : f32 to vector<16x32xf32>
    %58 = arith.addf %56, %57 : vector<16x32xf32>
    %59 = math.rsqrt %58 : vector<16x32xf32>
    %60 = arith.mulf %54, %59 : vector<16x32xf32>
    %61 = vector.broadcast %48 : vector<1x32xf32> to vector<16x32xf32>
    %62 = arith.mulf %60, %61 : vector<16x32xf32>
    %63 = vector.broadcast %49 : vector<1x32xf32> to vector<16x32xf32>
    %64 = arith.addf %62, %63 : vector<16x32xf32>
    %c0_26 = arith.constant 0 : index
    %c0_27 = arith.constant 0 : index
    %65 = vector.load %arg7[%c0_26, %c0_27] : memref<32x32xf32, #tpu.memory_space<vmem>>, vector<32x32xf32>
    %c0_28 = arith.constant 0 : index
    %c0_29 = arith.constant 0 : index
    %66 = vector.load %arg8[%c0_28, %c0_29] : memref<32x32xf32, #tpu.memory_space<vmem>>, vector<32x32xf32>
    %c0_30 = arith.constant 0 : index
    %c0_31 = arith.constant 0 : index
    %67 = vector.load %arg9[%c0_30, %c0_31] : memref<4x32xf32, #tpu.memory_space<vmem>>, vector<4x32xf32>
    %68 = vector.extract_strided_slice %67 {offsets = [0, 0], sizes = [1, 32], strides = [1, 1]} : vector<4x32xf32> to vector<1x32xf32>
    %69 = vector.extract_strided_slice %67 {offsets = [1, 0], sizes = [1, 32], strides = [1, 1]} : vector<4x32xf32> to vector<1x32xf32>
    %70 = vector.extract_strided_slice %67 {offsets = [2, 0], sizes = [1, 32], strides = [1, 1]} : vector<4x32xf32> to vector<1x32xf32>
    %71 = vector.extract_strided_slice %67 {offsets = [3, 0], sizes = [1, 32], strides = [1, 1]} : vector<4x32xf32> to vector<1x32xf32>
    %cst_32 = arith.constant dense<0.000000e+00> : vector<16x32xf32>
    %72 = tpu.matmul %64, %65, %cst_32 {dimension_numbers = #tpu.dot_dimension_numbers<[1], [0], [0], [1], [0, 0, 1, 1], [], []>} : vector<16x32xf32>, vector<32x32xf32>, vector<16x32xf32> -> vector<16x32xf32>
    %73 = vector.broadcast %68 : vector<1x32xf32> to vector<16x32xf32>
    %74 = arith.addf %72, %73 : vector<16x32xf32>
    %cst_33 = arith.constant dense<0.000000e+00> : vector<16x32xf32>
    %75 = tpu.matmul %64, %66, %cst_33 {dimension_numbers = #tpu.dot_dimension_numbers<[1], [0], [0], [1], [0, 0, 1, 1], [], []>} : vector<16x32xf32>, vector<32x32xf32>, vector<16x32xf32> -> vector<16x32xf32>
    %76 = vector.broadcast %69 : vector<1x32xf32> to vector<16x32xf32>
    %77 = arith.addf %75, %76 : vector<16x32xf32>
    %78 = vector.shape_cast %77 : vector<16x32xf32> to vector<16x1x32xf32>
    %79 = vector.shape_cast %74 : vector<16x32xf32> to vector<1x16x32xf32>
    %80 = vector.broadcast %78 : vector<16x1x32xf32> to vector<16x16x32xf32>
    %81 = vector.broadcast %79 : vector<1x16x32xf32> to vector<16x16x32xf32>
    %82 = arith.addf %80, %81 : vector<16x16x32xf32>
    %cst_34 = arith.constant 0.000000e+00 : f32
    %83 = vector.broadcast %cst_34 : f32 to vector<16x16x32xf32>
    %84 = arith.cmpf ogt, %82, %83 : vector<16x16x32xf32>
    %cst_35 = arith.constant 2.000000e-01 : f32
    %85 = vector.broadcast %cst_35 : f32 to vector<16x16x32xf32>
    %86 = arith.mulf %85, %82 : vector<16x16x32xf32>
    %87 = arith.select %84, %82, %86 : vector<16x16x32xi1>, vector<16x16x32xf32>
    %88 = vector.shape_cast %70 : vector<1x32xf32> to vector<1x1x32xf32>
    %89 = vector.broadcast %88 : vector<1x1x32xf32> to vector<16x16x32xf32>
    %90 = arith.mulf %87, %89 : vector<16x16x32xf32>
    %cst_36 = arith.constant dense<0.000000e+00> : vector<16x16xf32>
    %91 = vector.multi_reduction <add>, %90, %cst_36 [2] : vector<16x16x32xf32> to vector<16x16xf32>
    %92 = arith.addf %91, %1 : vector<16x16xf32>
    %cst_37 = arith.constant dense<0xFF800000> : vector<16xf32>
    %93 = vector.multi_reduction <maximumf>, %92, %cst_37 [1] : vector<16x16xf32> to vector<16xf32>
    %94 = vector.shape_cast %93 : vector<16xf32> to vector<16x1xf32>
    %95 = vector.broadcast %94 : vector<16x1xf32> to vector<16x16xf32>
    %96 = arith.subf %92, %95 : vector<16x16xf32>
    %97 = math.exp %96 : vector<16x16xf32>
    %cst_38 = arith.constant dense<0.000000e+00> : vector<16xf32>
    %98 = vector.multi_reduction <add>, %97, %cst_38 [1] : vector<16x16xf32> to vector<16xf32>
    %99 = vector.shape_cast %98 : vector<16xf32> to vector<16x1xf32>
    %100 = tpu.reciprocal %99 {approx = true} : vector<16x1xf32> -> vector<16x1xf32>
    %101 = vector.broadcast %100 : vector<16x1xf32> to vector<16x16xf32>
    %102 = arith.mulf %97, %101 : vector<16x16xf32>
    %cst_39 = arith.constant dense<0.000000e+00> : vector<16x32xf32>
    %103 = tpu.matmul %102, %74, %cst_39 {dimension_numbers = #tpu.dot_dimension_numbers<[1], [0], [0], [1], [0, 0, 1, 1], [], []>} : vector<16x16xf32>, vector<16x32xf32>, vector<16x32xf32> -> vector<16x32xf32>
    %104 = vector.broadcast %71 : vector<1x32xf32> to vector<16x32xf32>
    %105 = arith.addf %103, %104 : vector<16x32xf32>
    %cst_40 = arith.constant 0.000000e+00 : f32
    %106 = vector.broadcast %cst_40 : f32 to vector<16x32xf32>
    %107 = arith.maximumf %105, %106 : vector<16x32xf32>
    %c0_41 = arith.constant 0 : index
    %c0_42 = arith.constant 0 : index
    %108 = vector.load %arg14[%c0_41, %c0_42] : memref<3x32xf32, #tpu.memory_space<vmem>>, vector<3x32xf32>
    %109 = vector.extract_strided_slice %108 {offsets = [0, 0], sizes = [1, 32], strides = [1, 1]} : vector<3x32xf32> to vector<1x32xf32>
    %110 = vector.extract_strided_slice %108 {offsets = [1, 0], sizes = [1, 32], strides = [1, 1]} : vector<3x32xf32> to vector<1x32xf32>
    %111 = vector.extract_strided_slice %108 {offsets = [2, 0], sizes = [1, 32], strides = [1, 1]} : vector<3x32xf32> to vector<1x32xf32>
    %cst_43 = arith.constant dense<0.000000e+00> : vector<16x32xf32>
    %112 = tpu.matmul %2, %107, %cst_43 {dimension_numbers = #tpu.dot_dimension_numbers<[1], [0], [0], [1], [0, 0, 1, 1], [], []>} : vector<16x16xf32>, vector<16x32xf32>, vector<16x32xf32> -> vector<16x32xf32>
    %113 = vector.broadcast %111 : vector<1x32xf32> to vector<16x32xf32>
    %114 = arith.mulf %112, %113 : vector<16x32xf32>
    %115 = arith.subf %107, %114 : vector<16x32xf32>
    %116 = arith.mulf %115, %115 : vector<16x32xf32>
    %cst_44 = arith.constant dense<0.000000e+00> : vector<16x32xf32>
    %117 = tpu.matmul %2, %116, %cst_44 {dimension_numbers = #tpu.dot_dimension_numbers<[1], [0], [0], [1], [0, 0, 1, 1], [], []>} : vector<16x16xf32>, vector<16x32xf32>, vector<16x32xf32> -> vector<16x32xf32>
    %cst_45 = arith.constant 9.99999974E-6 : f32
    %118 = vector.broadcast %cst_45 : f32 to vector<16x32xf32>
    %119 = arith.addf %117, %118 : vector<16x32xf32>
    %120 = math.rsqrt %119 : vector<16x32xf32>
    %121 = arith.mulf %115, %120 : vector<16x32xf32>
    %122 = vector.broadcast %109 : vector<1x32xf32> to vector<16x32xf32>
    %123 = arith.mulf %121, %122 : vector<16x32xf32>
    %124 = vector.broadcast %110 : vector<1x32xf32> to vector<16x32xf32>
    %125 = arith.addf %123, %124 : vector<16x32xf32>
    %c0_46 = arith.constant 0 : index
    %c0_47 = arith.constant 0 : index
    %126 = vector.load %arg10[%c0_46, %c0_47] : memref<32x32xf32, #tpu.memory_space<vmem>>, vector<32x32xf32>
    %c0_48 = arith.constant 0 : index
    %c0_49 = arith.constant 0 : index
    %127 = vector.load %arg11[%c0_48, %c0_49] : memref<32x32xf32, #tpu.memory_space<vmem>>, vector<32x32xf32>
    %c0_50 = arith.constant 0 : index
    %c0_51 = arith.constant 0 : index
    %128 = vector.load %arg12[%c0_50, %c0_51] : memref<4x32xf32, #tpu.memory_space<vmem>>, vector<4x32xf32>
    %129 = vector.extract_strided_slice %128 {offsets = [0, 0], sizes = [1, 32], strides = [1, 1]} : vector<4x32xf32> to vector<1x32xf32>
    %130 = vector.extract_strided_slice %128 {offsets = [1, 0], sizes = [1, 32], strides = [1, 1]} : vector<4x32xf32> to vector<1x32xf32>
    %131 = vector.extract_strided_slice %128 {offsets = [2, 0], sizes = [1, 32], strides = [1, 1]} : vector<4x32xf32> to vector<1x32xf32>
    %132 = vector.extract_strided_slice %128 {offsets = [3, 0], sizes = [1, 32], strides = [1, 1]} : vector<4x32xf32> to vector<1x32xf32>
    %cst_52 = arith.constant dense<0.000000e+00> : vector<16x32xf32>
    %133 = tpu.matmul %125, %126, %cst_52 {dimension_numbers = #tpu.dot_dimension_numbers<[1], [0], [0], [1], [0, 0, 1, 1], [], []>} : vector<16x32xf32>, vector<32x32xf32>, vector<16x32xf32> -> vector<16x32xf32>
    %134 = vector.broadcast %129 : vector<1x32xf32> to vector<16x32xf32>
    %135 = arith.addf %133, %134 : vector<16x32xf32>
    %cst_53 = arith.constant dense<0.000000e+00> : vector<16x32xf32>
    %136 = tpu.matmul %125, %127, %cst_53 {dimension_numbers = #tpu.dot_dimension_numbers<[1], [0], [0], [1], [0, 0, 1, 1], [], []>} : vector<16x32xf32>, vector<32x32xf32>, vector<16x32xf32> -> vector<16x32xf32>
    %137 = vector.broadcast %130 : vector<1x32xf32> to vector<16x32xf32>
    %138 = arith.addf %136, %137 : vector<16x32xf32>
    %139 = vector.shape_cast %138 : vector<16x32xf32> to vector<16x1x32xf32>
    %140 = vector.shape_cast %135 : vector<16x32xf32> to vector<1x16x32xf32>
    %141 = vector.broadcast %139 : vector<16x1x32xf32> to vector<16x16x32xf32>
    %142 = vector.broadcast %140 : vector<1x16x32xf32> to vector<16x16x32xf32>
    %143 = arith.addf %141, %142 : vector<16x16x32xf32>
    %cst_54 = arith.constant 0.000000e+00 : f32
    %144 = vector.broadcast %cst_54 : f32 to vector<16x16x32xf32>
    %145 = arith.cmpf ogt, %143, %144 : vector<16x16x32xf32>
    %cst_55 = arith.constant 2.000000e-01 : f32
    %146 = vector.broadcast %cst_55 : f32 to vector<16x16x32xf32>
    %147 = arith.mulf %146, %143 : vector<16x16x32xf32>
    %148 = arith.select %145, %143, %147 : vector<16x16x32xi1>, vector<16x16x32xf32>
    %149 = vector.shape_cast %131 : vector<1x32xf32> to vector<1x1x32xf32>
    %150 = vector.broadcast %149 : vector<1x1x32xf32> to vector<16x16x32xf32>
    %151 = arith.mulf %148, %150 : vector<16x16x32xf32>
    %cst_56 = arith.constant dense<0.000000e+00> : vector<16x16xf32>
    %152 = vector.multi_reduction <add>, %151, %cst_56 [2] : vector<16x16x32xf32> to vector<16x16xf32>
    %153 = arith.addf %152, %1 : vector<16x16xf32>
    %cst_57 = arith.constant dense<0xFF800000> : vector<16xf32>
    %154 = vector.multi_reduction <maximumf>, %153, %cst_57 [1] : vector<16x16xf32> to vector<16xf32>
    %155 = vector.shape_cast %154 : vector<16xf32> to vector<16x1xf32>
    %156 = vector.broadcast %155 : vector<16x1xf32> to vector<16x16xf32>
    %157 = arith.subf %153, %156 : vector<16x16xf32>
    %158 = math.exp %157 : vector<16x16xf32>
    %cst_58 = arith.constant dense<0.000000e+00> : vector<16xf32>
    %159 = vector.multi_reduction <add>, %158, %cst_58 [1] : vector<16x16xf32> to vector<16xf32>
    %160 = vector.shape_cast %159 : vector<16xf32> to vector<16x1xf32>
    %161 = tpu.reciprocal %160 {approx = true} : vector<16x1xf32> -> vector<16x1xf32>
    %162 = vector.broadcast %161 : vector<16x1xf32> to vector<16x16xf32>
    %163 = arith.mulf %158, %162 : vector<16x16xf32>
    %cst_59 = arith.constant dense<0.000000e+00> : vector<16x32xf32>
    %164 = tpu.matmul %163, %135, %cst_59 {dimension_numbers = #tpu.dot_dimension_numbers<[1], [0], [0], [1], [0, 0, 1, 1], [], []>} : vector<16x16xf32>, vector<16x32xf32>, vector<16x32xf32> -> vector<16x32xf32>
    %165 = vector.broadcast %132 : vector<1x32xf32> to vector<16x32xf32>
    %166 = arith.addf %164, %165 : vector<16x32xf32>
    %c0_60 = arith.constant 0 : index
    %c0_61 = arith.constant 0 : index
    %167 = vector.load %arg15[%c0_60, %c0_61] : memref<3x32xf32, #tpu.memory_space<vmem>>, vector<3x32xf32>
    %168 = vector.extract_strided_slice %167 {offsets = [0, 0], sizes = [1, 32], strides = [1, 1]} : vector<3x32xf32> to vector<1x32xf32>
    %169 = vector.extract_strided_slice %167 {offsets = [1, 0], sizes = [1, 32], strides = [1, 1]} : vector<3x32xf32> to vector<1x32xf32>
    %170 = vector.extract_strided_slice %167 {offsets = [2, 0], sizes = [1, 32], strides = [1, 1]} : vector<3x32xf32> to vector<1x32xf32>
    %cst_62 = arith.constant dense<0.000000e+00> : vector<16x32xf32>
    %171 = tpu.matmul %2, %166, %cst_62 {dimension_numbers = #tpu.dot_dimension_numbers<[1], [0], [0], [1], [0, 0, 1, 1], [], []>} : vector<16x16xf32>, vector<16x32xf32>, vector<16x32xf32> -> vector<16x32xf32>
    %172 = vector.broadcast %170 : vector<1x32xf32> to vector<16x32xf32>
    %173 = arith.mulf %171, %172 : vector<16x32xf32>
    %174 = arith.subf %166, %173 : vector<16x32xf32>
    %175 = arith.mulf %174, %174 : vector<16x32xf32>
    %cst_63 = arith.constant dense<0.000000e+00> : vector<16x32xf32>
    %176 = tpu.matmul %2, %175, %cst_63 {dimension_numbers = #tpu.dot_dimension_numbers<[1], [0], [0], [1], [0, 0, 1, 1], [], []>} : vector<16x16xf32>, vector<16x32xf32>, vector<16x32xf32> -> vector<16x32xf32>
    %cst_64 = arith.constant 9.99999974E-6 : f32
    %177 = vector.broadcast %cst_64 : f32 to vector<16x32xf32>
    %178 = arith.addf %176, %177 : vector<16x32xf32>
    %179 = math.rsqrt %178 : vector<16x32xf32>
    %180 = arith.mulf %174, %179 : vector<16x32xf32>
    %181 = vector.broadcast %168 : vector<1x32xf32> to vector<16x32xf32>
    %182 = arith.mulf %180, %181 : vector<16x32xf32>
    %183 = vector.broadcast %169 : vector<1x32xf32> to vector<16x32xf32>
    %184 = arith.addf %182, %183 : vector<16x32xf32>
    %cst_65 = arith.constant dense<0.000000e+00> : vector<2x32xf32>
    %185 = tpu.matmul %3, %184, %cst_65 {dimension_numbers = #tpu.dot_dimension_numbers<[1], [0], [0], [1], [0, 0, 1, 1], [], []>} : vector<2x16xf32>, vector<16x32xf32>, vector<2x32xf32> -> vector<2x32xf32>
    %c0_66 = arith.constant 0 : index
    %c0_67 = arith.constant 0 : index
    %186 = vector.load %arg16[%c0_66, %c0_67] : memref<32x2xf32, #tpu.memory_space<vmem>>, vector<32x2xf32>
    %cst_68 = arith.constant dense<0.000000e+00> : vector<2x2xf32>
    %187 = tpu.matmul %185, %186, %cst_68 {dimension_numbers = #tpu.dot_dimension_numbers<[1], [0], [0], [1], [0, 0, 1, 1], [], []>} : vector<2x32xf32>, vector<32x2xf32>, vector<2x2xf32> -> vector<2x2xf32>
    %c0_69 = arith.constant 0 : index
    %c0_70 = arith.constant 0 : index
    %188 = vector.load %arg17[%c0_69, %c0_70] : memref<1x2xf32, #tpu.memory_space<vmem>>, vector<1x2xf32>
    %189 = vector.broadcast %188 : vector<1x2xf32> to vector<2x2xf32>
    %190 = arith.addf %187, %189 : vector<2x2xf32>
    %c0_71 = arith.constant 0 : index
    %c0_72 = arith.constant 0 : index
    %191 = vector.load %arg18[%c0_71, %c0_72] : memref<2x2xf32, #tpu.memory_space<vmem>>, vector<2x2xf32>
    tpu.vector_store %arg18[%c0_71, %c0_72], %190 {strides = array<i32>} : memref<2x2xf32, #tpu.memory_space<vmem>>, vector<2x2xf32>,
    %c0_73 = arith.constant 0 : index
    %c0_74 = arith.constant 0 : index
    %192 = vector.load %arg19[%c0_73, %c0_74] : memref<2x32xf32, #tpu.memory_space<vmem>>, vector<2x32xf32>
    tpu.vector_store %arg19[%c0_73, %c0_74], %185 {strides = array<i32>} : memref<2x32xf32, #tpu.memory_space<vmem>>, vector<2x32xf32>,
    return
  }
}

</mosaic_0001>

<bundles_post_ra>
// kernel: tpu_custom_call.1
= control target key start
LH: loop header
LB: loop body
LE: loop exit
PB: predicated region body
PF: predicated region fallthrough
CT: control target
= control target key end

     0   :  { %s10341_s0 = inlined_call_operand.hbm [shape: f32[16,22], index: 0, kind: input, shape index: {}]   ;;  %s10342_s1 = inlined_call_operand.hbm [shape: f32[16,16], index: 1, kind: input, shape index: {}]   ;;  %s10343_s2 = inlined_call_operand.hbm [shape: f32[16,16], index: 2, kind: input, shape index: {}]   ;;  %s10344_s3 = inlined_call_operand.hbm [shape: f32[2,16], index: 3, kind: input, shape index: {}]   ;;  %s10345_s4 = inlined_call_operand.hbm [shape: f32[22,32], index: 4, kind: input, shape index: {}]   ;;  %s10346_s5 = inlined_call_operand.hbm [shape: f32[22,32], index: 5, kind: input, shape index: {}]   ;;  %s10347_s6 = inlined_call_operand.vmem [shape: f32[4,32], index: 6, kind: input, shape index: {}]   ;;  %s10348_s7 = inlined_call_operand.vmem [shape: f32[32,32], index: 7, kind: input, shape index: {}]   ;;  %s10349_s8 = inlined_call_operand.hbm [shape: f32[32,32], index: 8, kind: input, shape index: {}]   ;;  %s10350_s9 = inlined_call_operand.vmem [shape: f32[4,32], index: 9, kind: input, shape index: {}]   ;;  %s10351_s10 = inlined_call_operand.hbm [shape: f32[32,32], index: 10, kind: input, shape index: {}]   ;;  %s10352_s11 = inlined_call_operand.hbm [shape: f32[32,32], index: 11, kind: input, shape index: {}]   ;;  %s10353_s12 = inlined_call_operand.vmem [shape: f32[4,32], index: 12, kind: input, shape index: {}]   ;;  %s10354_s13 = inlined_call_operand.vmem [shape: f32[3,32], index: 13, kind: input, shape index: {}]   ;;  %s10355_s14 = inlined_call_operand.vmem [shape: f32[3,32], index: 14, kind: input, shape index: {}]   ;;  %s10356_s15 = inlined_call_operand.vmem [shape: f32[3,32], index: 15, kind: input, shape index: {}]   ;;  %s10357_s16 = inlined_call_operand.vmem [shape: f32[32,2], index: 16, kind: input, shape index: {}]   ;;  %s10358_s17 = inlined_call_operand.vmem [shape: f32[1,2], index: 17, kind: input, shape index: {}]   ;;  %s10359_s18 = inlined_call_operand.hbm [shape: f32[2,2], index: 18, kind: output, shape index: {0}]   ;;  %s10360_s19 = inlined_call_operand.hbm [shape: f32[2,32], index: 19, kind: output, shape index: {1}]  }
   0x1   :  { %10512 = sst [smem:[#allocation74_spill]] %s10341_s0 }
   0x2   :  { %10513 = sst [smem:[#allocation75_spill]] %s10342_s1 }
   0x3   :  { %10514 = sst [smem:[#allocation76_spill]] %s10343_s2 }
   0x4   :  { %10515 = sst [smem:[#allocation77_spill]] %s10344_s3 }
   0x5   :  { %10516 = sst [smem:[#allocation78_spill]] %s10359_s18 }
   0x6   :  { %25 = vsyncpa [#allocation3], 0 }
   0x7   :  { %26 = vsyncpa [#allocation6], 0 }
   0x8   :  { %27 = vsyncpa [#allocation9], 0 }
   0x9   :  { %28 = vsyncpa [#allocation12], 0 }
   0xa   :  { %29 = vsyncpa [#allocation15], 0 }
   0xb   :  { %30 = vsyncpa [#allocation4], 0 }
   0xc   :  { %31 = vsyncpa [#allocation19], 0  ;;  %s7574_s0 = smov [#allocation5]   ;;  %s7575_s20 = smov [#allocation8]  }
   0xd   :  { %s49_s30 = sshll.u32 %s7574_s0, 4  ;;  %s74_s21 = sshll.u32 %s7575_s20, 4  ;;  %s50_s30 = int_to_ptr.vmem [resolvable:$true] %s49_s30  ;;  %s75_s21 = int_to_ptr.vmem [resolvable:$true] %s74_s21 }
   0xe   :  { %s7348_s1 = scalar_lea.vmem %s50_s30, 256  ;;  %p7353_p1 = scmp.lt.s32.totalorder %s50_s30, %s50_s30 }
   0xf   :  { %p7349_p0 = scmp.ne.s32.totalorder %s50_s30, %s7348_s1  ;;  %p7354_p2 = scmp.lt.s32.totalorder %s7348_s1, %s7348_s1 }
  0x11   :  { %p7355_p3 = por %p7354_p2, %p7353_p1 }
  0x13   :  { %p7356_p4 = pnand %p7355_p3, %p7349_p0 }
  0x15   :  { %7359 = shalt.err (!%p7356_p4)
}
  0x16   :  { %s7576_s22 = smov 128   ;;  %s7577_s2 = smov 8  }
  0x17   :  { %s10517_s25 = sld [smem:[#allocation75_spill]]  ;;  %s7368_s3 = scalar_lea.vmem %s75_s21, 32 }
  0x18   :  { %p7369_p5 = scmp.ne.s32.totalorder %s75_s21, %s7368_s3  ;;  %p7373_p6 = scmp.lt.s32.totalorder %s75_s21, %s75_s21 }
  0x19   :  { %p7374_p7 = scmp.lt.s32.totalorder %s7368_s3, %s7368_s3 }
  0x1b   :  { %p7375_p8 = por %p7374_p7, %p7373_p6 }
  0x1d   :  { %55 = dma.hbm_to_vmem [thread:$0]  %s10517_s25, 256, %s50_s30, [#allocation6], %s7576_s22, %s7576_s22, %s7577_s2  }
  0x1e   :  { %p7376_p9 = pnand %p7375_p8, %p7369_p5 }
  0x20   :  { %7379 = shalt.err (!%p7376_p9)
}
  0x21   :  { %s10518_s28 = sld [smem:[#allocation77_spill]]  ;;  %s7578_s29 = smov [#allocation11]  }
  0x22   :  { %s95_s0 = sshll.u32 %s7578_s29, 4  ;;  %s7579_s20 = smov [#allocation14]   ;;  %s96_s0 = int_to_ptr.vmem [resolvable:$true] %s95_s0 }
  0x23   :  { %s125_s1 = sshll.u32 %s7579_s20, 4  ;;  %s7388_s18 = scalar_lea.vmem %s96_s0, 384  ;;  %s126_s1 = int_to_ptr.vmem [resolvable:$true] %s125_s1 }
  0x24   :  { %p7389_p10 = scmp.ne.s32.totalorder %s96_s0, %s7388_s18  ;;  %p7393_p11 = scmp.lt.s32.totalorder %s96_s0, %s96_s0 }
  0x25   :  { %p7394_p12 = scmp.lt.s32.totalorder %s7388_s18, %s7388_s18 }
  0x27   :  { %77 = dma.hbm_to_vmem [thread:$0]  %s10518_s28, 32, %s75_s21, [#allocation9]  }
  0x28   :  { %p7395_p13 = por %p7394_p12, %p7393_p11 }
  0x2a   :  { %p7396_p0 = pnand %p7395_p13, %p7389_p10 }
  0x2c   :  { %7399 = shalt.err (!%p7396_p0)
}
  0x2d   :  { %101 = dma.hbm_to_vmem [thread:$0]  %s10346_s5, 384, %s96_s0, [#allocation12], %s7576_s22, %s7576_s22, %s7577_s2  }
  0x2e   :  { %s7408_s21 = scalar_lea.vmem %s126_s1, 512  ;;  %p7413_p2 = scmp.lt.s32.totalorder %s126_s1, %s126_s1 }
  0x2f   :  { %p7409_p1 = scmp.ne.s32.totalorder %s126_s1, %s7408_s21  ;;  %p7414_p3 = scmp.lt.s32.totalorder %s7408_s21, %s7408_s21 }
  0x31   :  { %p7415_p4 = por %p7414_p3, %p7413_p2 }
  0x33   :  { %p7416_p5 = pnand %p7415_p4, %p7409_p1 }
  0x35   :  { %7419 = shalt.err (!%p7416_p5)
}
  0x36   :  { %131 = dma.hbm_to_vmem [thread:$0]  %s10351_s10, 512, %s126_s1, [#allocation15], %s7576_s22, %s7576_s22, %s7577_s2  }
  0x37   :  { %s7580_s25 = smov [#allocation2]   ;;  %s7581_s26 = smov [#allocation7]  }
  0x38   :  { %s37_s3 = sshll.u32 %s7580_s25, 4  ;;  %s61_s27 = sshll.u32 %s7581_s26, 4  ;;  %s38_s3 = int_to_ptr.vmem [resolvable:$true] %s37_s3  ;;  %s62_s27 = int_to_ptr.vmem [resolvable:$true] %s61_s27 }
  0x39   :  { %s7428_s5 = scalar_lea.vmem %s38_s3, 256  ;;  %p7433_p7 = scmp.lt.s32.totalorder %s38_s3, %s38_s3 }
  0x3a   :  { %p7429_p6 = scmp.ne.s32.totalorder %s38_s3, %s7428_s5  ;;  %p7434_p8 = scmp.lt.s32.totalorder %s7428_s5, %s7428_s5 }
  0x3c   :  { %p7435_p9 = por %p7434_p8, %p7433_p7 }
  0x3e   :  { %p7436_p10 = pnand %p7435_p9, %p7429_p6 }
  0x40   :  { %7439 = shalt.err (!%p7436_p10)
}
  0x41   :  { %s10519_s0 = sld [smem:[#allocation74_spill]]  ;;  %s7448_s10 = scalar_lea.vmem %s62_s27, 256 }
  0x42   :  { %p7449_p11 = scmp.ne.s32.totalorder %s62_s27, %s7448_s10  ;;  %p7453_p12 = scmp.lt.s32.totalorder %s62_s27, %s62_s27 }
  0x43   :  { %p7454_p13 = scmp.lt.s32.totalorder %s7448_s10, %s7448_s10 }
  0x45   :  { %p7455_p0 = por %p7454_p13, %p7453_p12 }
  0x47   :  { %43 = dma.hbm_to_vmem [thread:$0]  %s10519_s0, 256, %s38_s3, [#allocation3], %s7576_s22, %s7576_s22, %s7577_s2  }
  0x48   :  { %p7456_p1 = pnand %p7455_p0, %p7449_p11 }
  0x4a   :  { %7459 = shalt.err (!%p7456_p1)
}
  0x4b   :  { %s10520_s30 = sld [smem:[#allocation76_spill]]  ;;  %s7582_s23 = smov [#allocation10]  }
  0x4c   :  { %s83_s21 = sshll.u32 %s7582_s23, 4  ;;  %s7583_s18 = smov [#allocation13]   ;;  %s84_s21 = int_to_ptr.vmem [resolvable:$true] %s83_s21 }
  0x4d   :  { %s111_s24 = sshll.u32 %s7583_s18, 4  ;;  %s7468_s25 = scalar_lea.vmem %s84_s21, 384  ;;  %s112_s24 = int_to_ptr.vmem [resolvable:$true] %s111_s24 }
  0x4e   :  { %p7469_p2 = scmp.ne.s32.totalorder %s84_s21, %s7468_s25  ;;  %p7473_p3 = scmp.lt.s32.totalorder %s84_s21, %s84_s21 }
  0x4f   :  { %p7474_p4 = scmp.lt.s32.totalorder %s7468_s25, %s7468_s25 }
  0x51   :  { %67 = dma.hbm_to_vmem [thread:$0]  %s10520_s30, 256, %s62_s27, [#allocation6], %s7576_s22, %s7576_s22, %s7577_s2  }
  0x52   :  { %p7475_p5 = por %p7474_p4, %p7473_p3 }
  0x54   :  { %p7476_p6 = pnand %p7475_p5, %p7469_p2 }
  0x56   :  { %7479 = shalt.err (!%p7476_p6)
}
  0x57   :  { %89 = dma.hbm_to_vmem [thread:$0]  %s10345_s4, 384, %s84_s21, [#allocation9], %s7576_s22, %s7576_s22, %s7577_s2  }
  0x58   :  { %s7488_s27 = scalar_lea.vmem %s112_s24, 512  ;;  %p7493_p8 = scmp.lt.s32.totalorder %s112_s24, %s112_s24 }
  0x59   :  { %p7489_p7 = scmp.ne.s32.totalorder %s112_s24, %s7488_s27  ;;  %p7494_p9 = scmp.lt.s32.totalorder %s7488_s27, %s7488_s27 }
  0x5b   :  { %p7495_p10 = por %p7494_p9, %p7493_p8 }
  0x5d   :  { %p7496_p11 = pnand %p7495_p10, %p7489_p7 }
  0x5f   :  { %7499 = shalt.err (!%p7496_p11)
}
  0x60   :  { %117 = dma.hbm_to_vmem [thread:$0]  %s10349_s8, 512, %s112_s24, [#allocation12], %s7576_s22, %s7576_s22, %s7577_s2  }
  0x61   :  { %s7584_s29 = smov [#allocation16]  }
  0x62   :  { %s137_s0 = sshll.u32 %s7584_s29, 4  ;;  %s138_s0 = int_to_ptr.vmem [resolvable:$true] %s137_s0 }
  0x63   :  { %s7508_s10 = scalar_lea.vmem %s138_s0, 512  ;;  %p7513_p13 = scmp.lt.s32.totalorder %s138_s0, %s138_s0 }
  0x64   :  { %p7509_p12 = scmp.ne.s32.totalorder %s138_s0, %s7508_s10  ;;  %p7514_p0 = scmp.lt.s32.totalorder %s7508_s10, %s7508_s10 }
  0x66   :  { %p7515_p1 = por %p7514_p0, %p7513_p13 }
  0x68   :  { %p7516_p2 = pnand %p7515_p1, %p7509_p12 }
  0x6a   :  { %7519 = shalt.err (!%p7516_p2)
}
  0x6b   :  { %143 = dma.hbm_to_vmem [thread:$0]  %s10352_s11, 512, %s138_s0, [#allocation15], %s7576_s22, %s7576_s22, %s7577_s2  }
  0x6c   :  { %7560 = dma.done.wait [#allocation3], 256  }
  0x6d   :  { %7561 = vsyncadd [#allocation3], 4294967040 }
  0x6e   :  { %7562 = dma.done.wait [#allocation6], 512  }
  0x6f   :  { %7563 = vsyncadd [#allocation6], 4294966784 }
  0x70   :  { %7564 = dma.done.wait [#allocation9], 416  }
  0x71   :  { %7565 = vsyncadd [#allocation9], 4294966880 }
  0x72   :  { %7566 = dma.done.wait [#allocation12], 896  }
  0x73   :  { %7567 = vsyncadd [#allocation12], 4294966400 }
  0x74   :  { %7568 = dma.done.wait [#allocation15], 1024  }
  0x75   :  { %7569 = vsyncadd [#allocation15], 4294966272  ;;  %v10361_v0 = vlaneseq  ;;  %vm208_vm0 = vcmask 1045504   ;;  %v195_v2 = vld [vmem:[#allocation11 + $0x10] sm:$0x3f]  ;;  %v194_v4 = vld [vmem:[#allocation11 + $0x8] sm:$0xff] }
  0x76   :  { %v192_v3 = vld [vmem:[#allocation10 + $0x10] sm:$0x3f]  ;;  %6964 = vmatprep.subr.msk.mxu1 %vm208_vm0, %v195_v2  ;;  %v191_v5 = vld [vmem:[#allocation10 + $0x8] sm:$0xff]  ;;  %v193_v7 = vld [vmem:[#allocation11] sm:$0xff]  ;;  %vm201_vm1 = vcmask 179200   ;;  %vm713_vm2 = vcmask 261120  }
  0x77   :  { %v7743_v1 = vshrl.u32 %v10361_v0, 7  ;;  %6955 = vmatprep.subr.msk.mxu0 %vm208_vm0, %v192_v3  ;;  %6965 = vmatpush3.msk.msra.mxu1 %vm208_vm0, %v195_v2  ;;  %v190_v8 = vld [vmem:[#allocation10] sm:$0xff]  ;;  %v183_v10 = vld [vmem:[#allocation2] sm:$0xff]  ;;  %v184_v11 = vld [vmem:[#allocation2 + $0x8] sm:$0xff]  ;;  %v7585_v36 = vmov 1966171168  }
  0x78   :  { %6956 = vmatpush3.msk.msra.mxu0 %vm208_vm0, %v192_v3  ;;  %v185_v9 = vld [vmem:[#allocation5] sm:$0xff]  ;;  %6966 = vmatprep.subr.mxu1 %v194_v4  ;;  %v186_v17 = vld [vmem:[#allocation5 + $0x8] sm:$0xff]  ;;  %v373_v37 = vunpack.c.l.s4 %v7585_v36  ;;  %v196_v38 = vld [vmem:[%s10347_s6] sm:$0xf] }
  0x79   :  { %v7746_v6 = vsub.s32 0, %v7743_v1  ;;  %6957 = vmatprep.subr.mxu0 %v191_v5  ;;  %6967 = vmatpush3.msra.mxu1 %v194_v4  ;;  %v7750_v13 = vsub.s32 1, %v7743_v1  ;;  %v7753_v14 = vsub.s32 2, %v7743_v1  ;;  %v7760_v20 = vsub.s32 3, %v7743_v1 }
  0x7a   :  { %6958 = vmatpush3.msra.mxu0 %v191_v5  ;;  %6968 = vmatprep.subr.mxu1 %v193_v7  ;;  %v7765_v23 = vsub.s32 4, %v7743_v1  ;;  %v7770_v26 = vsub.s32 5, %v7743_v1  ;;  %v7775_v29 = vsub.s32 6, %v7743_v1  ;;  %v7780_v32 = vsub.s32 7, %v7743_v1 }
  0x7b   :  { %6959 = vmatprep.subr.mxu0 %v190_v8  ;;  %v815_v12 = vrot.slane %v185_v9, %v7746_v6  ;;  %6969 = vmatpush3.msra.mxu1 %v193_v7  ;;  %v826_v15 = vrot.slane %v185_v9, %v7750_v13  ;;  %v837_v16 = vrot.slane %v185_v9, %v7753_v14  ;;  %v374_v39 = vunpack.c.0.s8 %v373_v37 }
  0x7c   :  { %6970 = vmatprep.mubr.msk.f32.mxu1 %vm201_vm1, %v183_v10  ;;  %6960 = vmatpush3.msra.mxu0 %v190_v8  ;;  %v903_v18 = vrot.slane %v186_v17, %v7746_v6  ;;  %v914_v19 = vrot.slane %v186_v17, %v7750_v13  ;;  %v848_v21 = vrot.slane %v185_v9, %v7760_v20 }
  0x7d   :  { %6961 = vmatprep.mubr.msk.f32.mxu0 %vm201_vm1, %v183_v10  ;;  %6971 = vmatmul.mubr.msk.f32.vlgmr.msra.gmra.mxu1 %vm201_vm1, %v184_v11  ;;  %v925_v22 = vrot.slane %v186_v17, %v7753_v14  ;;  %v859_v24 = vrot.slane %v185_v9, %v7765_v23  ;;  %v936_v25 = vrot.slane %v186_v17, %v7760_v20 }
  0x7e   :  { %6962 = vmatmul.mubr.msk.f32.vlgmr.msra.gmra.mxu0 %vm201_vm1, %v184_v11  ;;  %821 = vbcast.lane.b32.xlu1 %v815_v12, 264  ;;  %v870_v27 = vrot.slane %v185_v9, %v7770_v26  ;;  %v947_v28 = vrot.slane %v186_v17, %v7765_v23  ;;  %v881_v30 = vrot.slane %v185_v9, %v7775_v29 }
  0x7f   :  { %817 = vbcast.lane.b32.xlu0 %v815_v12, 256  ;;  %v958_v31 = vrot.slane %v186_v17, %v7770_v26  ;;  %10521 = vst [vmem:[#allocation27_spill] sm:$0xff] %v7780_v32  ;;  %v892_v33 = vrot.slane %v185_v9, %v7780_v32  ;;  %v969_v34 = vrot.slane %v186_v17, %v7775_v29 }
  0x80   :  { %v980_v35 = vrot.slane %v186_v17, %v7780_v32  ;;  %v290_v40 = vrot.slane %v196_v38, %v7750_v13  ;;  %v200_v41 = vrot.slane %v196_v38, %v7746_v6  ;;  %v7791_v42 = vsub.s32 %v374_v39, %v7743_v1 }
  0x81   :  { %v7830_v8 = vrot.slane %v196_v38, %v7753_v14 }
  0x82   :  { %828 = vbcast.lane.b32.xlu1 %v826_v15, 256  ;;  %10522 = vst [vmem:[#allocation28_spill] sm:$0xff] %v7791_v42 }
  0x83   :  { %839 = vbcast.lane.b32.xlu0 %v837_v16, 256 }
  0x86   :  { %832 = vbcast.lane.b32.xlu1 %v826_v15, 264 }
  0x87   :  { %905 = vbcast.lane.b32.xlu0 %v903_v18, 256 }
  0x8a   :  { %843 = vbcast.lane.b32.xlu1 %v837_v16, 264 }
  0x8b   :  { %916 = vbcast.lane.b32.xlu0 %v914_v19, 256 }
  0x8e   :  { %909 = vbcast.lane.b32.xlu1 %v903_v18, 264 }
  0x8f   :  { %850 = vbcast.lane.b32.xlu0 %v848_v21, 256 }
  0x92   :  { %920 = vbcast.lane.b32.xlu1 %v914_v19, 264 }
  0x93   :  { %927 = vbcast.lane.b32.xlu0 %v925_v22, 256 }
  0x96   :  { %854 = vbcast.lane.b32.xlu1 %v848_v21, 264 }
  0x97   :  { %861 = vbcast.lane.b32.xlu0 %v859_v24, 256 }
  0x9a   :  { %931 = vbcast.lane.b32.xlu1 %v925_v22, 264 }
  0x9b   :  { %938 = vbcast.lane.b32.xlu0 %v936_v25, 256 }
  0x9e   :  { %865 = vbcast.lane.b32.xlu1 %v859_v24, 264 }
  0x9f   :  { %872 = vbcast.lane.b32.xlu0 %v870_v27, 256 }
  0xa2   :  { %942 = vbcast.lane.b32.xlu1 %v936_v25, 264 }
  0xa3   :  { %949 = vbcast.lane.b32.xlu0 %v947_v28, 256 }
  0xa6   :  { %876 = vbcast.lane.b32.xlu1 %v870_v27, 264 }
  0xa7   :  { %883 = vbcast.lane.b32.xlu0 %v881_v30, 256 }
  0xaa   :  { %953 = vbcast.lane.b32.xlu1 %v947_v28, 264 }
  0xab   :  { %960 = vbcast.lane.b32.xlu0 %v958_v31, 256 }
  0xae   :  { %887 = vbcast.lane.b32.xlu1 %v881_v30, 264 }
  0xaf   :  { %894 = vbcast.lane.b32.xlu0 %v892_v33, 256 }
  0xb2   :  { %964 = vbcast.lane.b32.xlu1 %v958_v31, 264 }
  0xb3   :  { %971 = vbcast.lane.b32.xlu0 %v969_v34, 256 }
  0xb6   :  { %898 = vbcast.lane.b32.xlu1 %v892_v33, 264 }
  0xb7   :  { %982 = vbcast.lane.b32.xlu0 %v980_v35, 256 }
  0xba   :  { %975 = vbcast.lane.b32.xlu1 %v969_v34, 264 }
  0xbe   :  { %986 = vbcast.lane.b32.xlu1 %v980_v35, 264 }
 0x13d   :  { %v6972_v43 = vpop.f32.mrf.mxu1 }
 0x13e   :  { %v6963_v44 = vpop.f32.mrf.mxu0  ;;  %v366_v45 = vadd.f32 %v6972_v43, %v290_v40 }
 0x13f   :  { %v7793_v46 = vadd.f32 %v6963_v44, %v200_v41  ;;  %v360_v47 = vpop.f32.mrf.mxu1 }
 0x140   :  { %v278_v48 = vpop.f32.mrf.mxu0  ;;  %v420_v49 = vcombine.high %v366_v45, %v366_v45  ;;  %v427_v50 = vrot.slane %v366_v45, %v7791_v42  ;;  %v361_v51 = vadd.f32 %v360_v47, %v290_v40 }
 0x141   :  { %v7796_v52 = vadd.f32 %v278_v48, %v200_v41  ;;  %6973 = vmatprep.subr.mxu1 %v7793_v46 }
 0x142   :  { %6974 = vmatpush3.msra.mxu1 %v7793_v46  ;;  %v7801_v53 = vrot.slane %v420_v49, %v7791_v42  ;;  %v435_v54 = vcombine.high %v427_v50, %v427_v50  ;;  %v443_v55 = vrot.slane %v427_v50, %v7791_v42  ;;  %v371_v56 = vcombine.high %v361_v51, %v361_v51 }
 0x143   :  { %6975 = vmatprep.subr.mxu1 %v7796_v52  ;;  %v378_v57 = vrot.slane %v361_v51, %v7791_v42 }
 0x144   :  { %6976 = vmatpush3.msra.mxu1 %v7796_v52  ;;  %v7808_v58 = vrot.slane %v435_v54, %v7791_v42  ;;  %v465_v59 = vcombine.high %v443_v55, %v443_v55  ;;  %v504_v60 = vrot.slane %v443_v55, %v7746_v6  ;;  %v7816_v63 = vrot.slane %v7801_v53, %v7791_v42 }
 0x145   :  { %v386_v61 = vcombine.high %v378_v57, %v378_v57  ;;  %v7812_v62 = vrot.slane %v378_v57, %v7791_v42  ;;  %v7819_v2 = vrot.slane %v371_v56, %v7791_v42 }
 0x146   :  { %v508_v3 = vrot.slane %v7808_v58, %v7746_v6  ;;  %v512_v4 = vrot.slane %v465_v59, %v7746_v6  ;;  %v566_v9 = vadd.f32 %v504_v60, %v7793_v46  ;;  %v7835_v10 = vrot.slane %v7816_v63, %v7746_v6 }
 0x147   :  { %v7825_v5 = vrot.slane %v386_v61, %v7791_v42  ;;  %v472_v7 = vrot.slane %v7812_v62, %v7746_v6  ;;  %v7839_v11 = vrot.slane %v7819_v2, %v7791_v42  ;;  %v565_v12 = vadd.f32 %v504_v60, %v7796_v52 }
 0x148   :  { %vm598_vm3 = vcmp.gt.f32.partialorder %v566_v9, 0.0  ;;  %v630_v16 = vmul.f32 0.2, %v566_v9  ;;  %v568_v17 = vadd.f32 %v508_v3, %v7793_v46  ;;  %v570_v21 = vadd.f32 %v512_v4, %v7793_v46 }
 0x149   :  { %v476_v15 = vrot.slane %v7825_v5, %v7746_v6  ;;  %vm597_vm4 = vcmp.gt.f32.partialorder %v565_v12, 0.0  ;;  %v629_v18 = vmul.f32 0.2, %v565_v12  ;;  %v549_v19 = vadd.f32 %v472_v7, %v7796_v52 }
 0x14a   :  { %v662_v22 = vsel %vm598_vm3, %v566_v9, %v630_v16  ;;  %vm600_vm5 = vcmp.gt.f32.partialorder %v568_v17, 0.0  ;;  %v632_v24 = vmul.f32 0.2, %v568_v17  ;;  %v550_v25 = vadd.f32 %v472_v7, %v7793_v46 }
 0x14b   :  { %v698_v27 = vmul.f32 %v7830_v8, %v662_v22  ;;  %v661_v28 = vsel %vm597_vm4, %v565_v12, %v629_v18  ;;  %vm581_vm6 = vcmp.gt.f32.partialorder %v549_v19, 0.0  ;;  %v613_v30 = vmul.f32 0.2, %v549_v19 }
 0x14c   :  { %v697_v31 = vmul.f32 %v7830_v8, %v661_v28  ;;  %v664_v33 = vsel %vm600_vm5, %v568_v17, %v632_v24  ;;  %vm602_vm7 = vcmp.gt.f32.partialorder %v570_v21, 0.0  ;;  %v634_v34 = vmul.f32 0.2, %v570_v21 }
 0x14d   :  { %v765_v35 = vsel %vm713_vm2, %v698_v27, 0.0  ;;  %v700_v36 = vmul.f32 %v7830_v8, %v664_v33  ;;  %v645_v37 = vsel %vm581_vm6, %v549_v19, %v613_v30  ;;  %vm582_vm8 = vcmp.gt.f32.partialorder %v550_v25, 0.0 }
 0x14e   :  { %766 = vadd.xlane.f32.xlu1 %v765_v35  ;;  %v762_v38 = vsel %vm713_vm2, %v697_v31, 0.0  ;;  %v681_v39 = vmul.f32 %v7830_v8, %v645_v37  ;;  %v666_v40 = vsel %vm602_vm7, %v570_v21, %v634_v34  ;;  %v614_v41 = vmul.f32 0.2, %v550_v25 }
 0x14f   :  { %v416_v43 = vcombine.high %v7812_v62, %v7812_v62  ;;  %763 = vadd.xlane.f32.xlu0 %v762_v38  ;;  %v771_v44 = vsel %vm713_vm2, %v700_v36, 0.0  ;;  %v574_v45 = vadd.f32 %v7835_v10, %v7793_v46  ;;  %v567_v47 = vadd.f32 %v508_v3, %v7796_v52 }
 0x150   :  { %v702_v48 = vmul.f32 %v7830_v8, %v666_v40  ;;  %v646_v49 = vsel %vm582_vm8, %v550_v25, %v614_v41  ;;  %v551_v50 = vadd.f32 %v476_v15, %v7796_v52  ;;  %v569_v51 = vadd.f32 %v512_v4, %v7796_v52 }
 0x151   :  { %v714_v54 = vsel %vm713_vm2, %v681_v39, 0.0  ;;  %v682_v55 = vmul.f32 %v7830_v8, %v646_v49  ;;  %vm606_vm9 = vcmp.gt.f32.partialorder %v574_v45, 0.0  ;;  %v638_v56 = vmul.f32 0.2, %v574_v45 }
 0x152   :  { %772 = vadd.xlane.f32.xlu1 %v771_v44  ;;  %vm599_vm10 = vcmp.gt.f32.partialorder %v567_v47, 0.0  ;;  %v631_v57 = vmul.f32 0.2, %v567_v47  ;;  %vm583_vm11 = vcmp.gt.f32.partialorder %v551_v50, 0.0  ;;  %v615_v59 = vmul.f32 0.2, %v551_v50 }
 0x153   :  { %v436_v60 = vcombine.high %v7801_v53, %v7801_v53  ;;  %v488_v61 = vrot.slane %v7839_v11, %v7746_v6  ;;  %715 = vadd.xlane.f32.xlu0 %v714_v54  ;;  %v670_v62 = vsel %vm606_vm9, %v574_v45, %v638_v56  ;;  %v633_v3 = vmul.f32 0.2, %v569_v51 }
 0x154   :  { %v480_v4 = vrot.slane %v416_v43, %v7746_v6  ;;  %v663_v7 = vsel %vm599_vm10, %v567_v47, %v631_v57  ;;  %vm601_vm12 = vcmp.gt.f32.partialorder %v569_v51, 0.0  ;;  %v552_v9 = vadd.f32 %v476_v15, %v7793_v46 }
 0x155   :  { %v777_v12 = vsel %vm713_vm2, %v702_v48, 0.0  ;;  %v706_v16 = vmul.f32 %v7830_v8, %v670_v62  ;;  %v647_v17 = vsel %vm583_vm11, %v551_v50, %v615_v59  ;;  %v573_v53 = vadd.f32 %v7835_v10, %v7796_v52 }
 0x156   :  { %778 = vadd.xlane.f32.xlu1 %v777_v12  ;;  %v717_v18 = vsel %vm713_vm2, %v682_v55, 0.0  ;;  %v699_v19 = vmul.f32 %v7830_v8, %v663_v7  ;;  %vm584_vm13 = vcmp.gt.f32.partialorder %v552_v9, 0.0  ;;  %v616_v21 = vmul.f32 0.2, %v552_v9 }
 0x157   :  { %v7878_v22 = vrot.slane %v436_v60, %v7791_v42  ;;  %v467_v15 = vcombine.high %v7808_v58, %v7808_v58  ;;  %718 = vadd.xlane.f32.xlu0 %v717_v18  ;;  %v665_v24 = vsel %vm601_vm12, %v569_v51, %v633_v3  ;;  %v637_v25 = vmul.f32 0.2, %v573_v53 }
 0x158   :  { %v683_v27 = vmul.f32 %v7830_v8, %v647_v17  ;;  %vm605_vm14 = vcmp.gt.f32.partialorder %v573_v53, 0.0  ;;  %v554_v10 = vadd.f32 %v480_v4, %v7793_v46  ;;  %v553_v28 = vadd.f32 %v480_v4, %v7796_v52 }
 0x159   :  { %v789_v30 = vsel %vm713_vm2, %v706_v16, 0.0  ;;  %v648_v31 = vsel %vm584_vm13, %v552_v9, %v616_v21  ;;  %v558_v33 = vadd.f32 %v488_v61, %v7793_v46  ;;  %v557_v34 = vadd.f32 %v488_v61, %v7796_v52 }
 0x15a   :  { %790 = vadd.xlane.f32.xlu1 %v789_v30  ;;  %v768_v58 = vsel %vm713_vm2, %v699_v19, 0.0  ;;  %v701_v35 = vmul.f32 %v7830_v8, %v665_v24  ;;  %vm586_vm15 = vcmp.gt.f32.partialorder %v554_v10, 0.0  ;;  %v618_v36 = vmul.f32 0.2, %v554_v10 }
 0x15b   :  { %v466_v37 = vcombine.high %v7816_v63, %v7816_v63  ;;  %769 = vadd.xlane.f32.xlu0 %v768_v58  ;;  %v669_v38 = vsel %vm605_vm14, %v573_v53, %v637_v25  ;;  %v617_v39 = vmul.f32 0.2, %v553_v28  ;;  %v720_v40 = vsel %vm713_vm2, %v683_v27, 0.0 }
 0x15c   :  { %v684_v41 = vmul.f32 %v7830_v8, %v648_v31  ;;  %vm585_vm0 = vcmp.gt.f32.partialorder %v553_v28, 0.0  ;;  %v622_v43 = vmul.f32 0.2, %v558_v33  ;;  %v650_v44 = vsel %vm586_vm15, %v554_v10, %v618_v36 }
 0x15d   :  { %vm590_vm1 = vcmp.gt.f32.partialorder %v558_v33, 0.0  ;;  %v621_v45 = vmul.f32 0.2, %v557_v34  ;;  %v516_v47 = vrot.slane %v467_v15, %v7746_v6  ;;  %v774_v48 = vsel %vm713_vm2, %v701_v35, 0.0 }
 0x15e   :  { %721 = vadd.xlane.f32.xlu1 %v720_v40  ;;  %v705_v49 = vmul.f32 %v7830_v8, %v669_v38  ;;  %vm589_vm3 = vcmp.gt.f32.partialorder %v557_v34, 0.0  ;;  %v524_v63 = vrot.slane %v7878_v22, %v7746_v6  ;;  %v387_v50 = vcombine.high %v7819_v2, %v7819_v2 }
 0x15f   :  { %775 = vadd.xlane.f32.xlu0 %v774_v48  ;;  %v649_v51 = vsel %vm585_vm0, %v553_v28, %v617_v39  ;;  %v572_v54 = vadd.f32 %v516_v47, %v7793_v46  ;;  %v571_v55 = vadd.f32 %v516_v47, %v7796_v52  ;;  %v418_v56 = vcombine.high %v7825_v5, %v7825_v5 }
 0x160   :  { %v686_v57 = vmul.f32 %v7830_v8, %v650_v44  ;;  %v654_v59 = vsel %vm590_vm1, %v558_v33, %v622_v43  ;;  %v576_v60 = vadd.f32 %v524_v63, %v7793_v46  ;;  %v723_v61 = vsel %vm713_vm2, %v684_v41, 0.0 }
 0x161   :  { %v653_v62 = vsel %vm589_vm3, %v557_v34, %v621_v45  ;;  %v636_v3 = vmul.f32 0.2, %v572_v54  ;;  %v575_v2 = vadd.f32 %v524_v63, %v7796_v52  ;;  %v786_v4 = vsel %vm713_vm2, %v705_v49, 0.0 }
 0x162   :  { %724 = vadd.xlane.f32.xlu1 %v723_v61  ;;  %v685_v7 = vmul.f32 %v7830_v8, %v649_v51  ;;  %vm604_vm4 = vcmp.gt.f32.partialorder %v572_v54, 0.0  ;;  %v635_v9 = vmul.f32 0.2, %v571_v55  ;;  %v7912_v5 = vrot.slane %v387_v50, %v7791_v42 }
 0x163   :  { %787 = vadd.xlane.f32.xlu0 %v786_v4  ;;  %v690_v12 = vmul.f32 %v7830_v8, %v654_v59  ;;  %vm603_vm5 = vcmp.gt.f32.partialorder %v571_v55, 0.0  ;;  %v528_v16 = vrot.slane %v466_v37, %v7746_v6  ;;  %v729_v17 = vsel %vm713_vm2, %v686_v57, 0.0  ;;  %v7950_v4 = vpop.permute.xlu1 %821 }
 0x164   :  { %v689_v53 = vmul.f32 %v7830_v8, %v653_v62  ;;  %vm608_vm6 = vcmp.gt.f32.partialorder %v576_v60, 0.0  ;;  %v640_v18 = vmul.f32 0.2, %v576_v60  ;;  %v668_v19 = vsel %vm604_vm4, %v572_v54, %v636_v3  ;;  %10523 = vst [vmem:[#allocation29_spill] sm:$0xff] %v7950_v4 }
 0x165   :  { %v639_v21 = vmul.f32 0.2, %v575_v2  ;;  %v578_v15 = vadd.f32 %v528_v16, %v7793_v46  ;;  %v484_v24 = vrot.slane %v418_v56, %v7746_v6  ;;  %v726_v25 = vsel %vm713_vm2, %v685_v7, 0.0 }
 0x166   :  { %730 = vadd.xlane.f32.xlu1 %v729_v17  ;;  %v667_v27 = vsel %vm603_vm5, %v571_v55, %v635_v9  ;;  %vm607_vm7 = vcmp.gt.f32.partialorder %v575_v2, 0.0  ;;  %v577_v10 = vadd.f32 %v528_v16, %v7796_v52  ;;  %v417_v28 = vcombine.high %v7839_v11, %v7839_v11 }
 0x167   :  { %727 = vadd.xlane.f32.xlu0 %v726_v25  ;;  %v741_v30 = vsel %vm713_vm2, %v690_v12, 0.0  ;;  %v738_v31 = vsel %vm713_vm2, %v689_v53, 0.0  ;;  %v704_v33 = vmul.f32 %v7830_v8, %v668_v19  ;;  %v672_v34 = vsel %vm608_vm6, %v576_v60, %v640_v18 }
 0x168   :  { %v703_v58 = vmul.f32 %v7830_v8, %v667_v27  ;;  %v671_v35 = vsel %vm607_vm7, %v575_v2, %v639_v21  ;;  %v642_v36 = vmul.f32 0.2, %v578_v15  ;;  %v556_v37 = vadd.f32 %v484_v24, %v7793_v46 }
 0x169   :  { %vm610_vm8 = vcmp.gt.f32.partialorder %v578_v15, 0.0  ;;  %v641_v38 = vmul.f32 0.2, %v577_v10  ;;  %v555_v11 = vadd.f32 %v484_v24, %v7796_v52  ;;  %v492_v39 = vrot.slane %v7912_v5, %v7746_v6 }
 0x16a   :  { %742 = vadd.xlane.f32.xlu1 %v741_v30  ;;  %vm609_vm9 = vcmp.gt.f32.partialorder %v577_v10, 0.0  ;;  %v468_v40 = vcombine.high %v7878_v22, %v7878_v22  ;;  %v783_v41 = vsel %vm713_vm2, %v704_v33, 0.0  ;;  %v708_v43 = vmul.f32 %v7830_v8, %v672_v34 }
 0x16b   :  { %739 = vadd.xlane.f32.xlu0 %v738_v31  ;;  %v707_v44 = vmul.f32 %v7830_v8, %v671_v35  ;;  %v780_v45 = vsel %vm713_vm2, %v703_v58, 0.0  ;;  %v674_v47 = vsel %vm610_vm8, %v578_v15, %v642_v36  ;;  %vm588_vm10 = vcmp.gt.f32.partialorder %v556_v37, 0.0 }
 0x16c   :  { %v620_v48 = vmul.f32 0.2, %v556_v37  ;;  %v673_v49 = vsel %vm609_vm9, %v577_v10, %v641_v38  ;;  %v619_v63 = vmul.f32 0.2, %v555_v11  ;;  %v560_v50 = vadd.f32 %v492_v39, %v7793_v46  ;;  %v7960_v10 = vpop.permute.xlu1 %828 }
 0x16d   :  { %v496_v51 = vrot.slane %v417_v28, %v7746_v6  ;;  %vm587_vm11 = vcmp.gt.f32.partialorder %v555_v11, 0.0  ;;  %v559_v22 = vadd.f32 %v492_v39, %v7796_v52  ;;  %v419_v54 = vcombine.high %v7912_v5, %v7912_v5  ;;  %10524 = vst [vmem:[#allocation30_spill] sm:$0xff] %v7960_v10 }
 0x16e   :  { %784 = vadd.xlane.f32.xlu1 %v783_v41  ;;  %v710_v55 = vmul.f32 %v7830_v8, %v674_v47  ;;  %v795_v56 = vsel %vm713_vm2, %v708_v43, 0.0  ;;  %v792_v57 = vsel %vm713_vm2, %v707_v44, 0.0  ;;  %v709_v59 = vmul.f32 %v7830_v8, %v673_v49 }
 0x16f   :  { %781 = vadd.xlane.f32.xlu0 %v780_v45  ;;  %v652_v60 = vsel %vm588_vm10, %v556_v37, %v620_v48  ;;  %v651_v61 = vsel %vm587_vm11, %v555_v11, %v619_v63  ;;  %v624_v62 = vmul.f32 0.2, %v560_v50  ;;  %v562_v3 = vadd.f32 %v496_v51, %v7793_v46  ;;  %v7974_v48 = vpop.permute.xlu0 %817 }
 0x170   :  { %v532_v2 = vrot.slane %v468_v40, %v7746_v6  ;;  %vm592_vm12 = vcmp.gt.f32.partialorder %v560_v50, 0.0  ;;  %v623_v7 = vmul.f32 0.2, %v559_v22  ;;  %v561_v9 = vadd.f32 %v496_v51, %v7796_v52  ;;  %v7972_v45 = vpop.permute.xlu1 %832  ;;  %10526 = vst [vmem:[#allocation32_spill] sm:$0xff] %v7974_v48 }
 0x171   :  { %v801_v5 = vsel %vm713_vm2, %v710_v55, 0.0  ;;  %vm591_vm13 = vcmp.gt.f32.partialorder %v559_v22, 0.0  ;;  %v798_v12 = vsel %vm713_vm2, %v709_v59, 0.0  ;;  %v688_v16 = vmul.f32 %v7830_v8, %v652_v60  ;;  %10525 = vst [vmem:[#allocation31_spill] sm:$0xff] %v7972_v45 }
 0x172   :  { %796 = vadd.xlane.f32.xlu1 %v795_v56  ;;  %v687_v17 = vmul.f32 %v7830_v8, %v651_v61  ;;  %v656_v53 = vsel %vm592_vm12, %v560_v50, %v624_v62  ;;  %v626_v18 = vmul.f32 0.2, %v562_v3  ;;  %v580_v19 = vadd.f32 %v532_v2, %v7793_v46 }
 0x173   :  { %793 = vadd.xlane.f32.xlu0 %v792_v57  ;;  %v500_v21 = vrot.slane %v419_v54, %v7746_v6  ;;  %v7586_v15 = vmov 0   ;;  %v655_v24 = vsel %vm591_vm13, %v559_v22, %v623_v7  ;;  %vm594_vm14 = vcmp.gt.f32.partialorder %v562_v3, 0.0  ;;  %v7984_v57 = vpop.permute.xlu0 %839 }
 0x174   :  { %7116 = vset.pattern.permute.xlu0 %v7586_v15  ;;  %v625_v25 = vmul.f32 0.2, %v561_v9  ;;  %v579_v27 = vadd.f32 %v532_v2, %v7796_v52  ;;  %7115 = vset.pattern.permute.xlu1 %v7586_v15  ;;  %vm593_vm15 = vcmp.gt.f32.partialorder %v561_v9, 0.0  ;;  %v735_v28 = vsel %vm713_vm2, %v688_v16, 0.0  ;;  %v7980_v54 = vpop.permute.xlu1 %843  ;;  %10528 = vst [vmem:[#allocation34_spill] sm:$0xff] %v7984_v57 }
 0x175   :  { %v732_v30 = vsel %vm713_vm2, %v687_v17, 0.0  ;;  %v692_v31 = vmul.f32 %v7830_v8, %v656_v53  ;;  %v691_v33 = vmul.f32 %v7830_v8, %v655_v24  ;;  %v658_v34 = vsel %vm594_vm14, %v562_v3, %v626_v18  ;;  %10527 = vst [vmem:[#allocation33_spill] sm:$0xff] %v7980_v54 }
 0x176   :  { %802 = vadd.xlane.f32.xlu1 %v801_v5  ;;  %v644_v58 = vmul.f32 0.2, %v580_v19  ;;  %v564_v35 = vadd.f32 %v500_v21, %v7793_v46  ;;  %v657_v36 = vsel %vm593_vm15, %v561_v9, %v625_v25  ;;  %vm612_vm0 = vcmp.gt.f32.partialorder %v580_v19, 0.0 }
 0x177   :  { %799 = vadd.xlane.f32.xlu0 %v798_v12  ;;  %v643_v37 = vmul.f32 0.2, %v579_v27  ;;  %v563_v38 = vadd.f32 %v500_v21, %v7796_v52  ;;  %vm611_vm1 = vcmp.gt.f32.partialorder %v579_v27, 0.0  ;;  %v747_v11 = vsel %vm713_vm2, %v692_v31, 0.0  ;;  %v7992_v2 = vpop.permute.xlu0 %905 }
 0x178   :  { %v694_v39 = vmul.f32 %v7830_v8, %v658_v34  ;;  %v744_v40 = vsel %vm713_vm2, %v691_v33, 0.0  ;;  %v693_v41 = vmul.f32 %v7830_v8, %v657_v36  ;;  %v676_v43 = vsel %vm612_vm0, %v580_v19, %v644_v58  ;;  %v7990_v3 = vpop.permute.xlu1 %909  ;;  %10530 = vst [vmem:[#allocation36_spill] sm:$0xff] %v7992_v2 }
 0x179   :  { %v628_v44 = vmul.f32 0.2, %v564_v35  ;;  %v675_v46 = vsel %vm611_vm1, %v579_v27, %v643_v37  ;;  %vm596_vm3 = vcmp.gt.f32.partialorder %v564_v35, 0.0  ;;  %v627_v47 = vmul.f32 0.2, %v563_v38  ;;  %10529 = vst [vmem:[#allocation35_spill] sm:$0xff] %v7990_v3 }
 0x17a   :  { %736 = vadd.xlane.f32.xlu1 %v735_v28  ;;  %vm595_vm4 = vcmp.gt.f32.partialorder %v563_v38, 0.0  ;;  %v753_v52 = vsel %vm713_vm2, %v694_v39, 0.0  ;;  %v712_v49 = vmul.f32 %v7830_v8, %v676_v43  ;;  %v750_v63 = vsel %vm713_vm2, %v693_v41, 0.0 }
 0x17b   :  { %733 = vadd.xlane.f32.xlu0 %v732_v30  ;;  %v711_v50 = vmul.f32 %v7830_v8, %v675_v46  ;;  %v660_v51 = vsel %vm596_vm3, %v564_v35, %v628_v44  ;;  %v659_v22 = vsel %vm595_vm4, %v563_v38, %v627_v47  ;;  %v7996_v9 = vpop.permute.xlu0 %916  ;;  %vm1191_vm5 = vcmask 130112  }
 0x17c   :  { %v807_v55 = vsel %vm713_vm2, %v712_v49, 0.0  ;;  %v696_v56 = vmul.f32 %v7830_v8, %v660_v51  ;;  %v695_v60 = vmul.f32 %v7830_v8, %v659_v22  ;;  %v7994_v7 = vpop.permute.xlu1 %920  ;;  %10532 = vst [vmem:[#allocation38_spill] sm:$0xff] %v7996_v9  ;;  %vm1328_vm6 = vcmask 1041409  }
 0x17d   :  { %v804_v59 = vsel %vm713_vm2, %v711_v50, 0.0  ;;  %10531 = vst [vmem:[#allocation37_spill] sm:$0xff] %v7994_v7  ;;  %vm1330_vm7 = vcmask 1042434   ;;  %vm1332_vm8 = vcmask 1043459   ;;  %vm1334_vm9 = vcmask 1044484  }
 0x17e   :  { %748 = vadd.xlane.f32.xlu1 %v747_v11  ;;  %v759_v61 = vsel %vm713_vm2, %v696_v56, 0.0  ;;  %v756_v62 = vsel %vm713_vm2, %v695_v60, 0.0  ;;  %vm1336_vm10 = vcmask 1045509   ;;  %vm1340_vm11 = vcmask 1047559  }
 0x17f   :  { %745 = vadd.xlane.f32.xlu0 %v744_v40  ;;  %v8000_v12 = vpop.permute.xlu0 %850  ;;  %vm1338_vm12 = vcmask 1046534   ;;  %vm1351_vm13 = vcmask 130048  }
 0x180   :  { %v7998_v5 = vpop.permute.xlu1 %854  ;;  %10534 = vst [vmem:[#allocation40_spill] sm:$0xff] %v8000_v12 }
 0x181   :  { %10533 = vst [vmem:[#allocation39_spill] sm:$0xff] %v7998_v5 }
 0x182   :  { %754 = vadd.xlane.f32.xlu1 %v753_v52 }
 0x183   :  { %751 = vadd.xlane.f32.xlu0 %v750_v63  ;;  %v8004_v16 = vpop.permute.xlu0 %927 }
 0x184   :  { %v8002_v8 = vpop.permute.xlu1 %931  ;;  %10536 = vst [vmem:[#allocation42_spill] sm:$0xff] %v8004_v16 }
 0x185   :  { %10535 = vst [vmem:[#allocation41_spill] sm:$0xff] %v8002_v8 }
 0x186   :  { %808 = vadd.xlane.f32.xlu1 %v807_v55 }
 0x187   :  { %805 = vadd.xlane.f32.xlu0 %v804_v59  ;;  %v8008_v53 = vpop.permute.xlu0 %861 }
 0x188   :  { %v8006_v17 = vpop.permute.xlu1 %865  ;;  %10538 = vst [vmem:[#allocation44_spill] sm:$0xff] %v8008_v53 }
 0x189   :  { %10537 = vst [vmem:[#allocation43_spill] sm:$0xff] %v8006_v17 }
 0x18a   :  { %760 = vadd.xlane.f32.xlu1 %v759_v61 }
 0x18b   :  { %757 = vadd.xlane.f32.xlu0 %v756_v62  ;;  %v8012_v19 = vpop.permute.xlu0 %938 }
 0x18c   :  { %v8010_v18 = vpop.permute.xlu1 %942  ;;  %10540 = vst [vmem:[#allocation46_spill] sm:$0xff] %v8012_v19 }
 0x18d   :  { %10539 = vst [vmem:[#allocation45_spill] sm:$0xff] %v8010_v18 }
 0x18f   :  { %v8016_v15 = vpop.permute.xlu0 %872 }
 0x190   :  { %v8014_v21 = vpop.permute.xlu1 %876  ;;  %10542 = vst [vmem:[#allocation48_spill] sm:$0xff] %v8016_v15 }
 0x191   :  { %10541 = vst [vmem:[#allocation47_spill] sm:$0xff] %v8014_v21 }
 0x193   :  { %v8020_v25 = vpop.permute.xlu0 %949 }
 0x194   :  { %v8018_v24 = vpop.permute.xlu1 %953  ;;  %10544 = vst [vmem:[#allocation50_spill] sm:$0xff] %v8020_v25 }
 0x195   :  { %10543 = vst [vmem:[#allocation49_spill] sm:$0xff] %v8018_v24 }
 0x197   :  { %v8024_v28 = vpop.permute.xlu0 %883 }
 0x198   :  { %v8022_v27 = vpop.permute.xlu1 %887  ;;  %10546 = vst [vmem:[#allocation52_spill] sm:$0xff] %v8024_v28 }
 0x199   :  { %10545 = vst [vmem:[#allocation51_spill] sm:$0xff] %v8022_v27 }
 0x19b   :  { %v8028_v31 = vpop.permute.xlu0 %960 }
 0x19c   :  { %v8026_v30 = vpop.permute.xlu1 %964  ;;  %10548 = vst [vmem:[#allocation54_spill] sm:$0xff] %v8028_v31 }
 0x19d   :  { %10547 = vst [vmem:[#allocation53_spill] sm:$0xff] %v8026_v30 }
 0x19f   :  { %v8032_v34 = vpop.permute.xlu0 %894 }
 0x1a0   :  { %v8030_v33 = vpop.permute.xlu1 %898  ;;  %10550 = vst [vmem:[#allocation56_spill] sm:$0xff] %v8032_v34 }
 0x1a1   :  { %10549 = vst [vmem:[#allocation55_spill] sm:$0xff] %v8030_v33 }
 0x1a3   :  { %v8036_v35 = vpop.permute.xlu0 %971 }
 0x1a4   :  { %v8034_v58 = vpop.permute.xlu1 %975  ;;  %10552 = vst [vmem:[#allocation58_spill] sm:$0xff] %v8036_v35 }
 0x1a5   :  { %10551 = vst [vmem:[#allocation57_spill] sm:$0xff] %v8034_v58 }
 0x1a7   :  { %v8040_v37 = vpop.permute.xlu0 %982 }
 0x1a8   :  { %v8038_v36 = vpop.permute.xlu1 %986  ;;  %10554 = vst [vmem:[#allocation60_spill] sm:$0xff] %v8040_v37 }
 0x1a9   :  { %10553 = vst [vmem:[#allocation59_spill] sm:$0xff] %v8038_v36 }
 0x1d7   :  { %v767_v38 = vpop.xlane.xlu1 %766 }
 0x1d8   :  { %v8043_v11 = vadd.f32 %v7990_v3, %v767_v38  ;;  %v764_v39 = vpop.xlane.xlu0 %763 }
 0x1d9   :  { %v8046_v40 = vadd.f32 %v7992_v2, %v764_v39 }
 0x1da   :  { %1136 = vperm.xlu0 %7116, %v8043_v11  }
 0x1db   :  { %1133 = vperm.xlu1 %7115, %v8046_v40   ;;  %v773_v41 = vpop.xlane.xlu1 %772 }
 0x1dc   :  { %v716_v43 = vpop.xlane.xlu0 %715  ;;  %v8055_v52 = vadd.f32 %v7994_v7, %v773_v41 }
 0x1dd   :  { %v8051_v44 = vadd.f32 %v7974_v48, %v716_v43 }
 0x1df   :  { %1085 = vperm.xlu0 %7116, %v8051_v44   ;;  %v779_v46 = vpop.xlane.xlu1 %778 }
 0x1e0   :  { %v719_v47 = vpop.xlane.xlu0 %718  ;;  %v8063_v51 = vadd.f32 %v8002_v8, %v779_v46 }
 0x1e1   :  { %v8058_v49 = vadd.f32 %v7950_v4, %v719_v47  ;;  %v10566_v4 = vlaneseq }
 0x1e3   :  { %1142 = vperm.xlu0 %7116, %v8055_v52   ;;  %1088 = vperm.xlu1 %7115, %v8058_v49   ;;  %v791_v63 = vpop.xlane.xlu1 %790  ;;  %v1181_v2 = vand.u32 127, %v10566_v4 }
 0x1e4   :  { %v770_v50 = vpop.xlane.xlu0 %769  ;;  %v8071_v59 = vadd.f32 %v8018_v24, %v791_v63 }
 0x1e5   :  { %v8066_v22 = vadd.f32 %v7996_v9, %v770_v50 }
 0x1e7   :  { %1148 = vperm.xlu0 %7116, %v8063_v51   ;;  %1139 = vperm.xlu1 %7115, %v8066_v22   ;;  %v722_v55 = vpop.xlane.xlu1 %721 }
 0x1e8   :  { %v776_v56 = vpop.xlane.xlu0 %775  ;;  %v8090_v47 = vadd.f32 %v7960_v10, %v722_v55 }
 0x1e9   :  { %v8074_v60 = vadd.f32 %v8004_v16, %v776_v56 }
 0x1eb   :  { %1160 = vperm.xlu0 %7116, %v8071_v59   ;;  %1145 = vperm.xlu1 %7115, %v8074_v60   ;;  %v725_v61 = vpop.xlane.xlu1 %724 }
 0x1ec   :  { %v8079_v62 = vadd.f32 %v7972_v45, %v725_v61  ;;  %v788_v38 = vpop.xlane.xlu0 %787 }
 0x1ed   :  { %v8082_v39 = vadd.f32 %v8020_v25, %v788_v38 }
 0x1ef   :  { %1094 = vperm.xlu0 %7116, %v8079_v62   ;;  %1157 = vperm.xlu1 %7115, %v8082_v39   ;;  %v731_v41 = vpop.xlane.xlu1 %730 }
 0x1f0   :  { %v8087_v43 = vadd.f32 %v7980_v54, %v731_v41  ;;  %v728_v46 = vpop.xlane.xlu0 %727 }
 0x1f1   :  { %v8098_v61 = vadd.f32 %v7984_v57, %v728_v46 }
 0x1f3   :  { %1100 = vperm.xlu0 %7116, %v8087_v43   ;;  %1091 = vperm.xlu1 %7115, %v8090_v47   ;;  %v743_v63 = vpop.xlane.xlu1 %742 }
 0x1f4   :  { %v8095_v50 = vadd.f32 %v8006_v17, %v743_v63  ;;  %v740_v56 = vpop.xlane.xlu0 %739 }
 0x1f5   :  { %v8106_v0 = vadd.f32 %v8008_v53, %v740_v56 }
 0x1f6   :  { %10555 = vst [vmem:[#allocation61_spill] sm:$0xff] %v8095_v50 }
 0x1f7   :  { %1112 = vperm.xlu0 %7116, %v8095_v50   ;;  %1097 = vperm.xlu1 %7115, %v8098_v61   ;;  %v785_v38 = vpop.xlane.xlu1 %784  ;;  %10556 = vst [vmem:[#allocation62_spill] sm:$0xff] %v8106_v0 }
 0x1f8   :  { %v8103_v55 = vadd.f32 %v8010_v18, %v785_v38  ;;  %v782_v41 = vpop.xlane.xlu0 %781 }
 0x1f9   :  { %v8114_v57 = vadd.f32 %v8012_v19, %v782_v41 }
 0x1fb   :  { %1154 = vperm.xlu0 %7116, %v8103_v55   ;;  %1109 = vperm.xlu1 %7115, %v8106_v0   ;;  %v797_v63 = vpop.xlane.xlu1 %796 }
 0x1fc   :  { %v8111_v46 = vadd.f32 %v8026_v30, %v797_v63  ;;  %v794_v17 = vpop.xlane.xlu0 %793 }
 0x1fd   :  { %v8122_v53 = vadd.f32 %v8028_v31, %v794_v17 }
 0x1ff   :  { %1166 = vperm.xlu0 %7116, %v8111_v46   ;;  %1151 = vperm.xlu1 %7115, %v8114_v57   ;;  %v803_v38 = vpop.xlane.xlu1 %802 }
 0x200   :  { %v8119_v56 = vadd.f32 %v8034_v58, %v803_v38  ;;  %v800_v18 = vpop.xlane.xlu0 %799 }
 0x201   :  { %v8130_v19 = vadd.f32 %v8036_v35, %v800_v18 }
 0x203   :  { %1172 = vperm.xlu0 %7116, %v8119_v56   ;;  %1163 = vperm.xlu1 %7115, %v8122_v53   ;;  %v737_v63 = vpop.xlane.xlu1 %736 }
 0x204   :  { %v8127_v41 = vadd.f32 %v7998_v5, %v737_v63  ;;  %v734_v30 = vpop.xlane.xlu0 %733 }
 0x205   :  { %v8138_v31 = vadd.f32 %v8000_v12, %v734_v30 }
 0x206   :  { %10557 = vst [vmem:[#allocation63_spill] sm:$0xff] %v8127_v41 }
 0x207   :  { %1106 = vperm.xlu0 %7116, %v8127_v41   ;;  %1169 = vperm.xlu1 %7115, %v8130_v19   ;;  %v749_v38 = vpop.xlane.xlu1 %748 }
 0x208   :  { %v8135_v17 = vadd.f32 %v8014_v21, %v749_v38  ;;  %v746_v58 = vpop.xlane.xlu0 %745 }
 0x209   :  { %v8146_v35 = vadd.f32 %v8016_v15, %v746_v58 }
 0x20a   :  { %10558 = vst [vmem:[#allocation64_spill] sm:$0xff] %v8135_v17 }
 0x20b   :  { %1118 = vperm.xlu0 %7116, %v8135_v17   ;;  %1103 = vperm.xlu1 %7115, %v8138_v31   ;;  %v755_v63 = vpop.xlane.xlu1 %754  ;;  %10560 = vst [vmem:[#allocation66_spill] sm:$0xff] %v8146_v35 }
 0x20c   :  { %v8143_v18 = vadd.f32 %v8022_v27, %v755_v63  ;;  %v752_v5 = vpop.xlane.xlu0 %751 }
 0x20d   :  { %v8151_v30 = vadd.f32 %v8024_v28, %v752_v5 }
 0x20e   :  { %10559 = vst [vmem:[#allocation65_spill] sm:$0xff] %v8143_v18 }
 0x20f   :  { %1124 = vperm.xlu0 %7116, %v8143_v18   ;;  %1115 = vperm.xlu1 %7115, %v8146_v35   ;;  %v809_v38 = vpop.xlane.xlu1 %808  ;;  %10561 = vst [vmem:[#allocation67_spill] sm:$0xff] %v8151_v30 }
 0x210   :  { %v806_v21 = vpop.xlane.xlu0 %805  ;;  %v8163_v58 = vadd.f32 %v8038_v36, %v809_v38 }
 0x211   :  { %v8166_v5 = vadd.f32 %v8040_v37, %v806_v21 }
 0x212   :  { %10564 = vst [vmem:[#allocation70_spill] sm:$0xff] %v8163_v58 }
 0x213   :  { %1121 = vperm.xlu1 %7115, %v8151_v30   ;;  %v761_v12 = vpop.xlane.xlu1 %760  ;;  %10565 = vst [vmem:[#allocation71_spill] sm:$0xff] %v8166_v5 }
 0x214   :  { %v8155_v54 = vadd.f32 %v8030_v33, %v761_v12  ;;  %v758_v63 = vpop.xlane.xlu0 %757 }
 0x215   :  { %v8158_v27 = vadd.f32 %v8032_v34, %v758_v63 }
 0x216   :  { %10562 = vst [vmem:[#allocation68_spill] sm:$0xff] %v8155_v54  ;;  %1130 = vperm.xlu0 %7116, %v8155_v54  }
 0x217   :  { %10563 = vst [vmem:[#allocation69_spill] sm:$0xff] %v8158_v27  ;;  %1127 = vperm.xlu1 %7115, %v8158_v27   ;;  %v8192_v27 = vsub.s32 %v1181_v2, %v7743_v1 }
 0x21a   :  { %1178 = vperm.xlu0 %7116, %v8163_v58   ;;  %v1186_v58 = vadd.s32 4294967288, %v1181_v2 }
 0x21b   :  { %1175 = vperm.xlu1 %7115, %v8166_v5  }
 0x21c   :  { %v8195_v18 = vsub.s32 %v1186_v58, %v7743_v1 }
 0x255   :  { %v1137_v12 = vpop.permute.xlu0 %1136 }
 0x256   :  { %v1134_v33 = vpop.permute.xlu1 %1133  ;;  %v1263_v50 = vrot.slane %v1137_v12, %v8195_v18 }
 0x257   :  { %v1259_v35 = vrot.slane %v1134_v33, %v8192_v27 }
 0x25a   :  { %v1086_v28 = vpop.permute.xlu0 %1085 }
 0x25b   :  { %v1185_v33 = vrot.slane %v1086_v28, %v8192_v27 }
 0x25e   :  { %v1089_v15 = vpop.permute.xlu1 %1088  ;;  %v1143_v63 = vpop.permute.xlu0 %1142 }
 0x25f   :  { %v1190_v2 = vrot.slane %v1089_v15, %v8195_v18  ;;  %v1272_v41 = vrot.slane %v1143_v63, %v8195_v18  ;;  %v1264_v63 = vsel %vm1191_vm5, %v1263_v50, %v1259_v35 }
 0x262   :  { %v1140_v34 = vpop.permute.xlu1 %1139  ;;  %v8170_v45 = vpop.permute.xlu0 %1148 }
 0x263   :  { %v1268_v32 = vrot.slane %v1140_v34, %v8192_v27  ;;  %v1281_v35 = vrot.slane %v8170_v45, %v8195_v18 }
 0x265   :  { %v1273_v12 = vsel %vm1191_vm5, %v1272_v41, %v1268_v32 }
 0x266   :  { %v8172_v10 = vpop.permute.xlu1 %1145  ;;  %v8174_v25 = vpop.permute.xlu0 %1160 }
 0x26a   :  { %v8176_v38 = vpop.permute.xlu1 %1157  ;;  %v1095_v21 = vpop.permute.xlu0 %1094 }
 0x26b   :  { %v1200_v1 = vrot.slane %v1095_v21, %v8195_v18  ;;  %v1192_v21 = vsel %vm1191_vm5, %v1190_v2, %v1185_v33 }
 0x26e   :  { %v1092_v36 = vpop.permute.xlu1 %1091  ;;  %v1101_v37 = vpop.permute.xlu0 %1100 }
 0x26f   :  { %v1196_v4 = vrot.slane %v1092_v36, %v8192_v27  ;;  %v1209_v34 = vrot.slane %v1101_v37, %v8195_v18 }
 0x272   :  { %v1098_v24 = vpop.permute.xlu1 %1097  ;;  %v8178_v16 = vpop.permute.xlu0 %1112 }
 0x273   :  { %v1205_v0 = vrot.slane %v1098_v24, %v8192_v27  ;;  %v1201_v24 = vsel %vm1191_vm5, %v1200_v1, %v1196_v4  ;;  %v1342_v4 = vsel %vm1328_vm6, %v1273_v12, %v1264_v63 }
 0x275   :  { %v1210_v37 = vsel %vm1191_vm5, %v1209_v34, %v1205_v0 }
 0x276   :  { %v8180_v8 = vpop.permute.xlu1 %1109  ;;  %v1155_v9 = vpop.permute.xlu0 %1154 }
 0x277   :  { %v1223_v0 = vrot.slane %v8180_v8, %v8192_v27  ;;  %v1295_v8 = vrot.slane %v8176_v38, %v8192_v27 }
 0x27a   :  { %v1152_v7 = vpop.permute.xlu1 %1151  ;;  %v8182_v48 = vpop.permute.xlu0 %1166 }
 0x27b   :  { %v1286_v28 = vrot.slane %v1152_v7, %v8192_v27  ;;  %v1290_v7 = vrot.slane %v1155_v9, %v8195_v18 }
 0x27d   :  { %v1291_v12 = vsel %vm1191_vm5, %v1290_v7, %v1286_v28 }
 0x27e   :  { %v8185_v3 = vpop.permute.xlu1 %1163  ;;  %v8187_v42 = vpop.permute.xlu0 %1172 }
 0x27f   :  { %v1304_v9 = vrot.slane %v8185_v3, %v8192_v27 }
 0x282   :  { %v8189_v5 = vpop.permute.xlu1 %1169  ;;  %v1107_v54 = vpop.permute.xlu0 %1106 }
 0x283   :  { %v1218_v15 = vrot.slane %v1107_v54, %v8195_v18 }
 0x286   :  { %v1104_v30 = vpop.permute.xlu1 %1103  ;;  %v1119_v17 = vpop.permute.xlu0 %1118 }
 0x287   :  { %v1214_v58 = vrot.slane %v1104_v30, %v8192_v27  ;;  %v1277_v30 = vrot.slane %v8172_v10, %v8192_v27  ;;  %v1329_v10 = vsel %vm1328_vm6, %v1201_v24, %v1192_v21  ;;  %v1236_v1 = vrot.slane %v1119_v17, %v8195_v18 }
 0x288   :  { %v1331_v2 = vsel %vm1330_vm7, %v1210_v37, %v1329_v10  ;;  %v1308_v21 = vrot.slane %v8182_v48, %v8195_v18 }
 0x289   :  { %v1219_v32 = vsel %vm1191_vm5, %v1218_v15, %v1214_v58  ;;  %v1282_v34 = vsel %vm1191_vm5, %v1281_v35, %v1277_v30 }
 0x28a   :  { %v1116_v36 = vpop.permute.xlu1 %1115  ;;  %v1125_v54 = vpop.permute.xlu0 %1124  ;;  %v1333_v45 = vsel %vm1332_vm8, %v1219_v32, %v1331_v2  ;;  %v1343_v38 = vsel %vm1330_vm7, %v1282_v34, %v1342_v4  ;;  %v1299_v32 = vrot.slane %v8174_v25, %v8195_v18  ;;  %v1309_v35 = vsel %vm1191_vm5, %v1308_v21, %v1304_v9 }
 0x28b   :  { %v1232_v41 = vrot.slane %v1116_v36, %v8192_v27  ;;  %v1227_v36 = vrot.slane %v8178_v16, %v8195_v18  ;;  %v1245_v33 = vrot.slane %v1125_v54, %v8195_v18  ;;  %v1313_v16 = vrot.slane %v8189_v5, %v8192_v27 }
 0x28c   :  { %v1317_v5 = vrot.slane %v8187_v42, %v8195_v18 }
 0x28d   :  { %v1237_v17 = vsel %vm1191_vm5, %v1236_v1, %v1232_v41  ;;  %v1228_v15 = vsel %vm1191_vm5, %v1227_v36, %v1223_v0  ;;  %v1344_v41 = vsel %vm1332_vm8, %v1291_v12, %v1343_v38  ;;  %v1300_v0 = vsel %vm1191_vm5, %v1299_v32, %v1295_v8 }
 0x28e   :  { %v1122_v50 = vpop.permute.xlu1 %1121  ;;  %v1335_v28 = vsel %vm1334_vm9, %v1228_v15, %v1333_v45  ;;  %v1318_v7 = vsel %vm1191_vm5, %v1317_v5, %v1313_v16 }
 0x28f   :  { %v1241_v58 = vrot.slane %v1122_v50, %v8192_v27  ;;  %v1337_v54 = vsel %vm1336_vm10, %v1237_v17, %v1335_v28 }
 0x291   :  { %v1131_v24 = vpop.permute.xlu0 %1130  ;;  %v1246_v63 = vsel %vm1191_vm5, %v1245_v33, %v1241_v58  ;;  %v1345_v58 = vsel %vm1334_vm9, %v1300_v0, %v1344_v41 }
 0x292   :  { %v1128_v30 = vpop.permute.xlu1 %1127  ;;  %v1254_v37 = vrot.slane %v1131_v24, %v8195_v18  ;;  %v1339_v48 = vsel %vm1338_vm12, %v1246_v63, %v1337_v54  ;;  %v1346_v34 = vsel %vm1336_vm10, %v1309_v35, %v1345_v58 }
 0x293   :  { %v1250_v3 = vrot.slane %v1128_v30, %v8192_v27  ;;  %v1347_v45 = vsel %vm1338_vm12, %v1318_v7, %v1346_v34 }
 0x295   :  { %v1179_v4 = vpop.permute.xlu0 %1178  ;;  %v1255_v10 = vsel %vm1191_vm5, %v1254_v37, %v1250_v3 }
 0x296   :  { %v1176_v50 = vpop.permute.xlu1 %1175  ;;  %v1326_v2 = vrot.slane %v1179_v4, %v8195_v18  ;;  %v1341_v25 = vsel %vm1340_vm11, %v1255_v10, %v1339_v48 }
 0x297   :  { %v1322_v42 = vrot.slane %v1176_v50, %v8192_v27  ;;  %v1352_v1 = vsel %vm1351_vm13, %v1341_v25, -inf }
 0x298   :  { %1353 = vmax.xlane.f32.xlu1 %v1352_v1 }
 0x299   :  { %v1327_v36 = vsel %vm1191_vm5, %v1326_v2, %v1322_v42 }
 0x29a   :  { %v1348_v33 = vsel %vm1340_vm11, %v1327_v36, %v1347_v45 }
 0x29b   :  { %v1355_v8 = vsel %vm1351_vm13, %v1348_v33, -inf }
 0x29c   :  { %1356 = vmax.xlane.f32.xlu0 %v1355_v8 }
 0x321   :  { %v8300_v0 = vpop.xlane.xlu1 %1353 }
 0x322   :  { %v1367_v58 = vrot.slane %v8300_v0, %v7750_v13  ;;  %v1371_v8 = vrot.slane %v8300_v0, %v7753_v14 }
 0x325   :  { %v8271_v12 = vpop.xlane.xlu0 %1356 }
 0x326   :  { %v1395_v9 = vrot.slane %v8271_v12, %v7746_v6  ;;  %v1399_v17 = vrot.slane %v8271_v12, %v7750_v13  ;;  %v1403_v16 = vrot.slane %v8271_v12, %v7753_v14  ;;  %v1407_v21 = vrot.slane %v8271_v12, %v7760_v20 }
 0x327   :  { %v1411_v32 = vrot.slane %v8271_v12, %v7765_v23 }
 0x328   :  { %v1456_v24 = vsub.f32 %v8046_v40, %v1395_v9  ;;  %v1457_v15 = vsub.f32 %v8043_v11, %v1395_v9  ;;  %v1458_v63 = vsub.f32 %v8066_v22, %v1399_v17  ;;  %v1459_v37 = vsub.f32 %v8055_v52, %v1399_v17 }
 0x329   :  { %v1460_v3 = vsub.f32 %v8074_v60, %v1403_v16  ;;  %v1461_v40 = vsub.f32 %v8063_v51, %v1403_v16  ;;  %v1462_v22 = vsub.f32 %v8114_v57, %v1407_v21  ;;  %v1463_v52 = vsub.f32 %v8103_v55, %v1407_v21 }
 0x32a   :  { %v1504_v30 = vmul.f32 1.442695, %v1456_v24  ;;  %v1506_v38 = vmul.f32 1.442695, %v1457_v15  ;;  %v1508_v28 = vmul.f32 1.442695, %v1458_v63  ;;  %v1415_v60 = vrot.slane %v8271_v12, %v7770_v26 }
 0x32b   :  { %v1510_v11 = vmul.f32 1.442695, %v1459_v37  ;;  %v1512_v41 = vmul.f32 1.442695, %v1460_v3  ;;  %v1514_v5 = vmul.f32 1.442695, %v1461_v40  ;;  %v1464_v54 = vsub.f32 %v8082_v39, %v1411_v32 }
 0x32c   :  { %7117 = vpow2.f32 %v1504_v30  ;;  %v1516_v51 = vmul.f32 1.442695, %v1462_v22  ;;  %v1465_v35 = vsub.f32 %v8071_v59, %v1411_v32  ;;  %v1518_v4 = vmul.f32 1.442695, %v1463_v52  ;;  %v10567_v40 = vld [vmem:[#allocation63_spill] sm:$0xff] }
 0x32d   :  { %7119 = vpow2.f32 %v1506_v38  ;;  %v1419_v57 = vrot.slane %v8271_v12, %v7775_v29  ;;  %v1466_v10 = vsub.f32 %v8122_v53, %v1415_v60  ;;  %v1520_v55 = vmul.f32 1.442695, %v1464_v54 }
 0x32e   :  { %7121 = vpow2.f32 %v1508_v28  ;;  %v1467_v50 = vsub.f32 %v8111_v46, %v1415_v60  ;;  %v1522_v39 = vmul.f32 1.442695, %v1465_v35  ;;  %v1363_v59 = vrot.slane %v8300_v0, %v7746_v6  ;;  %v10569_v60 = vld [vmem:[#allocation61_spill] sm:$0xff] }
 0x32f   :  { %7123 = vpow2.f32 %v1510_v11  ;;  %v1468_v53 = vsub.f32 %v8130_v19, %v1419_v57  ;;  %v1524_v25 = vmul.f32 1.442695, %v1466_v10  ;;  %v1469_v42 = vsub.f32 %v8119_v56, %v1419_v57  ;;  %v10570_v57 = vld [vmem:[#allocation66_spill] sm:$0xff] }
 0x330   :  { %7125 = vpow2.f32 %v1512_v41  ;;  %v1526_v46 = vmul.f32 1.442695, %v1467_v50  ;;  %v1441_v34 = vsub.f32 %v8058_v49, %v1363_v59  ;;  %v1440_v45 = vsub.f32 %v8051_v44, %v1363_v59  ;;  %v10568_v41 = vld [vmem:[#allocation62_spill] sm:$0xff] }
 0x331   :  { %7127 = vpow2.f32 %v1514_v5  ;;  %v1528_v19 = vmul.f32 1.442695, %v1468_v53  ;;  %v1530_v56 = vmul.f32 1.442695, %v1469_v42  ;;  %v1442_v9 = vsub.f32 %v8090_v47, %v1367_v58  ;;  %v10572_v42 = vld [vmem:[#allocation27_spill] sm:$0xff] }
 0x332   :  { %7129 = vpow2.f32 %v1516_v51  ;;  %v1474_v49 = vmul.f32 1.442695, %v1441_v34  ;;  %v1443_v24 = vsub.f32 %v8079_v62, %v1367_v58  ;;  %v1472_v44 = vmul.f32 1.442695, %v1440_v45  ;;  %v10573_v58 = vld [vmem:[#allocation67_spill] sm:$0xff] }
 0x333   :  { %7131 = vpow2.f32 %v1518_v4  ;;  %v1375_v16 = vrot.slane %v8300_v0, %v7760_v20  ;;  %v1444_v63 = vsub.f32 %v8098_v61, %v1371_v8  ;;  %v1476_v47 = vmul.f32 1.442695, %v1442_v9 }
 0x334   :  { %7133 = vpow2.f32 %v1520_v55  ;;  %v1445_v37 = vsub.f32 %v8087_v43, %v1371_v8  ;;  %v1478_v62 = vmul.f32 1.442695, %v1443_v24  ;;  %v1379_v21 = vrot.slane %v8300_v0, %v7765_v23  ;;  %v10575_v24 = vld [vmem:[#allocation69_spill] sm:$0xff] }
 0x335   :  { %7135 = vpow2.f32 %v1522_v39  ;;  %v1446_v3 = vsub.f32 %v8138_v31, %v1375_v16  ;;  %v1480_v61 = vmul.f32 1.442695, %v1444_v63  ;;  %v1447_v11 = vsub.f32 %v10567_v40, %v1375_v16  ;;  %v10571_v39 = vld [vmem:[#allocation64_spill] sm:$0xff] }
 0x336   :  { %7137 = vpow2.f32 %v1524_v25  ;;  %v1482_v43 = vmul.f32 1.442695, %v1445_v37  ;;  %v1383_v22 = vrot.slane %v8300_v0, %v7770_v26  ;;  %v1448_v52 = vsub.f32 %v10568_v41, %v1379_v21 }
 0x337   :  { %7139 = vpow2.f32 %v1526_v46  ;;  %v1484_v31 = vmul.f32 1.442695, %v1446_v3  ;;  %v1449_v54 = vsub.f32 %v10569_v60, %v1379_v21  ;;  %v1486_v51 = vmul.f32 1.442695, %v1447_v11 }
 0x338   :  { %7141 = vpow2.f32 %v1528_v19  ;;  %v1387_v4 = vrot.slane %v8300_v0, %v7775_v29  ;;  %v1450_v10 = vsub.f32 %v10570_v57, %v1383_v22  ;;  %v1488_v55 = vmul.f32 1.442695, %v1448_v52 }
 0x339   :  { %v8298_v48 = vpop.eup %7117  ;;  %7143 = vpow2.f32 %v1530_v56  ;;  %v1451_v59 = vsub.f32 %v10571_v39, %v1383_v22  ;;  %v1490_v53 = vmul.f32 1.442695, %v1449_v54  ;;  %v1391_v46 = vrot.slane %v8300_v0, %v10572_v42  ;;  %v10574_v56 = vld [vmem:[#allocation65_spill] sm:$0xff] }
 0x33a   :  { %v8303_v2 = vpop.eup %7119  ;;  %1617 = vperm.xlu1 %7115, %v8298_v48   ;;  %7145 = vpow2.f32 %v1474_v49  ;;  %v1452_v34 = vsub.f32 %v10573_v58, %v1387_v4  ;;  %v1492_v19 = vmul.f32 1.442695, %v1450_v10  ;;  %v1453_v8 = vsub.f32 %v10574_v56, %v1387_v4 }
 0x33b   :  { %1620 = vperm.xlu0 %7116, %v8303_v2   ;;  %v8310_v7 = vpop.eup %7121  ;;  %7147 = vpow2.f32 %v1472_v44  ;;  %v1494_v9 = vmul.f32 1.442695, %v1451_v59  ;;  %v1454_v44 = vsub.f32 %v10575_v24, %v1391_v46  ;;  %v1423_v16 = vrot.slane %v8271_v12, %v10572_v42 }
 0x33c   :  { %v8313_v1 = vpop.eup %7123  ;;  %7149 = vpow2.f32 %v1476_v47  ;;  %v1496_v0 = vmul.f32 1.442695, %v1452_v34  ;;  %v10576_v47 = vld [vmem:[#allocation68_spill] sm:$0xff] }
 0x33d   :  { %v8320_v36 = vpop.eup %7125  ;;  %7151 = vpow2.f32 %v1478_v62  ;;  %v1455_v37 = vsub.f32 %v10576_v47, %v1391_v46  ;;  %v1498_v62 = vmul.f32 1.442695, %v1453_v8  ;;  %v1500_v3 = vmul.f32 1.442695, %v1454_v44 }
 0x33e   :  { %1623 = vperm.xlu1 %7115, %v8310_v7   ;;  %v8323_v33 = vpop.eup %7127  ;;  %7153 = vpow2.f32 %v1480_v61  ;;  %v10578_v61 = vld [vmem:[#allocation71_spill] sm:$0xff] }
 0x33f   :  { %1626 = vperm.xlu0 %7116, %v8313_v1   ;;  %v8330_v17 = vpop.eup %7129  ;;  %7155 = vpow2.f32 %v1482_v43  ;;  %v1470_v40 = vsub.f32 %v10578_v61, %v1423_v16  ;;  %v1502_v12 = vmul.f32 1.442695, %v1455_v37  ;;  %v10580_v43 = vld [vmem:[#allocation70_spill] sm:$0xff] }
 0x340   :  { %v8333_v15 = vpop.eup %7131  ;;  %7157 = vpow2.f32 %v1484_v31  ;;  %v1471_v22 = vsub.f32 %v10580_v43, %v1423_v16 }
 0x341   :  { %v8340_v30 = vpop.eup %7133  ;;  %7159 = vpow2.f32 %v1486_v51  ;;  %v1532_v52 = vmul.f32 1.442695, %v1470_v40 }
 0x342   :  { %1629 = vperm.xlu1 %7115, %v8320_v36   ;;  %v8343_v38 = vpop.eup %7135  ;;  %7161 = vpow2.f32 %v1488_v55  ;;  %v1534_v60 = vmul.f32 1.442695, %v1471_v22 }
 0x343   :  { %1632 = vperm.xlu0 %7116, %v8323_v33   ;;  %v8350_v28 = vpop.eup %7137  ;;  %7163 = vpow2.f32 %v1490_v53 }
 0x344   :  { %v8353_v32 = vpop.eup %7139  ;;  %7165 = vpow2.f32 %v1492_v19 }
 0x345   :  { %v8360_v5 = vpop.eup %7141  ;;  %7167 = vpow2.f32 %v1494_v9 }
 0x346   :  { %1635 = vperm.xlu1 %7115, %v8330_v17   ;;  %v8363_v35 = vpop.eup %7143  ;;  %7169 = vpow2.f32 %v1496_v0 }
 0x347   :  { %1638 = vperm.xlu0 %7116, %v8333_v15   ;;  %v8370_v50 = vpop.eup %7145  ;;  %7171 = vpow2.f32 %v1498_v62 }
 0x348   :  { %v8373_v25 = vpop.eup %7147  ;;  %7173 = vpow2.f32 %v1500_v3 }
 0x349   :  { %v8380_v45 = vpop.eup %7149  ;;  %7175 = vpow2.f32 %v1502_v12 }
 0x34a   :  { %1641 = vperm.xlu1 %7115, %v8340_v30   ;;  %v8383_v49 = vpop.eup %7151  ;;  %7177 = vpow2.f32 %v1532_v52 }
 0x34b   :  { %1644 = vperm.xlu0 %7116, %v8343_v38   ;;  %v8390_v63 = vpop.eup %7153  ;;  %7179 = vpow2.f32 %v1534_v60 }
 0x34c   :  { %v8393_v21 = vpop.eup %7155 }
 0x34d   :  { %10577 = vst [vmem:[#allocation63_spill] sm:$0xff] %v8393_v21  ;;  %v8398_v11 = vpop.eup %7157 }
 0x34e   :  { %1647 = vperm.xlu1 %7115, %v8350_v28   ;;  %10579 = vst [vmem:[#allocation62_spill] sm:$0xff] %v8398_v11  ;;  %v8401_v41 = vpop.eup %7159 }
 0x34f   :  { %1650 = vperm.xlu0 %7116, %v8353_v32   ;;  %10581 = vst [vmem:[#allocation61_spill] sm:$0xff] %v8401_v41  ;;  %v8405_v31 = vpop.eup %7161 }
 0x350   :  { %10582 = vst [vmem:[#allocation66_spill] sm:$0xff] %v8405_v31  ;;  %v8407_v54 = vpop.eup %7163 }
 0x351   :  { %10583 = vst [vmem:[#allocation64_spill] sm:$0xff] %v8407_v54  ;;  %v8411_v51 = vpop.eup %7165 }
 0x352   :  { %1653 = vperm.xlu1 %7115, %v8360_v5   ;;  %10584 = vst [vmem:[#allocation67_spill] sm:$0xff] %v8411_v51  ;;  %v8413_v4 = vpop.eup %7167 }
 0x353   :  { %1656 = vperm.xlu0 %7116, %v8363_v35   ;;  %10585 = vst [vmem:[#allocation65_spill] sm:$0xff] %v8413_v4  ;;  %v8417_v57 = vpop.eup %7169 }
 0x354   :  { %10586 = vst [vmem:[#allocation69_spill] sm:$0xff] %v8417_v57  ;;  %v8419_v10 = vpop.eup %7171 }
 0x355   :  { %10587 = vst [vmem:[#allocation68_spill] sm:$0xff] %v8419_v10  ;;  %v8423_v55 = vpop.eup %7173 }
 0x356   :  { %1572 = vperm.xlu1 %7115, %v8370_v50   ;;  %10588 = vst [vmem:[#allocation71_spill] sm:$0xff] %v8423_v55  ;;  %v8425_v39 = vpop.eup %7175 }
 0x357   :  { %1569 = vperm.xlu0 %7116, %v8373_v25   ;;  %10589 = vst [vmem:[#allocation70_spill] sm:$0xff] %v8425_v39  ;;  %v8429_v59 = vpop.eup %7177 }
 0x358   :  { %10590 = vst [vmem:[#allocation72_spill] sm:$0xff] %v8429_v59  ;;  %v8431_v53 = vpop.eup %7179 }
 0x359   :  { %10591 = vst [vmem:[#allocation73_spill] sm:$0xff] %v8431_v53 }
 0x35a   :  { %1575 = vperm.xlu1 %7115, %v8380_v45  }
 0x35b   :  { %1578 = vperm.xlu0 %7116, %v8383_v49  }
 0x35e   :  { %1581 = vperm.xlu1 %7115, %v8390_v63  }
 0x35f   :  { %1584 = vperm.xlu0 %7116, %v8393_v21  }
 0x362   :  { %1587 = vperm.xlu1 %7115, %v8398_v11  }
 0x363   :  { %1590 = vperm.xlu0 %7116, %v8401_v41  }
 0x366   :  { %1593 = vperm.xlu1 %7115, %v8405_v31  }
 0x367   :  { %1596 = vperm.xlu0 %7116, %v8407_v54  }
 0x36a   :  { %1599 = vperm.xlu1 %7115, %v8411_v51  }
 0x36b   :  { %1602 = vperm.xlu0 %7116, %v8413_v4  }
 0x36e   :  { %1605 = vperm.xlu1 %7115, %v8417_v57  }
 0x36f   :  { %1608 = vperm.xlu0 %7116, %v8419_v10  }
 0x372   :  { %1611 = vperm.xlu1 %7115, %v8423_v55  }
 0x373   :  { %1614 = vperm.xlu0 %7116, %v8425_v39  }
 0x376   :  { %1659 = vperm.xlu1 %7115, %v8429_v59  }
 0x377   :  { %1662 = vperm.xlu0 %7116, %v8431_v53  }
 0x3b5   :  { %v8435_v46 = vpop.permute.xlu1 %1617 }
 0x3b6   :  { %v8437_v58 = vpop.permute.xlu0 %1620  ;;  %v1739_v54 = vrot.slane %v8435_v46, %v8192_v27 }
 0x3b9   :  { %v1624_v34 = vpop.permute.xlu1 %1623 }
 0x3ba   :  { %v1627_v19 = vpop.permute.xlu0 %1626  ;;  %v1748_v55 = vrot.slane %v1624_v34, %v8192_v27 }
 0x3bb   :  { %v1752_v39 = vrot.slane %v1627_v19, %v8195_v18 }
 0x3bd   :  { %v1630_v56 = vpop.permute.xlu1 %1629 }
 0x3be   :  { %v1633_v8 = vpop.permute.xlu0 %1632  ;;  %v1757_v10 = vrot.slane %v1630_v56, %v8192_v27 }
 0x3bf   :  { %v1761_v42 = vrot.slane %v1633_v8, %v8195_v18 }
 0x3c1   :  { %v8439_v9 = vpop.permute.xlu1 %1635 }
 0x3c2   :  { %v8441_v24 = vpop.permute.xlu0 %1638 }
 0x3c5   :  { %v8443_v44 = vpop.permute.xlu1 %1641 }
 0x3c6   :  { %v8445_v0 = vpop.permute.xlu0 %1644 }
 0x3c9   :  { %v8447_v16 = vpop.permute.xlu1 %1647 }
 0x3ca   :  { %v8449_v47 = vpop.permute.xlu0 %1650 }
 0x3cd   :  { %v8451_v37 = vpop.permute.xlu1 %1653 }
 0x3ce   :  { %v8453_v62 = vpop.permute.xlu0 %1656 }
 0x3d1   :  { %v1573_v3 = vpop.permute.xlu1 %1572 }
 0x3d2   :  { %v1570_v61 = vpop.permute.xlu0 %1569  ;;  %v1671_v34 = vrot.slane %v1573_v3, %v8195_v18 }
 0x3d3   :  { %v1667_v19 = vrot.slane %v1570_v61, %v8192_v27 }
 0x3d5   :  { %v1576_v40 = vpop.permute.xlu1 %1575 }
 0x3d6   :  { %v1579_v12 = vpop.permute.xlu0 %1578  ;;  %v1676_v4 = vrot.slane %v1576_v40, %v8192_v27  ;;  %v1743_v40 = vrot.slane %v8437_v58, %v8195_v18  ;;  %v1766_v58 = vrot.slane %v8439_v9, %v8192_v27  ;;  %v1793_v9 = vrot.slane %v8451_v37, %v8192_v27 }
 0x3d7   :  { %v1680_v57 = vrot.slane %v1579_v12, %v8195_v18  ;;  %v1753_v12 = vsel %vm1191_vm5, %v1752_v39, %v1748_v55 }
 0x3d9   :  { %v1582_v43 = vpop.permute.xlu1 %1581  ;;  %v1681_v21 = vsel %vm1191_vm5, %v1680_v57, %v1676_v4  ;;  %v1672_v4 = vsel %vm1191_vm5, %v1671_v34, %v1667_v19  ;;  %v1779_v57 = vrot.slane %v8445_v0, %v8195_v18  ;;  %v1797_v0 = vrot.slane %v8453_v62, %v8195_v18 }
 0x3da   :  { %v1585_v22 = vpop.permute.xlu0 %1584  ;;  %v1685_v41 = vrot.slane %v1582_v43, %v8192_v27  ;;  %v1762_v43 = vsel %vm1191_vm5, %v1761_v42, %v1757_v10  ;;  %v1775_v42 = vrot.slane %v8443_v44, %v8192_v27  ;;  %v1784_v10 = vrot.slane %v8447_v16, %v8192_v27 }
 0x3db   :  { %v1689_v31 = vrot.slane %v1585_v22, %v8195_v18 }
 0x3dd   :  { %v1588_v52 = vpop.permute.xlu1 %1587  ;;  %v1690_v55 = vsel %vm1191_vm5, %v1689_v31, %v1685_v41  ;;  %v1808_v41 = vsel %vm1328_vm6, %v1681_v21, %v1672_v4 }
 0x3de   :  { %v1591_v60 = vpop.permute.xlu0 %1590  ;;  %v1694_v56 = vrot.slane %v1588_v52, %v8192_v27  ;;  %v1770_v52 = vrot.slane %v8441_v24, %v8195_v18  ;;  %v1809_v24 = vsel %vm1330_vm7, %v1690_v55, %v1808_v41 }
 0x3df   :  { %v1698_v8 = vrot.slane %v1591_v60, %v8195_v18 }
 0x3e1   :  { %v1594_v53 = vpop.permute.xlu1 %1593 }
 0x3e2   :  { %v1597_v59 = vpop.permute.xlu0 %1596  ;;  %v1703_v22 = vrot.slane %v1594_v53, %v8192_v27  ;;  %v1788_v53 = vrot.slane %v8449_v47, %v8195_v18  ;;  %v1744_v47 = vsel %vm1191_vm5, %v1743_v40, %v1739_v54 }
 0x3e3   :  { %v1707_v46 = vrot.slane %v1597_v59, %v8195_v18 }
 0x3e5   :  { %v1600_v51 = vpop.permute.xlu1 %1599  ;;  %v1708_v31 = vsel %vm1191_vm5, %v1707_v46, %v1703_v22  ;;  %v1815_v22 = vsel %vm1328_vm6, %v1753_v12, %v1744_v47 }
 0x3e6   :  { %v1603_v11 = vpop.permute.xlu0 %1602  ;;  %v1712_v3 = vrot.slane %v1600_v51, %v8192_v27 }
 0x3e7   :  { %v1716_v61 = vrot.slane %v1603_v11, %v8195_v18  ;;  %v1699_v11 = vsel %vm1191_vm5, %v1698_v8, %v1694_v56  ;;  %v1771_v56 = vsel %vm1191_vm5, %v1770_v52, %v1766_v58  ;;  %v1798_v52 = vsel %vm1191_vm5, %v1797_v0, %v1793_v9 }
 0x3e8   :  { %v1810_v16 = vsel %vm1332_vm8, %v1699_v11, %v1809_v24 }
 0x3e9   :  { %v1606_v60 = vpop.permute.xlu1 %1605  ;;  %v1717_v44 = vsel %vm1191_vm5, %v1716_v61, %v1712_v3  ;;  %v1811_v37 = vsel %vm1334_vm9, %v1708_v31, %v1810_v16  ;;  %v1780_v61 = vsel %vm1191_vm5, %v1779_v57, %v1775_v42  ;;  %v1816_v3 = vsel %vm1330_vm7, %v1762_v43, %v1815_v22 }
 0x3ea   :  { %v1609_v39 = vpop.permute.xlu0 %1608  ;;  %v1721_v59 = vrot.slane %v1606_v60, %v8192_v27  ;;  %v1812_v62 = vsel %vm1336_vm10, %v1717_v44, %v1811_v37  ;;  %v1789_v60 = vsel %vm1191_vm5, %v1788_v53, %v1784_v10  ;;  %v1817_v40 = vsel %vm1332_vm8, %v1771_v56, %v1816_v3 }
 0x3eb   :  { %v1725_v51 = vrot.slane %v1609_v39, %v8195_v18  ;;  %v1818_v42 = vsel %vm1334_vm9, %v1780_v61, %v1817_v40 }
 0x3ec   :  { %v1819_v11 = vsel %vm1336_vm10, %v1789_v60, %v1818_v42  ;;  %v10592_v60 = vld [vmem:[#allocation63_spill] sm:$0xff] }
 0x3ed   :  { %v1612_v19 = vpop.permute.xlu1 %1611  ;;  %v1726_v21 = vsel %vm1191_vm5, %v1725_v51, %v1721_v59  ;;  %v1820_v57 = vsel %vm1338_vm12, %v1798_v52, %v1819_v11 }
 0x3ee   :  { %v1615_v34 = vpop.permute.xlu0 %1614  ;;  %v1730_v8 = vrot.slane %v1612_v19, %v8192_v27  ;;  %v1813_v54 = vsel %vm1338_vm12, %v1726_v21, %v1812_v62 }
 0x3ef   :  { %v1734_v46 = vrot.slane %v1615_v34, %v8195_v18 }
 0x3f1   :  { %v1660_v55 = vpop.permute.xlu1 %1659  ;;  %v1735_v39 = vsel %vm1191_vm5, %v1734_v46, %v1730_v8 }
 0x3f2   :  { %v1663_v58 = vpop.permute.xlu0 %1662  ;;  %v1802_v12 = vrot.slane %v1660_v55, %v8192_v27  ;;  %v1814_v59 = vsel %vm1340_vm11, %v1735_v39, %v1813_v54  ;;  %v10594_v54 = vld [vmem:[#allocation61_spill] sm:$0xff] }
 0x3f3   :  { %v1806_v43 = vrot.slane %v1663_v58, %v8195_v18  ;;  %v1824_v4 = vsel %vm1351_vm13, %v1814_v59, 0.0  ;;  %v10596_v58 = vld [vmem:[#allocation64_spill] sm:$0xff]  ;;  %v10597_v59 = vld [vmem:[#allocation67_spill] sm:$0xff] }
 0x3f4   :  { %1825 = vadd.xlane.f32.xlu1 %v1824_v4 }
 0x3f5   :  { %v1807_v51 = vsel %vm1191_vm5, %v1806_v43, %v1802_v12  ;;  %v10598_v43 = vld [vmem:[#allocation65_spill] sm:$0xff] }
 0x3f6   :  { %v1821_v10 = vsel %vm1340_vm11, %v1807_v51, %v1820_v57  ;;  %v10599_v51 = vld [vmem:[#allocation69_spill] sm:$0xff] }
 0x3f7   :  { %v1827_v41 = vsel %vm1351_vm13, %v1821_v10, 0.0  ;;  %v10600_v10 = vld [vmem:[#allocation68_spill] sm:$0xff] }
 0x3f8   :  { %1828 = vadd.xlane.f32.xlu0 %v1827_v41 }
 0x47d   :  { %v1826_v34 = vpop.xlane.xlu1 %1825 }
 0x481   :  { %v1829_v31 = vpop.xlane.xlu0 %1828 }
 0x482   :  { %7181 = vrcp.f32 %v1829_v31  ;;  %v10601_v31 = vld [vmem:[#allocation27_spill] sm:$0xff] }
 0x483   :  { %7183 = vrcp.f32 %v1826_v34 }
 0x48f   :  { %v8529_v53 = vpop.eup %7181 }
 0x490   :  { %v1869_v9 = vrot.slane %v8529_v53, %v7746_v6  ;;  %v1873_v19 = vrot.slane %v8529_v53, %v7750_v13  ;;  %v1877_v21 = vrot.slane %v8529_v53, %v7753_v14  ;;  %v1881_v8 = vrot.slane %v8529_v53, %v7760_v20  ;;  %v7184_v46 = vpop.eup %7183 }
 0x491   :  { %v1885_v47 = vrot.slane %v8529_v53, %v7765_v23  ;;  %v1861_v11 = vrot.slane %v7184_v46, %v7775_v29 }
 0x492   :  { %v1931_v24 = vmul.f32 %v8303_v2, %v1869_v9  ;;  %v1930_v44 = vmul.f32 %v8298_v48, %v1869_v9  ;;  %v1933_v0 = vmul.f32 %v8313_v1, %v1873_v19  ;;  %v1932_v16 = vmul.f32 %v8310_v7, %v1873_v19  ;;  %v10603_v19 = vld [vmem:[#allocation70_spill] sm:$0xff] }
 0x493   :  { %v1935_v2 = vmul.f32 %v8323_v33, %v1877_v21  ;;  %v1934_v48 = vmul.f32 %v8320_v36, %v1877_v21  ;;  %v1937_v1 = vmul.f32 %v8333_v15, %v1881_v8  ;;  %v1936_v7 = vmul.f32 %v8330_v17, %v1881_v8  ;;  %v10604_v21 = vld [vmem:[#allocation72_spill] sm:$0xff] }
 0x494   :  { %2034 = vperm.xlu0 %7116, %v1931_v24   ;;  %2031 = vperm.xlu1 %7115, %v1930_v44   ;;  %v1939_v56 = vmul.f32 %v8343_v38, %v1885_v47  ;;  %v1938_v33 = vmul.f32 %v8340_v30, %v1885_v47  ;;  %v1889_v36 = vrot.slane %v8529_v53, %v7770_v26  ;;  %v10602_v24 = vld [vmem:[#allocation71_spill] sm:$0xff] }
 0x495   :  { %v1893_v17 = vrot.slane %v8529_v53, %v7775_v29  ;;  %v1837_v30 = vrot.slane %v7184_v46, %v7746_v6  ;;  %v1926_v57 = vmul.f32 %v10599_v51, %v1861_v11  ;;  %v1927_v41 = vmul.f32 %v10600_v10, %v1861_v11 }
 0x496   :  { %v1941_v37 = vmul.f32 %v8353_v32, %v1889_v36  ;;  %v1940_v15 = vmul.f32 %v8350_v28, %v1889_v36  ;;  %v1841_v28 = vrot.slane %v7184_v46, %v7750_v13  ;;  %v1865_v9 = vrot.slane %v7184_v46, %v10601_v31 }
 0x497   :  { %v1943_v22 = vmul.f32 %v8363_v35, %v1893_v17  ;;  %v1942_v38 = vmul.f32 %v8360_v5, %v1893_v17  ;;  %v1915_v61 = vmul.f32 %v8370_v50, %v1837_v30  ;;  %v1914_v32 = vmul.f32 %v8373_v25, %v1837_v30  ;;  %v10593_v25 = vld [vmem:[#allocation62_spill] sm:$0xff] }
 0x498   :  { %2040 = vperm.xlu0 %7116, %v1933_v0   ;;  %2037 = vperm.xlu1 %7115, %v1932_v16   ;;  %v1916_v62 = vmul.f32 %v8380_v45, %v1841_v28  ;;  %v1917_v3 = vmul.f32 %v8383_v49, %v1841_v28  ;;  %v1845_v35 = vrot.slane %v7184_v46, %v7753_v14  ;;  %v10595_v49 = vld [vmem:[#allocation66_spill] sm:$0xff] }
 0x499   :  { %v1849_v50 = vrot.slane %v7184_v46, %v7760_v20  ;;  %v1853_v45 = vrot.slane %v7184_v46, %v7765_v23  ;;  %v1928_v44 = vmul.f32 %v10602_v24, %v1865_v9  ;;  %v1929_v0 = vmul.f32 %v10603_v19, %v1865_v9 }
 0x49a   :  { %v1918_v5 = vmul.f32 %v8390_v63, %v1845_v35  ;;  %v1919_v55 = vmul.f32 %v10592_v60, %v1845_v35  ;;  %v1857_v63 = vrot.slane %v7184_v46, %v7770_v26  ;;  %v1897_v16 = vrot.slane %v8529_v53, %v10601_v31 }
 0x49b   :  { %v1920_v39 = vmul.f32 %v10593_v25, %v1849_v50  ;;  %v1921_v40 = vmul.f32 %v10594_v54, %v1849_v50  ;;  %v1922_v52 = vmul.f32 %v10595_v49, %v1853_v45  ;;  %v1923_v12 = vmul.f32 %v10596_v58, %v1853_v45 }
 0x49c   :  { %2046 = vperm.xlu0 %7116, %v1935_v2   ;;  %2043 = vperm.xlu1 %7115, %v1934_v48   ;;  %v1924_v42 = vmul.f32 %v10597_v59, %v1857_v63  ;;  %v1925_v4 = vmul.f32 %v10598_v43, %v1857_v63  ;;  %v1944_v34 = vmul.f32 %v10604_v21, %v1897_v16  ;;  %v10605_v2 = vld [vmem:[#allocation73_spill] sm:$0xff] }
 0x49d   :  { %v1945_v48 = vmul.f32 %v10605_v2, %v1897_v16 }
 0x4a0   :  { %2052 = vperm.xlu0 %7116, %v1937_v1   ;;  %2049 = vperm.xlu1 %7115, %v1936_v7  }
 0x4a4   :  { %2058 = vperm.xlu0 %7116, %v1939_v56   ;;  %2055 = vperm.xlu1 %7115, %v1938_v33  }
 0x4a8   :  { %2064 = vperm.xlu0 %7116, %v1941_v37   ;;  %2061 = vperm.xlu1 %7115, %v1940_v15  }
 0x4ac   :  { %2070 = vperm.xlu0 %7116, %v1943_v22   ;;  %2067 = vperm.xlu1 %7115, %v1942_v38  }
 0x4b0   :  { %1986 = vperm.xlu1 %7115, %v1915_v61   ;;  %1983 = vperm.xlu0 %7116, %v1914_v32  }
 0x4b4   :  { %1989 = vperm.xlu1 %7115, %v1916_v62   ;;  %1992 = vperm.xlu0 %7116, %v1917_v3  }
 0x4b8   :  { %1995 = vperm.xlu1 %7115, %v1918_v5   ;;  %1998 = vperm.xlu0 %7116, %v1919_v55  }
 0x4bc   :  { %2001 = vperm.xlu1 %7115, %v1920_v39   ;;  %2004 = vperm.xlu0 %7116, %v1921_v40  }
 0x4c0   :  { %2007 = vperm.xlu1 %7115, %v1922_v52   ;;  %2010 = vperm.xlu0 %7116, %v1923_v12  }
 0x4c4   :  { %2013 = vperm.xlu1 %7115, %v1924_v42   ;;  %2016 = vperm.xlu0 %7116, %v1925_v4  }
 0x4c8   :  { %2019 = vperm.xlu1 %7115, %v1926_v57   ;;  %2022 = vperm.xlu0 %7116, %v1927_v41  }
 0x4cc   :  { %2025 = vperm.xlu1 %7115, %v1928_v44   ;;  %2028 = vperm.xlu0 %7116, %v1929_v0  }
 0x4d0   :  { %2073 = vperm.xlu1 %7115, %v1944_v34   ;;  %2076 = vperm.xlu0 %7116, %v1945_v48  }
 0x50f   :  { %v2035_v8 = vpop.permute.xlu0 %2034  ;;  %v2032_v1 = vpop.permute.xlu1 %2031 }
 0x510   :  { %v2157_v50 = vrot.slane %v2035_v8, %v8195_v18  ;;  %v2153_v25 = vrot.slane %v2032_v1, %v8192_v27 }
 0x512   :  { %v2158_v51 = vsel %vm1191_vm5, %v2157_v50, %v2153_v25 }
 0x513   :  { %v2041_v7 = vpop.permute.xlu0 %2040  ;;  %v2038_v47 = vpop.permute.xlu1 %2037 }
 0x514   :  { %v2166_v39 = vrot.slane %v2041_v7, %v8195_v18  ;;  %v2162_v54 = vrot.slane %v2038_v47, %v8192_v27 }
 0x516   :  { %v2167_v41 = vsel %vm1191_vm5, %v2166_v39, %v2162_v54 }
 0x517   :  { %v2047_v56 = vpop.permute.xlu0 %2046  ;;  %v2044_v33 = vpop.permute.xlu1 %2043 }
 0x518   :  { %v2175_v49 = vrot.slane %v2047_v56, %v8195_v18  ;;  %v2171_v52 = vrot.slane %v2044_v33, %v8192_v27 }
 0x51a   :  { %v2176_v19 = vsel %vm1191_vm5, %v2175_v49, %v2171_v52 }
 0x51b   :  { %v8587_v36 = vpop.permute.xlu0 %2052  ;;  %v8589_v37 = vpop.permute.xlu1 %2049 }
 0x51c   :  { %v2184_v0 = vrot.slane %v8587_v36, %v8195_v18  ;;  %v2180_v16 = vrot.slane %v8589_v37, %v8192_v27 }
 0x51f   :  { %v8591_v15 = vpop.permute.xlu0 %2058  ;;  %v8593_v53 = vpop.permute.xlu1 %2055 }
 0x520   :  { %v2193_v47 = vrot.slane %v8591_v15, %v8195_v18  ;;  %v2189_v56 = vrot.slane %v8593_v53, %v8192_v27 }
 0x523   :  { %v8595_v17 = vpop.permute.xlu0 %2064  ;;  %v8597_v46 = vpop.permute.xlu1 %2061 }
 0x524   :  { %v2202_v37 = vrot.slane %v8595_v17, %v8195_v18  ;;  %v2185_v17 = vsel %vm1191_vm5, %v2184_v0, %v2180_v16  ;;  %v188_v16 = vld [vmem:[#allocation7 + $0x8] sm:$0xff] }
 0x527   :  { %v8599_v22 = vpop.permute.xlu0 %2070  ;;  %v8601_v38 = vpop.permute.xlu1 %2067 }
 0x528   :  { %v2211_v15 = vrot.slane %v8599_v22, %v8195_v18  ;;  %v2207_v53 = vrot.slane %v8601_v38, %v8192_v27  ;;  %v2194_v22 = vsel %vm1191_vm5, %v2193_v47, %v2189_v56 }
 0x52b   :  { %v1984_v30 = vpop.permute.xlu0 %1983  ;;  %v1987_v61 = vpop.permute.xlu1 %1986 }
 0x52c   :  { %v2081_v42 = vrot.slane %v1984_v30, %v8192_v27  ;;  %v2085_v43 = vrot.slane %v1987_v61, %v8195_v18  ;;  %v2198_v30 = vrot.slane %v8597_v46, %v8192_v27 }
 0x52e   :  { %v2086_v48 = vsel %vm1191_vm5, %v2085_v43, %v2081_v42  ;;  %v2203_v25 = vsel %vm1191_vm5, %v2202_v37, %v2198_v30  ;;  %v2507_v37 = vld [vmem:[#allocation13 + $0x18] sm:$0xff]  ;;  %v2502_v30 = vld [vmem:[%s10348_s7 + $0x10] sm:$0xff] }
 0x52f   :  { %v1993_v32 = vpop.permute.xlu0 %1992  ;;  %v1990_v28 = vpop.permute.xlu1 %1989 }
 0x530   :  { %v2094_v40 = vrot.slane %v1993_v32, %v8195_v18  ;;  %v2090_v45 = vrot.slane %v1990_v28, %v8192_v27 }
 0x532   :  { %v2095_v9 = vsel %vm1191_vm5, %v2094_v40, %v2090_v45  ;;  %v2212_v45 = vsel %vm1191_vm5, %v2211_v15, %v2207_v53  ;;  %v2505_v15 = vld [vmem:[#allocation13 + $0x8] sm:$0xff]  ;;  %v2500_v53 = vld [vmem:[%s10348_s7] sm:$0xff] }
 0x533   :  { %v1999_v62 = vpop.permute.xlu0 %1998  ;;  %v1996_v3 = vpop.permute.xlu1 %1995  ;;  %v2222_v33 = vsel %vm1328_vm6, %v2095_v9, %v2086_v48 }
 0x534   :  { %v2103_v58 = vrot.slane %v1999_v62, %v8195_v18  ;;  %v2099_v12 = vrot.slane %v1996_v3, %v8192_v27 }
 0x536   :  { %v2104_v21 = vsel %vm1191_vm5, %v2103_v58, %v2099_v12 }
 0x537   :  { %v2005_v35 = vpop.permute.xlu0 %2004  ;;  %v2002_v5 = vpop.permute.xlu1 %2001  ;;  %v2223_v61 = vsel %vm1330_vm7, %v2104_v21, %v2222_v33  ;;  %v2317_v21 = vld [vmem:[%s10354_s13] sm:$0x7] }
 0x538   :  { %v2112_v4 = vrot.slane %v2005_v35, %v8195_v18  ;;  %v2108_v11 = vrot.slane %v2002_v5, %v8192_v27 }
 0x53a   :  { %v2113_v8 = vsel %vm1191_vm5, %v2112_v4, %v2108_v11 }
 0x53b   :  { %v2011_v60 = vpop.permute.xlu0 %2010  ;;  %v2008_v55 = vpop.permute.xlu1 %2007  ;;  %v2224_v28 = vsel %vm1332_vm8, %v2113_v8, %v2223_v61  ;;  %v2506_v61 = vld [vmem:[#allocation13 + $0x10] sm:$0xff] }
 0x53c   :  { %v2121_v57 = vrot.slane %v2011_v60, %v8195_v18  ;;  %v2117_v10 = vrot.slane %v2008_v55, %v8192_v27  ;;  %v2229_v55 = vsel %vm1328_vm6, %v2167_v41, %v2158_v51  ;;  %v8675_v51 = vld [vmem:[#allocation7] sm:$0xff] }
 0x53d   :  { %v2230_v50 = vsel %vm1330_vm7, %v2176_v19, %v2229_v55  ;;  %6991 = vmatprep.mubr.msk.f32.mxu0 %vm1351_vm13, %v8675_v51 }
 0x53e   :  { %v2122_v36 = vsel %vm1191_vm5, %v2121_v57, %v2117_v10  ;;  %v2231_v40 = vsel %vm1332_vm8, %v2185_v17, %v2230_v50  ;;  %v7333_v57 = vld [vmem:[%s10347_s6] sm:$0xf]  ;;  %s7589_s6 = smov [#allocation18]  }
 0x53f   :  { %v2017_v63 = vpop.permute.xlu0 %2016  ;;  %v2014_v59 = vpop.permute.xlu1 %2013  ;;  %v2225_v46 = vsel %vm1334_vm9, %v2122_v36, %v2224_v28  ;;  %v2232_v12 = vsel %vm1334_vm9, %v2194_v22, %v2231_v40  ;;  %v1949_v10 = vrot.slane %v7333_v57, %v7760_v20  ;;  %v2503_v36 = vld [vmem:[%s10348_s7 + $0x18] sm:$0xff]  ;;  %v2504_v28 = vld [vmem:[#allocation13] sm:$0xff]  ;;  %s6825_s23 = sshll.u32 %s7589_s6, 4  ;;  %s6826_s23 = int_to_ptr.vmem [resolvable:$true] %s6825_s23 }
 0x540   :  { %v2130_v24 = vrot.slane %v2017_v63, %v8195_v18  ;;  %v2126_v44 = vrot.slane %v2014_v59, %v8192_v27  ;;  %v2233_v42 = vsel %vm1336_vm10, %v2203_v25, %v2232_v12  ;;  %v2508_v40 = vld [vmem:[%s10350_s9] sm:$0xf]  ;;  %s7520_s13 = scalar_lea.vmem %s6826_s23, 32  ;;  %p7525_p4 = scmp.lt.s32.totalorder %s6826_s23, %s6826_s23 }
 0x541   :  { %v2234_v4 = vsel %vm1338_vm12, %v2212_v45, %v2233_v42  ;;  %v2512_v45 = vrot.slane %v2508_v40, %v7746_v6  ;;  %p7521_p3 = scmp.ne.s32.totalorder %s6826_s23, %s7520_s13  ;;  %p7526_p5 = scmp.lt.s32.totalorder %s7520_s13, %s7520_s13 }
 0x542   :  { %v2131_v32 = vsel %vm1191_vm5, %v2130_v24, %v2126_v44 }
 0x543   :  { %v2023_v34 = vpop.permute.xlu0 %2022  ;;  %v2020_v2 = vpop.permute.xlu1 %2019  ;;  %v2226_v38 = vsel %vm1336_vm10, %v2131_v32, %v2225_v46  ;;  %v2501_v32 = vld [vmem:[%s10348_s7 + $0x8] sm:$0xff]  ;;  %p7527_p6 = por %p7526_p5, %p7525_p4 }
 0x544   :  { %v2139_v1 = vrot.slane %v2023_v34, %v8195_v18  ;;  %v2135_v7 = vrot.slane %v2020_v2, %v8192_v27  ;;  %v2402_v34 = vrot.slane %v2317_v21, %v7753_v14 }
 0x545   :  { %p7528_p7 = pnand %p7527_p6, %p7521_p3 }
 0x546   :  { %v2140_v62 = vsel %vm1191_vm5, %v2139_v1, %v2135_v7 }
 0x547   :  { %v2029_v3 = vpop.permute.xlu0 %2028  ;;  %v2026_v35 = vpop.permute.xlu1 %2025  ;;  %v2227_v54 = vsel %vm1338_vm12, %v2140_v62, %v2226_v38  ;;  %v2497_v38 = vrot.slane %v2317_v21, %v7750_v13 }
 0x548   :  { %v2148_v5 = vrot.slane %v2029_v3, %v8195_v18  ;;  %v2144_v60 = vrot.slane %v2026_v35, %v8192_v27 }
 0x54a   :  { %v2149_v39 = vsel %vm1191_vm5, %v2148_v5, %v2144_v60  ;;  %v2491_v5 = vrot.slane %v2317_v21, %v7746_v6 }
 0x54b   :  { %v2077_v49 = vpop.permute.xlu0 %2076  ;;  %v2074_v52 = vpop.permute.xlu1 %2073  ;;  %v2228_v58 = vsel %vm1340_vm11, %v2149_v39, %v2227_v54 }
 0x54c   :  { %v2220_v63 = vrot.slane %v2077_v49, %v8195_v18  ;;  %v2216_v59 = vrot.slane %v2074_v52, %v8192_v27  ;;  %6977 = vmatprep.mubr.msk.f32.mxu1 %vm1351_vm13, %v2228_v58  ;;  %v2597_v49 = vrot.slane %v2508_v40, %v7750_v13 }
 0x54e   :  { %v2221_v43 = vsel %vm1191_vm5, %v2220_v63, %v2216_v59 }
 0x54f   :  { %v2235_v11 = vsel %vm1340_vm11, %v2221_v43, %v2234_v4  ;;  %v10606_v4 = vld [vmem:[#allocation28_spill] sm:$0xff] }
 0x550   :  { %6978 = vmatmul.mubr.msk.f32.vlgmr.msra.gmra.mxu1 %vm1351_vm13, %v2235_v11 }
 0x551   :  { %6984 = vmatprep.mubr.msk.f32.mxu1 %vm1351_vm13, %v8675_v51 }
 0x610   :  { %v6979_v41 = vpop.f32.mrf.mxu1 }
 0x611   :  { %v2312_v9 = vadd.f32 %v6979_v41, %v1949_v10 }
 0x612   :  { %v2306_v24 = vpop.f32.mrf.mxu1 }
 0x613   :  { %v2316_v44 = vmax.f32 %v2312_v9, 0.0  ;;  %v2307_v19 = vadd.f32 %v2306_v24, %v1949_v10 }
 0x615   :  { %v2315_v0 = vmax.f32 %v2307_v19, 0.0  ;;  %6980 = vmatprep.subr.mxu1 %v2316_v44 }
 0x616   :  { %6981 = vmatpush3.msra.mxu1 %v2316_v44 }
 0x617   :  { %6982 = vmatprep.subr.mxu1 %v2315_v0 }
 0x618   :  { %6983 = vmatpush3.msra.mxu1 %v2315_v0 }
 0x619   :  { %6985 = vmatmul.mubr.msk.f32.vlgmr.msra.gmra.mxu1 %vm1351_vm13, %v188_v16  ;;  %6994 = vmatprep.subr.mxu1 %v2503_v36 }
 0x61a   :  { %6995 = vmatpush3.msra.mxu1 %v2503_v36 }
 0x61b   :  { %6996 = vmatprep.subr.mxu1 %v2502_v30 }
 0x61c   :  { %6997 = vmatpush3.msra.mxu1 %v2502_v30 }
 0x61d   :  { %6998 = vmatprep.subr.mxu1 %v2501_v32 }
 0x61e   :  { %6999 = vmatpush3.msra.mxu1 %v2501_v32 }
 0x61f   :  { %7000 = vmatprep.subr.mxu1 %v2500_v53 }
 0x620   :  { %7001 = vmatpush3.msra.mxu1 %v2500_v53 }
 0x6d9   :  { %v6986_v2 = vpop.f32.mrf.mxu1 }
 0x6da   :  { %v2404_v48 = vmul.f32 %v6986_v2, %v2402_v34 }
 0x6db   :  { %v2390_v8 = vpop.f32.mrf.mxu1 }
 0x6dc   :  { %v2406_v1 = vsub.f32 %v2316_v44, %v2404_v48  ;;  %v2403_v7 = vmul.f32 %v2402_v34, %v2390_v8 }
 0x6de   :  { %v2405_v47 = vsub.f32 %v2315_v0, %v2403_v7  ;;  %v2408_v56 = vmul.f32 %v2406_v1, %v2406_v1  ;;  %v8741_v7 = vrot.slane %v2508_v40, %v7753_v14 }
 0x6e0   :  { %6987 = vmatprep.subr.mxu0 %v2408_v56  ;;  %v2407_v33 = vmul.f32 %v2405_v47, %v2405_v47 }
 0x6e1   :  { %6988 = vmatpush3.msra.mxu0 %v2408_v56 }
 0x6e2   :  { %6989 = vmatprep.subr.mxu0 %v2407_v33 }
 0x6e3   :  { %6990 = vmatpush3.msra.mxu0 %v2407_v33 }
 0x6e4   :  { %6992 = vmatmul.mubr.msk.f32.vlgmr.msra.gmra.mxu0 %vm1351_vm13, %v188_v16  ;;  %7005 = vmatprep.subr.mxu0 %v2507_v37 }
 0x6e5   :  { %7006 = vmatpush3.msra.mxu0 %v2507_v37 }
 0x6e6   :  { %7007 = vmatprep.subr.mxu0 %v2506_v61 }
 0x6e7   :  { %7008 = vmatpush3.msra.mxu0 %v2506_v61 }
 0x6e8   :  { %7009 = vmatprep.subr.mxu0 %v2505_v15 }
 0x6e9   :  { %7010 = vmatpush3.msra.mxu0 %v2505_v15 }
 0x6ea   :  { %7011 = vmatprep.subr.mxu0 %v2504_v28 }
 0x6eb   :  { %7012 = vmatpush3.msra.mxu0 %v2504_v28 }
 0x7a4   :  { %v6993_v62 = vpop.f32.mrf.mxu0 }
 0x7a5   :  { %v2481_v3 = vadd.f32 1e-05, %v6993_v62 }
 0x7a6   :  { %v2475_v35 = vpop.f32.mrf.mxu0 }
 0x7a7   :  { %7185 = vrsqrt.f32 %v2481_v3  ;;  %v2476_v17 = vadd.f32 1e-05, %v2475_v35 }
 0x7a9   :  { %7187 = vrsqrt.f32 %v2476_v17 }
 0x7b4   :  { %v7186_v46 = vpop.eup %7185 }
 0x7b5   :  { %v2487_v60 = vmul.f32 %v7186_v46, %v2406_v1 }
 0x7b6   :  { %v7188_v55 = vpop.eup %7187 }
 0x7b7   :  { %v2486_v22 = vmul.f32 %v7188_v55, %v2405_v47  ;;  %v2493_v50 = vmul.f32 %v2491_v5, %v2487_v60 }
 0x7b9   :  { %v2492_v25 = vmul.f32 %v2491_v5, %v2486_v22  ;;  %v2499_v54 = vadd.f32 %v2497_v38, %v2493_v50 }
 0x7bb   :  { %v2498_v39 = vadd.f32 %v2497_v38, %v2492_v25 }
 0x7bd   :  { %7002 = vmatprep.mubr.msk.f32.mxu1 %vm713_vm2, %v2498_v39  ;;  %7013 = vmatprep.mubr.msk.f32.mxu0 %vm713_vm2, %v2498_v39 }
 0x7be   :  { %7003 = vmatmul.mubr.msk.f32.vlgmr.msra.gmra.mxu1 %vm713_vm2, %v2499_v54  ;;  %7014 = vmatmul.mubr.msk.f32.vlgmr.msra.gmra.mxu0 %vm713_vm2, %v2499_v54 }
 0x7bf   :  { %7027 = vmatprep.mubr.msk.f32.mxu0 %vm1351_vm13, %v8675_v51 }
 0x87e   :  { %v7004_v52 = vpop.f32.mrf.mxu1  ;;  %v7015_v58 = vpop.f32.mrf.mxu0 }
 0x87f   :  { %v8716_v12 = vadd.f32 %v7004_v52, %v2512_v45  ;;  %v2670_v63 = vadd.f32 %v7015_v58, %v2597_v49 }
 0x880   :  { %v2585_v59 = vpop.f32.mrf.mxu1  ;;  %v2664_v42 = vpop.f32.mrf.mxu0 }
 0x881   :  { %v2724_v43 = vcombine.high %v2670_v63, %v2670_v63  ;;  %v2731_v11 = vrot.slane %v2670_v63, %v10606_v4  ;;  %v8719_v57 = vadd.f32 %v2585_v59, %v2512_v45  ;;  %v2665_v51 = vadd.f32 %v2664_v42, %v2597_v49  ;;  %7016 = vmatprep.subr.mxu1 %v8716_v12 }
 0x882   :  { %7017 = vmatpush3.msra.mxu1 %v8716_v12 }
 0x883   :  { %v2747_v10 = vrot.slane %v2731_v11, %v10606_v4  ;;  %7018 = vmatprep.subr.mxu1 %v8719_v57  ;;  %v2738_v41 = vrot.slane %v2724_v43, %v10606_v4  ;;  %v2739_v9 = vcombine.high %v2731_v11, %v2731_v11  ;;  %v2682_v24 = vrot.slane %v2665_v51, %v10606_v4 }
 0x884   :  { %7019 = vmatpush3.msra.mxu1 %v8719_v57  ;;  %v2675_v44 = vcombine.high %v2665_v51, %v2665_v51 }
 0x885   :  { %v2808_v19 = vrot.slane %v2747_v10, %v7746_v6  ;;  %v2690_v0 = vcombine.high %v2682_v24, %v2682_v24  ;;  %v2698_v16 = vrot.slane %v2682_v24, %v10606_v4  ;;  %v2740_v21 = vcombine.high %v2738_v41, %v2738_v41 }
 0x886   :  { %v8731_v34 = vrot.slane %v2739_v9, %v10606_v4  ;;  %v8735_v48 = vrot.slane %v2738_v41, %v10606_v4  ;;  %v2769_v8 = vcombine.high %v2747_v10, %v2747_v10  ;;  %v8738_v1 = vrot.slane %v2675_v44, %v10606_v4 }
 0x887   :  { %v2870_v2 = vadd.f32 %v2808_v19, %v8716_v12  ;;  %v8744_v47 = vrot.slane %v2690_v0, %v10606_v4  ;;  %v2776_v56 = vrot.slane %v2698_v16, %v7746_v6  ;;  %v2869_v36 = vadd.f32 %v2808_v19, %v8719_v57 }
 0x888   :  { %v8749_v37 = vrot.slane %v2740_v21, %v10606_v4  ;;  %v2771_v30 = vcombine.high %v8731_v34, %v8731_v34  ;;  %v2812_v61 = vrot.slane %v8731_v34, %v7746_v6  ;;  %v2816_v32 = vrot.slane %v2769_v8, %v7746_v6 }
 0x889   :  { %vm2902_vm14 = vcmp.gt.f32.partialorder %v2870_v2, 0.0  ;;  %v2934_v33 = vmul.f32 0.2, %v2870_v2  ;;  %v2824_v15 = vrot.slane %v8735_v48, %v7746_v6  ;;  %v8760_v53 = vrot.slane %v8738_v1, %v10606_v4 }
 0x88a   :  { %v2853_v28 = vadd.f32 %v2776_v56, %v8719_v57  ;;  %v2720_v62 = vcombine.high %v2698_v16, %v2698_v16  ;;  %v2780_v3 = vrot.slane %v8744_v47, %v7746_v6  ;;  %v2854_v35 = vadd.f32 %v2776_v56, %v8716_v12 }
 0x88b   :  { %v2966_v17 = vsel %vm2902_vm14, %v2870_v2, %v2934_v33  ;;  %vm2901_vm15 = vcmp.gt.f32.partialorder %v2869_v36, 0.0  ;;  %v2933_v5 = vmul.f32 0.2, %v2869_v36  ;;  %v2872_v22 = vadd.f32 %v2812_v61, %v8716_v12 }
 0x88c   :  { %v3002_v46 = vmul.f32 %v8741_v7, %v2966_v17  ;;  %vm2885_vm0 = vcmp.gt.f32.partialorder %v2853_v28, 0.0  ;;  %vm2886_vm1 = vcmp.gt.f32.partialorder %v2854_v35, 0.0  ;;  %v2918_v60 = vmul.f32 0.2, %v2854_v35 }
 0x88d   :  { %v2917_v55 = vmul.f32 0.2, %v2853_v28  ;;  %v2965_v50 = vsel %vm2901_vm15, %v2869_v36, %v2933_v5  ;;  %v2871_v25 = vadd.f32 %v2812_v61, %v8719_v57  ;;  %v2874_v39 = vadd.f32 %v2816_v32, %v8716_v12 }
 0x88e   :  { %v3068_v38 = vsel %vm713_vm2, %v3002_v46, 0.0  ;;  %v3001_v54 = vmul.f32 %v8741_v7, %v2965_v50  ;;  %v2950_v40 = vsel %vm2886_vm1, %v2854_v35, %v2918_v60  ;;  %vm2904_vm3 = vcmp.gt.f32.partialorder %v2872_v22, 0.0 }
 0x88f   :  { %3069 = vadd.xlane.f32.xlu0 %v3068_v38  ;;  %v2949_v45 = vsel %vm2885_vm0, %v2853_v28, %v2917_v55  ;;  %v2986_v49 = vmul.f32 %v8741_v7, %v2950_v40  ;;  %v2936_v58 = vmul.f32 0.2, %v2872_v22  ;;  %vm2903_vm4 = vcmp.gt.f32.partialorder %v2871_v25, 0.0 }
 0x890   :  { %v2985_v52 = vmul.f32 %v8741_v7, %v2949_v45  ;;  %v3065_v63 = vsel %vm713_vm2, %v3001_v54, 0.0  ;;  %v2935_v59 = vmul.f32 0.2, %v2871_v25  ;;  %vm2906_vm14 = vcmp.gt.f32.partialorder %v2874_v39, 0.0 }
 0x891   :  { %v2938_v42 = vmul.f32 0.2, %v2874_v39  ;;  %v2784_v43 = vrot.slane %v2720_v62, %v7746_v6  ;;  %3066 = vadd.xlane.f32.xlu1 %v3065_v63  ;;  %v3020_v11 = vsel %vm713_vm2, %v2986_v49, 0.0  ;;  %v2968_v51 = vsel %vm2904_vm3, %v2872_v22, %v2936_v58 }
 0x892   :  { %v2873_v10 = vadd.f32 %v2816_v32, %v8719_v57  ;;  %v3004_v41 = vmul.f32 %v8741_v7, %v2968_v51  ;;  %v2967_v9 = vsel %vm2903_vm4, %v2871_v25, %v2935_v59  ;;  %v2878_v44 = vadd.f32 %v2824_v15, %v8716_v12 }
 0x893   :  { %3021 = vadd.xlane.f32.xlu0 %v3020_v11  ;;  %v2970_v24 = vsel %vm2906_vm14, %v2874_v39, %v2938_v42  ;;  %v2792_v19 = vrot.slane %v8760_v53, %v7746_v6  ;;  %v3017_v0 = vsel %vm713_vm2, %v2985_v52, 0.0  ;;  %v3003_v21 = vmul.f32 %v8741_v7, %v2967_v9 }
 0x894   :  { %vm2905_vm15 = vcmp.gt.f32.partialorder %v2873_v10, 0.0  ;;  %v2937_v16 = vmul.f32 0.2, %v2873_v10  ;;  %vm2910_vm0 = vcmp.gt.f32.partialorder %v2878_v44, 0.0  ;;  %v2942_v2 = vmul.f32 0.2, %v2878_v44 }
 0x895   :  { %v2877_v8 = vadd.f32 %v2824_v15, %v8719_v57  ;;  %3018 = vadd.xlane.f32.xlu1 %v3017_v0  ;;  %v3074_v56 = vsel %vm713_vm2, %v3004_v41, 0.0  ;;  %v3006_v33 = vmul.f32 %v8741_v7, %v2970_v24  ;;  %v2855_v61 = vadd.f32 %v2780_v3, %v8719_v57 }
 0x896   :  { %v2969_v36 = vsel %vm2905_vm15, %v2873_v10, %v2937_v16  ;;  %v2770_v32 = vcombine.high %v8735_v48, %v8735_v48  ;;  %v2974_v28 = vsel %vm2910_vm0, %v2878_v44, %v2942_v2  ;;  %v2820_v15 = vrot.slane %v2771_v30, %v7746_v6 }
 0x897   :  { %3075 = vadd.xlane.f32.xlu0 %v3074_v56  ;;  %vm2909_vm1 = vcmp.gt.f32.partialorder %v2877_v8, 0.0  ;;  %v2941_v62 = vmul.f32 0.2, %v2877_v8  ;;  %vm2887_vm3 = vcmp.gt.f32.partialorder %v2855_v61, 0.0  ;;  %v2919_v35 = vmul.f32 0.2, %v2855_v61 }
 0x898   :  { %v2857_v17 = vadd.f32 %v2784_v43, %v8719_v57  ;;  %v3071_v46 = vsel %vm713_vm2, %v3003_v21, 0.0  ;;  %v3005_v5 = vmul.f32 %v8741_v7, %v2969_v36  ;;  %v2856_v60 = vadd.f32 %v2780_v3, %v8716_v12 }
 0x899   :  { %v2861_v48 = vadd.f32 %v2792_v19, %v8719_v57  ;;  %3072 = vadd.xlane.f32.xlu1 %v3071_v46  ;;  %v3080_v55 = vsel %vm713_vm2, %v3006_v33, 0.0  ;;  %v3010_v22 = vmul.f32 %v8741_v7, %v2974_v28  ;;  %v2973_v38 = vsel %vm2909_vm1, %v2877_v8, %v2941_v62 }
 0x89a   :  { %vm2889_vm4 = vcmp.gt.f32.partialorder %v2857_v17, 0.0  ;;  %v2828_v34 = vrot.slane %v8749_v37, %v7746_v6  ;;  %v2951_v30 = vsel %vm2887_vm3, %v2855_v61, %v2919_v35  ;;  %v2921_v50 = vmul.f32 0.2, %v2857_v17 }
 0x89b   :  { %3081 = vadd.xlane.f32.xlu0 %v3080_v55  ;;  %v2920_v25 = vmul.f32 0.2, %v2856_v60  ;;  %vm2888_vm14 = vcmp.gt.f32.partialorder %v2856_v60, 0.0  ;;  %vm2893_vm15 = vcmp.gt.f32.partialorder %v2861_v48, 0.0  ;;  %v2925_v39 = vmul.f32 0.2, %v2861_v48 }
 0x89c   :  { %v2858_v3 = vadd.f32 %v2784_v43, %v8716_v12  ;;  %v3077_v54 = vsel %vm713_vm2, %v3005_v5, 0.0  ;;  %v3009_v40 = vmul.f32 %v8741_v7, %v2973_v38  ;;  %v2953_v45 = vsel %vm2889_vm4, %v2857_v17, %v2921_v50 }
 0x89d   :  { %v2875_v49 = vadd.f32 %v2820_v15, %v8719_v57  ;;  %v2691_v52 = vcombine.high %v8738_v1, %v8738_v1  ;;  %v2722_v58 = vcombine.high %v8744_v47, %v8744_v47  ;;  %3078 = vadd.xlane.f32.xlu1 %v3077_v54  ;;  %v3092_v63 = vsel %vm713_vm2, %v3010_v22, 0.0 }
 0x89e   :  { %v2987_v59 = vmul.f32 %v8741_v7, %v2951_v30  ;;  %v2989_v42 = vmul.f32 %v8741_v7, %v2953_v45  ;;  %v2952_v43 = vsel %vm2888_vm14, %v2856_v60, %v2920_v25  ;;  %v2957_v11 = vsel %vm2893_vm15, %v2861_v48, %v2925_v39 }
 0x89f   :  { %3093 = vadd.xlane.f32.xlu0 %v3092_v63  ;;  %v2922_v51 = vmul.f32 0.2, %v2858_v3  ;;  %vm2890_vm0 = vcmp.gt.f32.partialorder %v2858_v3, 0.0  ;;  %v2939_v10 = vmul.f32 0.2, %v2875_v49  ;;  %v2862_v41 = vadd.f32 %v2792_v19, %v8716_v12 }
 0x8a0   :  { %v2879_v1 = vadd.f32 %v2828_v34, %v8719_v57  ;;  %v2832_v9 = vrot.slane %v2770_v32, %v7746_v6  ;;  %v3089_v47 = vsel %vm713_vm2, %v3009_v40, 0.0  ;;  %vm2907_vm1 = vcmp.gt.f32.partialorder %v2875_v49, 0.0 }
 0x8a1   :  { %v2876_v24 = vadd.f32 %v2820_v15, %v8716_v12  ;;  %3090 = vadd.xlane.f32.xlu1 %v3089_v47  ;;  %v3023_v44 = vsel %vm713_vm2, %v2987_v59, 0.0  ;;  %v2988_v0 = vmul.f32 %v8741_v7, %v2952_v43  ;;  %vm2894_vm3 = vcmp.gt.f32.partialorder %v2862_v41, 0.0 }
 0x8a2   :  { %v2926_v16 = vmul.f32 0.2, %v2862_v41  ;;  %v2788_v21 = vrot.slane %v2722_v58, %v7746_v6  ;;  %v3029_v19 = vsel %vm713_vm2, %v2989_v42, 0.0  ;;  %v2993_v2 = vmul.f32 %v8741_v7, %v2957_v11 }
 0x8a3   :  { %3024 = vadd.xlane.f32.xlu0 %v3023_v44  ;;  %v2954_v8 = vsel %vm2890_vm0, %v2858_v3, %v2922_v51  ;;  %v2971_v56 = vsel %vm2907_vm1, %v2875_v49, %v2939_v10  ;;  %vm2911_vm4 = vcmp.gt.f32.partialorder %v2879_v1, 0.0  ;;  %v2943_v33 = vmul.f32 0.2, %v2879_v1 }
 0x8a4   :  { %v2940_v36 = vmul.f32 0.2, %v2876_v24  ;;  %v2958_v61 = vsel %vm2894_vm3, %v2862_v41, %v2926_v16  ;;  %vm2908_vm14 = vcmp.gt.f32.partialorder %v2876_v24, 0.0  ;;  %v2881_v32 = vadd.f32 %v2832_v9, %v8719_v57 }
 0x8a5   :  { %v2880_v28 = vadd.f32 %v2828_v34, %v8716_v12  ;;  %v2719_v62 = vrot.slane %v2691_v52, %v10606_v4  ;;  %3030 = vadd.xlane.f32.xlu1 %v3029_v19  ;;  %v3026_v15 = vsel %vm713_vm2, %v2988_v0, 0.0  ;;  %v2990_v35 = vmul.f32 %v8741_v7, %v2954_v8 }
 0x8a6   :  { %v2721_v17 = vcombine.high %v8760_v53, %v8760_v53  ;;  %v3041_v46 = vsel %vm713_vm2, %v2993_v2, 0.0  ;;  %v3007_v5 = vmul.f32 %v8741_v7, %v2971_v56  ;;  %v2994_v60 = vmul.f32 %v8741_v7, %v2958_v61 }
 0x8a7   :  { %3027 = vadd.xlane.f32.xlu0 %v3026_v15  ;;  %v2975_v48 = vsel %vm2911_vm4, %v2879_v1, %v2943_v33  ;;  %v2972_v55 = vsel %vm2908_vm14, %v2876_v24, %v2940_v36  ;;  %v2945_v22 = vmul.f32 0.2, %v2881_v32  ;;  %v2944_v38 = vmul.f32 0.2, %v2880_v28 }
 0x8a8   :  { %v2859_v34 = vadd.f32 %v2788_v21, %v8719_v57  ;;  %v2882_v30 = vadd.f32 %v2832_v9, %v8716_v12  ;;  %v2796_v50 = vrot.slane %v2719_v62, %v7746_v6  ;;  %v3032_v53 = vsel %vm713_vm2, %v2990_v35, 0.0 }
 0x8a9   :  { %3042 = vadd.xlane.f32.xlu1 %v3041_v46  ;;  %vm2913_vm15 = vcmp.gt.f32.partialorder %v2881_v32, 0.0  ;;  %vm2912_vm0 = vcmp.gt.f32.partialorder %v2880_v28, 0.0  ;;  %v2772_v25 = vcombine.high %v8749_v37, %v8749_v37  ;;  %v2723_v39 = vcombine.high %v2719_v62, %v2719_v62 }
 0x8aa   :  { %v2800_v3 = vrot.slane %v2721_v17, %v7746_v6  ;;  %v3083_v54 = vsel %vm713_vm2, %v3007_v5, 0.0  ;;  %v3044_v40 = vsel %vm713_vm2, %v2994_v60, 0.0  ;;  %v3011_v45 = vmul.f32 %v8741_v7, %v2975_v48 }
 0x8ab   :  { %3033 = vadd.xlane.f32.xlu0 %v3032_v53  ;;  %v3008_v49 = vmul.f32 %v8741_v7, %v2972_v55  ;;  %v2977_v52 = vsel %vm2913_vm15, %v2881_v32, %v2945_v22  ;;  %v2976_v58 = vsel %vm2912_vm0, %v2880_v28, %v2944_v38  ;;  %v2923_v63 = vmul.f32 0.2, %v2859_v34 }
 0x8ac   :  { %v2946_v59 = vmul.f32 0.2, %v2882_v30  ;;  %vm2891_vm1 = vcmp.gt.f32.partialorder %v2859_v34, 0.0  ;;  %vm2914_vm3 = vcmp.gt.f32.partialorder %v2882_v30, 0.0  ;;  %v2863_v37 = vadd.f32 %v2796_v50, %v8719_v57 }
 0x8ad   :  { %3084 = vadd.xlane.f32.xlu1 %v3083_v54  ;;  %v2860_v42 = vadd.f32 %v2788_v21, %v8716_v12  ;;  %v3095_v43 = vsel %vm713_vm2, %v3011_v45, 0.0  ;;  %v3086_v11 = vsel %vm713_vm2, %v3008_v49, 0.0  ;;  %v3013_v51 = vmul.f32 %v8741_v7, %v2977_v52 }
 0x8ae   :  { %v3012_v10 = vmul.f32 %v8741_v7, %v2976_v58  ;;  %v2955_v41 = vsel %vm2891_vm1, %v2859_v34, %v2923_v63  ;;  %v2978_v1 = vsel %vm2914_vm3, %v2882_v30, %v2946_v59  ;;  %v2865_v9 = vadd.f32 %v2800_v3, %v8719_v57 }
 0x8af   :  { %3045 = vadd.xlane.f32.xlu0 %v3044_v40  ;;  %v2927_v47 = vmul.f32 0.2, %v2863_v37  ;;  %v2924_v24 = vmul.f32 0.2, %v2860_v42  ;;  %v2836_v44 = vrot.slane %v2772_v25, %v7746_v6  ;;  %v2804_v0 = vrot.slane %v2723_v39, %v7746_v6 }
 0x8b0   :  { %vm2895_vm4 = vcmp.gt.f32.partialorder %v2863_v37, 0.0  ;;  %vm2892_vm14 = vcmp.gt.f32.partialorder %v2860_v42, 0.0  ;;  %v2864_v16 = vadd.f32 %v2796_v50, %v8716_v12  ;;  %v3101_v21 = vsel %vm713_vm2, %v3013_v51, 0.0 }
 0x8b1   :  { %3096 = vadd.xlane.f32.xlu1 %v3095_v43  ;;  %v2991_v19 = vmul.f32 %v8741_v7, %v2955_v41  ;;  %v3098_v2 = vsel %vm713_vm2, %v3012_v10, 0.0  ;;  %v3014_v8 = vmul.f32 %v8741_v7, %v2978_v1  ;;  %v2929_v56 = vmul.f32 0.2, %v2865_v9 }
 0x8b2   :  { %v2868_v33 = vadd.f32 %v2804_v0, %v8716_v12  ;;  %v2959_v36 = vsel %vm2895_vm4, %v2863_v37, %v2927_v47  ;;  %v2956_v61 = vsel %vm2892_vm14, %v2860_v42, %v2924_v24  ;;  %vm2897_vm15 = vcmp.gt.f32.partialorder %v2865_v9, 0.0 }
 0x8b3   :  { %3087 = vadd.xlane.f32.xlu0 %v3086_v11  ;;  %v2883_v32 = vadd.f32 %v2836_v44, %v8719_v57  ;;  %v2928_v28 = vmul.f32 0.2, %v2864_v16  ;;  %v2866_v62 = vadd.f32 %v2800_v3, %v8716_v12  ;;  %v3035_v15 = vsel %vm713_vm2, %v2991_v19, 0.0 }
 0x8b4   :  { %vm2900_vm0 = vcmp.gt.f32.partialorder %v2868_v33, 0.0  ;;  %vm2896_vm1 = vcmp.gt.f32.partialorder %v2864_v16, 0.0  ;;  %v2932_v35 = vmul.f32 0.2, %v2868_v33  ;;  %v3104_v17 = vsel %vm713_vm2, %v3014_v8, 0.0 }
 0x8b5   :  { %3102 = vadd.xlane.f32.xlu1 %v3101_v21  ;;  %v2995_v46 = vmul.f32 %v8741_v7, %v2959_v36  ;;  %v2992_v5 = vmul.f32 %v8741_v7, %v2956_v61  ;;  %v2961_v60 = vsel %vm2897_vm15, %v2865_v9, %v2929_v56  ;;  %v2947_v48 = vmul.f32 0.2, %v2883_v32  ;;  %v10607_v9 = vld [vmem:[#allocation35_spill] sm:$0xff] }
 0x8b6   :  { %v2867_v55 = vadd.f32 %v2804_v0, %v8719_v57  ;;  %v2884_v22 = vadd.f32 %v2836_v44, %v8716_v12  ;;  %v2964_v38 = vsel %vm2900_vm0, %v2868_v33, %v2932_v35  ;;  %v2960_v34 = vsel %vm2896_vm1, %v2864_v16, %v2928_v28  ;;  %v10608_v44 = vld [vmem:[#allocation36_spill] sm:$0xff]  ;;  %v10609_v16 = vld [vmem:[#allocation29_spill] sm:$0xff] }
 0x8b7   :  { %3099 = vadd.xlane.f32.xlu0 %v3098_v2  ;;  %vm2915_vm3 = vcmp.gt.f32.partialorder %v2883_v32, 0.0  ;;  %v2930_v30 = vmul.f32 0.2, %v2866_v62  ;;  %v3000_v50 = vmul.f32 %v8741_v7, %v2964_v38  ;;  %vm2898_vm4 = vcmp.gt.f32.partialorder %v2866_v62, 0.0  ;;  %v10610_v2 = vld [vmem:[#allocation32_spill] sm:$0xff]  ;;  %v10611_v33 = vld [vmem:[#allocation37_spill] sm:$0xff] }
 0x8b8   :  { %v3047_v53 = vsel %vm713_vm2, %v2995_v46, 0.0  ;;  %v2997_v25 = vmul.f32 %v8741_v7, %v2961_v60  ;;  %v3038_v39 = vsel %vm713_vm2, %v2992_v5, 0.0  ;;  %v2996_v3 = vmul.f32 %v8741_v7, %v2960_v34  ;;  %v10614_v46 = vld [vmem:[#allocation42_spill] sm:$0xff] }
 0x8b9   :  { %3036 = vadd.xlane.f32.xlu1 %v3035_v15  ;;  %v2979_v57 = vsel %vm2915_vm3, %v2883_v32, %v2947_v48  ;;  %v2931_v54 = vmul.f32 0.2, %v2867_v55  ;;  %v2962_v12 = vsel %vm2898_vm4, %v2866_v62, %v2930_v30  ;;  %vm2899_vm14 = vcmp.gt.f32.partialorder %v2867_v55, 0.0  ;;  %v10612_v32 = vld [vmem:[#allocation38_spill] sm:$0xff]  ;;  %v10613_v15 = vld [vmem:[#allocation41_spill] sm:$0xff] }
 0x8ba   :  { %v2948_v40 = vmul.f32 0.2, %v2884_v22  ;;  %vm2916_vm15 = vcmp.gt.f32.partialorder %v2884_v22, 0.0  ;;  %v3053_v45 = vsel %vm713_vm2, %v2997_v25, 0.0  ;;  %v3015_v49 = vmul.f32 %v8741_v7, %v2979_v57  ;;  %v10615_v48 = vld [vmem:[#allocation49_spill] sm:$0xff]  ;;  %v10616_v38 = vld [vmem:[#allocation50_spill] sm:$0xff] }
 0x8bb   :  { %3105 = vadd.xlane.f32.xlu0 %v3104_v17  ;;  %v3050_v52 = vsel %vm713_vm2, %v2996_v3, 0.0  ;;  %v2998_v58 = vmul.f32 %v8741_v7, %v2962_v12  ;;  %v2963_v63 = vsel %vm2899_vm14, %v2867_v55, %v2931_v54  ;;  %v3062_v41 = vsel %vm713_vm2, %v3000_v50, 0.0  ;;  %v10617_v50 = vld [vmem:[#allocation30_spill] sm:$0xff]  ;;  %v10618_v3 = vld [vmem:[#allocation31_spill] sm:$0xff] }
 0x8bc   :  { %v2980_v59 = vsel %vm2916_vm15, %v2884_v22, %v2948_v40  ;;  %v3107_v37 = vsel %vm713_vm2, %v3015_v49, 0.0  ;;  %v2999_v42 = vmul.f32 %v8741_v7, %v2963_v63  ;;  %v10619_v40 = vld [vmem:[#allocation33_spill] sm:$0xff] }
 0x8bd   :  { %3048 = vadd.xlane.f32.xlu1 %v3047_v53  ;;  %v3056_v43 = vsel %vm713_vm2, %v2998_v58, 0.0  ;;  %v3016_v11 = vmul.f32 %v8741_v7, %v2980_v59  ;;  %v10622_v59 = vld [vmem:[#allocation43_spill] sm:$0xff] }
 0x8be   :  { %v3059_v51 = vsel %vm713_vm2, %v2999_v42, 0.0 }
 0x8bf   :  { %3039 = vadd.xlane.f32.xlu0 %v3038_v39  ;;  %v3110_v10 = vsel %vm713_vm2, %v3016_v11, 0.0 }
 0x8c1   :  { %3054 = vadd.xlane.f32.xlu1 %v3053_v45 }
 0x8c3   :  { %3051 = vadd.xlane.f32.xlu0 %v3050_v52  ;;  %v10621_v52 = vld [vmem:[#allocation34_spill] sm:$0xff] }
 0x8c5   :  { %3108 = vadd.xlane.f32.xlu1 %v3107_v37 }
 0x8c7   :  { %3057 = vadd.xlane.f32.xlu0 %v3056_v43  ;;  %v10624_v43 = vld [vmem:[#allocation44_spill] sm:$0xff] }
 0x8c9   :  { %3060 = vadd.xlane.f32.xlu1 %v3059_v51 }
 0x8cb   :  { %3111 = vadd.xlane.f32.xlu0 %v3110_v10  ;;  %v10626_v10 = vld [vmem:[#allocation45_spill] sm:$0xff] }
 0x8cf   :  { %3063 = vadd.xlane.f32.xlu0 %v3062_v41 }
 0x918   :  { %v3070_v1 = vpop.xlane.xlu0 %3069 }
 0x919   :  { %v8887_v47 = vadd.f32 %v3070_v1, %v10607_v9 }
 0x91a   :  { %v3067_v24 = vpop.xlane.xlu1 %3066 }
 0x91b   :  { %3229 = vperm.xlu0 %7116, %v8887_v47   ;;  %v8891_v0 = vadd.f32 %v3067_v24, %v10608_v44  ;;  %v10627_v24 = vld [vmem:[#allocation46_spill] sm:$0xff] }
 0x91c   :  { %v3022_v7 = vpop.xlane.xlu0 %3021 }
 0x91d   :  { %v8894_v21 = vadd.f32 %v3022_v7, %v10609_v16  ;;  %3226 = vperm.xlu1 %7115, %v8891_v0  }
 0x91e   :  { %v3019_v19 = vpop.xlane.xlu1 %3018 }
 0x91f   :  { %3181 = vperm.xlu0 %7116, %v8894_v21   ;;  %v8899_v8 = vadd.f32 %v3019_v19, %v10610_v2 }
 0x920   :  { %v3076_v56 = vpop.xlane.xlu0 %3075 }
 0x921   :  { %v8902_v36 = vadd.f32 %v3076_v56, %v10611_v33  ;;  %3178 = vperm.xlu1 %7115, %v8899_v8   ;;  %v10628_v56 = vld [vmem:[#allocation53_spill] sm:$0xff] }
 0x922   :  { %v3073_v61 = vpop.xlane.xlu1 %3072 }
 0x923   :  { %3235 = vperm.xlu0 %7116, %v8902_v36   ;;  %v8907_v28 = vadd.f32 %v3073_v61, %v10612_v32 }
 0x924   :  { %v3082_v62 = vpop.xlane.xlu0 %3081 }
 0x925   :  { %v8910_v35 = vadd.f32 %v3082_v62, %v10613_v15  ;;  %3232 = vperm.xlu1 %7115, %v8907_v28  }
 0x926   :  { %v3079_v17 = vpop.xlane.xlu1 %3078 }
 0x927   :  { %3241 = vperm.xlu0 %7116, %v8910_v35   ;;  %v8915_v5 = vadd.f32 %v3079_v17, %v10614_v46  ;;  %v10629_v17 = vld [vmem:[#allocation54_spill] sm:$0xff] }
 0x928   :  { %v3094_v60 = vpop.xlane.xlu0 %3093 }
 0x929   :  { %v8918_v55 = vadd.f32 %v3094_v60, %v10615_v48  ;;  %3238 = vperm.xlu1 %7115, %v8915_v5  }
 0x92a   :  { %v3091_v22 = vpop.xlane.xlu1 %3090 }
 0x92b   :  { %3253 = vperm.xlu0 %7116, %v8918_v55   ;;  %v8923_v34 = vadd.f32 %v3091_v22, %v10616_v38 }
 0x92c   :  { %v3025_v30 = vpop.xlane.xlu0 %3024 }
 0x92d   :  { %3250 = vperm.xlu1 %7115, %v8923_v34   ;;  %v8927_v53 = vadd.f32 %v3025_v30, %v10617_v50  ;;  %v10630_v30 = vld [vmem:[#allocation57_spill] sm:$0xff] }
 0x92e   :  { %v3031_v25 = vpop.xlane.xlu1 %3030 }
 0x92f   :  { %v8939_v58 = vadd.f32 %v3031_v25, %v10621_v52 }
 0x930   :  { %v3028_v39 = vpop.xlane.xlu0 %3027 }
 0x931   :  { %3184 = vperm.xlu1 %7115, %v8927_v53   ;;  %v8931_v57 = vadd.f32 %v3028_v39, %v10618_v3 }
 0x932   :  { %v3043_v54 = vpop.xlane.xlu1 %3042 }
 0x933   :  { %v8947_v11 = vadd.f32 %v3043_v54, %v10624_v43  ;;  %v10631_v54 = vld [vmem:[#allocation58_spill] sm:$0xff]  ;;  %v10644_v43 = vld [vmem:[#allocation56_spill] sm:$0xff] }
 0x934   :  { %v3034_v12 = vpop.xlane.xlu0 %3033 }
 0x935   :  { %v8934_v45 = vadd.f32 %v3034_v12, %v10619_v40  ;;  %3187 = vperm.xlu1 %7115, %v8931_v57   ;;  %10625 = vst [vmem:[#allocation61_spill] sm:$0xff] %v8947_v11 }
 0x936   :  { %v3085_v49 = vpop.xlane.xlu1 %3084 }
 0x937   :  { %10620 = vst [vmem:[#allocation63_spill] sm:$0xff] %v8934_v45  ;;  %3193 = vperm.xlu0 %7116, %v8934_v45   ;;  %v8955_v7 = vadd.f32 %v3085_v49, %v10627_v24  ;;  %v10640_v24 = vld [vmem:[#allocation51_spill] sm:$0xff] }
 0x938   :  { %v3046_v63 = vpop.xlane.xlu0 %3045 }
 0x939   :  { %v8942_v37 = vadd.f32 %v3046_v63, %v10622_v59  ;;  %3190 = vperm.xlu1 %7115, %v8939_v58   ;;  %v10632_v63 = vld [vmem:[#allocation39_spill] sm:$0xff] }
 0x93a   :  { %v3097_v42 = vpop.xlane.xlu1 %3096 }
 0x93b   :  { %10623 = vst [vmem:[#allocation62_spill] sm:$0xff] %v8942_v37  ;;  %3205 = vperm.xlu0 %7116, %v8942_v37   ;;  %v8963_v60 = vadd.f32 %v3097_v42, %v10629_v17  ;;  %v10636_v17 = vld [vmem:[#allocation47_spill] sm:$0xff] }
 0x93c   :  { %v3088_v51 = vpop.xlane.xlu0 %3087 }
 0x93d   :  { %v8950_v41 = vadd.f32 %v3088_v51, %v10626_v10  ;;  %3202 = vperm.xlu1 %7115, %v8947_v11  }
 0x93e   :  { %v3103_v1 = vpop.xlane.xlu1 %3102 }
 0x93f   :  { %3247 = vperm.xlu0 %7116, %v8950_v41   ;;  %v8971_v12 = vadd.f32 %v3103_v1, %v10631_v54  ;;  %v10638_v54 = vld [vmem:[#allocation48_spill] sm:$0xff] }
 0x940   :  { %v3100_v19 = vpop.xlane.xlu0 %3099 }
 0x941   :  { %v8958_v61 = vadd.f32 %v3100_v19, %v10628_v56  ;;  %3244 = vperm.xlu1 %7115, %v8955_v7   ;;  %v10634_v19 = vld [vmem:[#allocation40_spill] sm:$0xff] }
 0x942   :  { %v3037_v62 = vpop.xlane.xlu1 %3036 }
 0x943   :  { %3259 = vperm.xlu0 %7116, %v8958_v61  }
 0x944   :  { %v3106_v22 = vpop.xlane.xlu0 %3105 }
 0x945   :  { %v8966_v25 = vadd.f32 %v3106_v22, %v10630_v30  ;;  %3256 = vperm.xlu1 %7115, %v8963_v60   ;;  %v8979_v22 = vadd.f32 %v3037_v62, %v10634_v19  ;;  %v10642_v62 = vld [vmem:[#allocation52_spill] sm:$0xff] }
 0x946   :  { %v3049_v39 = vpop.xlane.xlu1 %3048 }
 0x947   :  { %3265 = vperm.xlu0 %7116, %v8966_v25   ;;  %10635 = vst [vmem:[#allocation64_spill] sm:$0xff] %v8979_v22 }
 0x948   :  { %v3040_v49 = vpop.xlane.xlu0 %3039 }
 0x949   :  { %v8974_v51 = vadd.f32 %v3040_v49, %v10632_v63  ;;  %3262 = vperm.xlu1 %7115, %v8971_v12   ;;  %v8987_v49 = vadd.f32 %v3049_v39, %v10638_v54  ;;  %v10646_v54 = vld [vmem:[#allocation55_spill] sm:$0xff] }
 0x94a   :  { %v3055_v42 = vpop.xlane.xlu1 %3054 }
 0x94b   :  { %10633 = vst [vmem:[#allocation66_spill] sm:$0xff] %v8974_v51  ;;  %3199 = vperm.xlu0 %7116, %v8974_v51   ;;  %10639 = vst [vmem:[#allocation65_spill] sm:$0xff] %v8987_v49  ;;  %v8995_v19 = vadd.f32 %v3055_v42, %v10642_v62  ;;  %v10650_v42 = vld [vmem:[#allocation59_spill] sm:$0xff] }
 0x94c   :  { %v3052_v30 = vpop.xlane.xlu0 %3051 }
 0x94d   :  { %v8982_v56 = vadd.f32 %v3052_v30, %v10636_v17  ;;  %3196 = vperm.xlu1 %7115, %v8979_v22   ;;  %10643 = vst [vmem:[#allocation68_spill] sm:$0xff] %v8995_v19 }
 0x94e   :  { %v3109_v1 = vpop.xlane.xlu1 %3108 }
 0x94f   :  { %10637 = vst [vmem:[#allocation67_spill] sm:$0xff] %v8982_v56  ;;  %3211 = vperm.xlu0 %7116, %v8982_v56  }
 0x950   :  { %v3058_v63 = vpop.xlane.xlu0 %3057 }
 0x951   :  { %v8990_v10 = vadd.f32 %v3058_v63, %v10640_v24  ;;  %3208 = vperm.xlu1 %7115, %v8987_v49   ;;  %v10648_v63 = vld [vmem:[#allocation60_spill] sm:$0xff] }
 0x952   :  { %v3061_v17 = vpop.xlane.xlu1 %3060  ;;  %v9007_v24 = vadd.f32 %v3109_v1, %v10648_v63 }
 0x953   :  { %10641 = vst [vmem:[#allocation69_spill] sm:$0xff] %v8990_v10  ;;  %3217 = vperm.xlu0 %7116, %v8990_v10   ;;  %v8999_v59 = vadd.f32 %v3061_v17, %v10644_v43 }
 0x954   :  { %v3112_v30 = vpop.xlane.xlu0 %3111  ;;  %10649 = vst [vmem:[#allocation72_spill] sm:$0xff] %v9007_v24 }
 0x955   :  { %3214 = vperm.xlu1 %7115, %v8995_v19   ;;  %10645 = vst [vmem:[#allocation71_spill] sm:$0xff] %v8999_v59  ;;  %v9010_v62 = vadd.f32 %v3112_v30, %v10650_v42 }
 0x957   :  { %10651 = vst [vmem:[#allocation73_spill] sm:$0xff] %v9010_v62 }
 0x958   :  { %v3064_v39 = vpop.xlane.xlu0 %3063 }
 0x959   :  { %v9002_v52 = vadd.f32 %v3064_v39, %v10646_v54  ;;  %3220 = vperm.xlu1 %7115, %v8999_v59  }
 0x95b   :  { %10647 = vst [vmem:[#allocation70_spill] sm:$0xff] %v9002_v52  ;;  %3223 = vperm.xlu0 %7116, %v9002_v52  }
 0x95d   :  { %3268 = vperm.xlu1 %7115, %v9007_v24  }
 0x95f   :  { %3271 = vperm.xlu0 %7116, %v9010_v62  }
 0x996   :  { %v3230_v17 = vpop.permute.xlu0 %3229 }
 0x997   :  { %v3352_v59 = vrot.slane %v3230_v17, %v8195_v18 }
 0x998   :  { %v3227_v43 = vpop.permute.xlu1 %3226 }
 0x999   :  { %v3348_v10 = vrot.slane %v3227_v43, %v8192_v27 }
 0x99a   :  { %v3182_v40 = vpop.permute.xlu0 %3181 }
 0x99b   :  { %v3280_v19 = vrot.slane %v3182_v40, %v8195_v18  ;;  %v3353_v45 = vsel %vm1191_vm5, %v3352_v59, %v3348_v10 }
 0x99c   :  { %v3179_v3 = vpop.permute.xlu1 %3178 }
 0x99d   :  { %v3276_v56 = vrot.slane %v3179_v3, %v8192_v27 }
 0x99e   :  { %v3236_v54 = vpop.permute.xlu0 %3235 }
 0x99f   :  { %v3361_v49 = vrot.slane %v3236_v54, %v8195_v18  ;;  %v3281_v3 = vsel %vm1191_vm5, %v3280_v19, %v3276_v56 }
 0x9a0   :  { %v3233_v39 = vpop.permute.xlu1 %3232 }
 0x9a1   :  { %v3357_v37 = vrot.slane %v3233_v39, %v8192_v27 }
 0x9a2   :  { %v3242_v38 = vpop.permute.xlu0 %3241 }
 0x9a3   :  { %v3362_v54 = vsel %vm1191_vm5, %v3361_v49, %v3357_v37  ;;  %v3370_v39 = vrot.slane %v3242_v38, %v8195_v18 }
 0x9a4   :  { %v3239_v50 = vpop.permute.xlu1 %3238 }
 0x9a6   :  { %v9016_v1 = vpop.permute.xlu0 %3253 }
 0x9a8   :  { %v9014_v48 = vpop.permute.xlu1 %3250 }
 0x9ac   :  { %v3185_v46 = vpop.permute.xlu1 %3184 }
 0x9ad   :  { %v3285_v11 = vrot.slane %v3185_v46, %v8192_v27 }
 0x9b0   :  { %v3188_v63 = vpop.permute.xlu1 %3187 }
 0x9b1   :  { %v3289_v24 = vrot.slane %v3188_v63, %v8195_v18 }
 0x9b2   :  { %v3194_v30 = vpop.permute.xlu0 %3193 }
 0x9b3   :  { %v3298_v51 = vrot.slane %v3194_v30, %v8195_v18  ;;  %v3290_v22 = vsel %vm1191_vm5, %v3289_v24, %v3285_v11  ;;  %v3366_v30 = vrot.slane %v3239_v50, %v8192_v27 }
 0x9b4   :  { %v3191_v42 = vpop.permute.xlu1 %3190 }
 0x9b5   :  { %v3294_v63 = vrot.slane %v3191_v42, %v8192_v27  ;;  %v3417_v42 = vsel %vm1328_vm6, %v3290_v22, %v3281_v3  ;;  %v3384_v22 = vrot.slane %v9014_v48, %v8192_v27 }
 0x9b6   :  { %v3206_v15 = vpop.permute.xlu0 %3205 }
 0x9b7   :  { %v3299_v11 = vsel %vm1191_vm5, %v3298_v51, %v3294_v63  ;;  %v3316_v38 = vrot.slane %v3206_v15, %v8195_v18  ;;  %v3424_v51 = vsel %vm1328_vm6, %v3362_v54, %v3353_v45 }
 0x9b8   :  { %v3203_v32 = vpop.permute.xlu1 %3202 }
 0x9b9   :  { %v3312_v56 = vrot.slane %v3203_v32, %v8192_v27 }
 0x9ba   :  { %v3248_v33 = vpop.permute.xlu0 %3247 }
 0x9bb   :  { %v3379_v24 = vrot.slane %v3248_v33, %v8195_v18  ;;  %v3418_v33 = vsel %vm1330_vm7, %v3299_v11, %v3417_v42 }
 0x9bc   :  { %v3245_v2 = vpop.permute.xlu1 %3244 }
 0x9be   :  { %v9018_v16 = vpop.permute.xlu0 %3259 }
 0x9bf   :  { %v3397_v49 = vrot.slane %v9018_v16, %v8195_v18 }
 0x9c0   :  { %v3257_v44 = vpop.permute.xlu1 %3256 }
 0x9c1   :  { %v3393_v63 = vrot.slane %v3257_v44, %v8192_v27 }
 0x9c2   :  { %v9020_v9 = vpop.permute.xlu0 %3265 }
 0x9c4   :  { %v9022_v4 = vpop.permute.xlu1 %3262 }
 0x9c5   :  { %v3402_v48 = vrot.slane %v9022_v4, %v8192_v27 }
 0x9c6   :  { %v3200_v62 = vpop.permute.xlu0 %3199 }
 0x9c7   :  { %v3307_v17 = vrot.slane %v3200_v62, %v8195_v18 }
 0x9c8   :  { %v3197_v52 = vpop.permute.xlu1 %3196 }
 0x9c9   :  { %v3303_v43 = vrot.slane %v3197_v52, %v8192_v27  ;;  %v3375_v52 = vrot.slane %v3245_v2, %v8192_v27  ;;  %v3371_v2 = vsel %vm1191_vm5, %v3370_v39, %v3366_v30 }
 0x9ca   :  { %v3212_v31 = vpop.permute.xlu0 %3211  ;;  %v3425_v54 = vsel %vm1330_vm7, %v3371_v2, %v3424_v51 }
 0x9cb   :  { %v3308_v62 = vsel %vm1191_vm5, %v3307_v17, %v3303_v43  ;;  %v3325_v59 = vrot.slane %v3212_v31, %v8195_v18  ;;  %v3388_v31 = vrot.slane %v9016_v1, %v8195_v18  ;;  %v3380_v32 = vsel %vm1191_vm5, %v3379_v24, %v3375_v52 }
 0x9cc   :  { %v3209_v40 = vpop.permute.xlu1 %3208  ;;  %v3419_v15 = vsel %vm1332_vm8, %v3308_v62, %v3418_v33  ;;  %v3317_v43 = vsel %vm1191_vm5, %v3316_v38, %v3312_v56  ;;  %v3406_v1 = vrot.slane %v9020_v9, %v8195_v18  ;;  %v3398_v9 = vsel %vm1191_vm5, %v3397_v49, %v3393_v63 }
 0x9cd   :  { %v3321_v10 = vrot.slane %v3209_v40, %v8192_v27  ;;  %v3420_v39 = vsel %vm1334_vm9, %v3317_v43, %v3419_v15  ;;  %v3389_v24 = vsel %vm1191_vm5, %v3388_v31, %v3384_v22 }
 0x9ce   :  { %v3218_v46 = vpop.permute.xlu0 %3217  ;;  %v3407_v52 = vsel %vm1191_vm5, %v3406_v1, %v3402_v48 }
 0x9cf   :  { %v3334_v50 = vrot.slane %v3218_v46, %v8195_v18  ;;  %v3326_v45 = vsel %vm1191_vm5, %v3325_v59, %v3321_v10  ;;  %v3426_v46 = vsel %vm1332_vm8, %v3380_v32, %v3425_v54 }
 0x9d0   :  { %v3215_v37 = vpop.permute.xlu1 %3214  ;;  %v3421_v30 = vsel %vm1336_vm10, %v3326_v45, %v3420_v39  ;;  %v3427_v56 = vsel %vm1334_vm9, %v3389_v24, %v3426_v46 }
 0x9d1   :  { %v3330_v19 = vrot.slane %v3215_v37, %v8192_v27 }
 0x9d3   :  { %v3335_v40 = vsel %vm1191_vm5, %v3334_v50, %v3330_v19  ;;  %v3428_v50 = vsel %vm1336_vm10, %v3398_v9, %v3427_v56 }
 0x9d4   :  { %v3221_v17 = vpop.permute.xlu1 %3220  ;;  %v3422_v11 = vsel %vm1338_vm12, %v3335_v40, %v3421_v30  ;;  %v3429_v51 = vsel %vm1338_vm12, %v3407_v52, %v3428_v50 }
 0x9d5   :  { %v3339_v16 = vrot.slane %v3221_v17, %v8192_v27 }
 0x9d6   :  { %v3224_v3 = vpop.permute.xlu0 %3223 }
 0x9d7   :  { %v3343_v44 = vrot.slane %v3224_v3, %v8195_v18 }
 0x9d8   :  { %v3269_v42 = vpop.permute.xlu1 %3268 }
 0x9d9   :  { %v3344_v4 = vsel %vm1191_vm5, %v3343_v44, %v3339_v16  ;;  %v3411_v10 = vrot.slane %v3269_v42, %v8192_v27 }
 0x9da   :  { %v3272_v62 = vpop.permute.xlu0 %3271  ;;  %v3423_v59 = vsel %vm1340_vm11, %v3344_v4, %v3422_v11 }
 0x9db   :  { %v3415_v37 = vrot.slane %v3272_v62, %v8195_v18  ;;  %v3433_v38 = vsel %vm1351_vm13, %v3423_v59, -inf }
 0x9dc   :  { %3434 = vmax.xlane.f32.xlu1 %v3433_v38 }
 0x9dd   :  { %v3416_v19 = vsel %vm1191_vm5, %v3415_v37, %v3411_v10 }
 0x9de   :  { %v3430_v33 = vsel %vm1340_vm11, %v3416_v19, %v3429_v51 }
 0x9df   :  { %v3436_v2 = vsel %vm1351_vm13, %v3430_v33, -inf }
 0x9e0   :  { %3437 = vmax.xlane.f32.xlu0 %v3436_v2 }
 0xa65   :  { %v9122_v4 = vpop.xlane.xlu1 %3434 }
 0xa66   :  { %v3448_v37 = vrot.slane %v9122_v4, %v7750_v13  ;;  %v3452_v51 = vrot.slane %v9122_v4, %v7753_v14 }
 0xa68   :  { %v3523_v33 = vsub.f32 %v8927_v53, %v3448_v37 }
 0xa69   :  { %v9093_v31 = vpop.xlane.xlu0 %3437 }
 0xa6a   :  { %v3476_v22 = vrot.slane %v9093_v31, %v7746_v6  ;;  %v3480_v15 = vrot.slane %v9093_v31, %v7750_v13  ;;  %v3484_v63 = vrot.slane %v9093_v31, %v7753_v14  ;;  %v3488_v48 = vrot.slane %v9093_v31, %v7760_v20 }
 0xa6b   :  { %v3492_v54 = vrot.slane %v9093_v31, %v7765_v23  ;;  %v3557_v53 = vmul.f32 1.442695, %v3523_v33  ;;  %v10661_v33 = vld [vmem:[#allocation69_spill] sm:$0xff] }
 0xa6c   :  { %v3537_v32 = vsub.f32 %v8891_v0, %v3476_v22  ;;  %v3538_v49 = vsub.f32 %v8887_v47, %v3476_v22  ;;  %v3539_v45 = vsub.f32 %v8907_v28, %v3480_v15  ;;  %v3540_v43 = vsub.f32 %v8902_v36, %v3480_v15 }
 0xa6d   :  { %v3541_v40 = vsub.f32 %v8915_v5, %v3484_v63  ;;  %v3542_v0 = vsub.f32 %v8910_v35, %v3484_v63  ;;  %v3543_v28 = vsub.f32 %v8955_v7, %v3488_v48  ;;  %v3544_v36 = vsub.f32 %v8950_v41, %v3488_v48  ;;  %v10653_v48 = vld [vmem:[#allocation64_spill] sm:$0xff] }
 0xa6e   :  { %v3585_v17 = vmul.f32 1.442695, %v3537_v32  ;;  %v3587_v1 = vmul.f32 1.442695, %v3538_v49  ;;  %v3589_v3 = vmul.f32 1.442695, %v3539_v45  ;;  %v3496_v5 = vrot.slane %v9093_v31, %v7770_v26 }
 0xa6f   :  { %v3591_v47 = vmul.f32 1.442695, %v3540_v43  ;;  %v3593_v16 = vmul.f32 1.442695, %v3541_v40  ;;  %v3595_v44 = vmul.f32 1.442695, %v3542_v0  ;;  %v3545_v39 = vsub.f32 %v8923_v34, %v3492_v54 }
 0xa70   :  { %7189 = vpow2.f32 %v3585_v17  ;;  %v3597_v35 = vmul.f32 1.442695, %v3543_v28  ;;  %v3546_v46 = vsub.f32 %v8918_v55, %v3492_v54  ;;  %v3599_v30 = vmul.f32 1.442695, %v3544_v36  ;;  %v10652_v45 = vld [vmem:[#allocation63_spill] sm:$0xff]  ;;  %v10654_v0 = vld [vmem:[#allocation66_spill] sm:$0xff] }
 0xa71   :  { %7191 = vpow2.f32 %v3587_v1  ;;  %v3500_v7 = vrot.slane %v9093_v31, %v7775_v29  ;;  %v3547_v9 = vsub.f32 %v8963_v60, %v3496_v5  ;;  %v3601_v41 = vmul.f32 1.442695, %v3545_v39  ;;  %v10655_v36 = vld [vmem:[#allocation61_spill] sm:$0xff] }
 0xa72   :  { %7193 = vpow2.f32 %v3589_v3  ;;  %v3548_v11 = vsub.f32 %v8958_v61, %v3496_v5  ;;  %v3603_v34 = vmul.f32 1.442695, %v3546_v46  ;;  %v3444_v55 = vrot.slane %v9122_v4, %v7746_v6 }
 0xa73   :  { %7195 = vpow2.f32 %v3591_v47  ;;  %v3549_v60 = vsub.f32 %v8971_v12, %v3500_v7  ;;  %v3605_v52 = vmul.f32 1.442695, %v3547_v9  ;;  %v3550_v59 = vsub.f32 %v8966_v25, %v3500_v7 }
 0xa74   :  { %7197 = vpow2.f32 %v3593_v16  ;;  %v3607_v61 = vmul.f32 1.442695, %v3548_v11  ;;  %v3522_v38 = vsub.f32 %v8894_v21, %v3444_v55  ;;  %v3521_v50 = vsub.f32 %v8899_v8, %v3444_v55 }
 0xa75   :  { %7199 = vpow2.f32 %v3595_v44  ;;  %v3609_v12 = vmul.f32 1.442695, %v3549_v60  ;;  %v3611_v25 = vmul.f32 1.442695, %v3550_v59  ;;  %v3524_v22 = vsub.f32 %v8931_v57, %v3448_v37  ;;  %v10658_v60 = vld [vmem:[#allocation67_spill] sm:$0xff] }
 0xa76   :  { %7201 = vpow2.f32 %v3597_v35  ;;  %v3555_v21 = vmul.f32 1.442695, %v3522_v38  ;;  %v3553_v8 = vmul.f32 1.442695, %v3521_v50  ;;  %v3456_v32 = vrot.slane %v9122_v4, %v7760_v20  ;;  %v10656_v35 = vld [vmem:[#allocation62_spill] sm:$0xff]  ;;  %v10659_v37 = vld [vmem:[#allocation27_spill] sm:$0xff] }
 0xa77   :  { %7203 = vpow2.f32 %v3599_v30  ;;  %v3525_v49 = vsub.f32 %v8939_v58, %v3452_v51  ;;  %v3526_v17 = vsub.f32 %v10652_v45, %v3452_v51  ;;  %v3559_v57 = vmul.f32 1.442695, %v3524_v22 }
 0xa78   :  { %7205 = vpow2.f32 %v3601_v41  ;;  %v3460_v1 = vrot.slane %v9122_v4, %v7765_v23  ;;  %v3527_v40 = vsub.f32 %v10653_v48, %v3456_v32  ;;  %v3528_v47 = vsub.f32 %v10654_v0, %v3456_v32  ;;  %v10657_v41 = vld [vmem:[#allocation65_spill] sm:$0xff]  ;;  %v10662_v32 = vld [vmem:[#allocation71_spill] sm:$0xff] }
 0xa79   :  { %7207 = vpow2.f32 %v3603_v34  ;;  %v3561_v58 = vmul.f32 1.442695, %v3525_v49  ;;  %v3563_v54 = vmul.f32 1.442695, %v3526_v17  ;;  %v3464_v16 = vrot.slane %v9122_v4, %v7770_v26  ;;  %v10663_v17 = vld [vmem:[#allocation70_spill] sm:$0xff] }
 0xa7a   :  { %7209 = vpow2.f32 %v3605_v52  ;;  %v3529_v44 = vsub.f32 %v10655_v36, %v3460_v1  ;;  %v3565_v5 = vmul.f32 1.442695, %v3527_v40  ;;  %v3530_v46 = vsub.f32 %v10656_v35, %v3460_v1 }
 0xa7b   :  { %7211 = vpow2.f32 %v3607_v61  ;;  %v3567_v30 = vmul.f32 1.442695, %v3528_v47  ;;  %v3468_v9 = vrot.slane %v9122_v4, %v7775_v29  ;;  %v3531_v11 = vsub.f32 %v10657_v41, %v3464_v16 }
 0xa7c   :  { %7213 = vpow2.f32 %v3609_v12  ;;  %v3569_v34 = vmul.f32 1.442695, %v3529_v44  ;;  %v3532_v52 = vsub.f32 %v10658_v60, %v3464_v16  ;;  %v3571_v59 = vmul.f32 1.442695, %v3530_v46  ;;  %v10660_v12 = vld [vmem:[#allocation68_spill] sm:$0xff] }
 0xa7d   :  { %v9120_v42 = vpop.eup %7189  ;;  %7215 = vpow2.f32 %v3611_v25  ;;  %v3472_v38 = vrot.slane %v9122_v4, %v10659_v37  ;;  %v3533_v50 = vsub.f32 %v10660_v12, %v3468_v9  ;;  %v3573_v25 = vmul.f32 1.442695, %v3531_v11 }
 0xa7e   :  { %v9125_v24 = vpop.eup %7191  ;;  %3698 = vperm.xlu1 %7115, %v9120_v42   ;;  %7217 = vpow2.f32 %v3555_v21  ;;  %v3534_v21 = vsub.f32 %v10661_v33, %v3468_v9  ;;  %v3575_v22 = vmul.f32 1.442695, %v3532_v52 }
 0xa7f   :  { %3701 = vperm.xlu0 %7116, %v9125_v24   ;;  %v9132_v62 = vpop.eup %7193  ;;  %7219 = vpow2.f32 %v3553_v8  ;;  %v3535_v49 = vsub.f32 %v10662_v32, %v3472_v38  ;;  %v3577_v4 = vmul.f32 1.442695, %v3533_v50 }
 0xa80   :  { %v9135_v10 = vpop.eup %7195  ;;  %7221 = vpow2.f32 %v3557_v53  ;;  %v3504_v53 = vrot.slane %v9093_v31, %v10659_v37  ;;  %v3579_v1 = vmul.f32 1.442695, %v3534_v21 }
 0xa81   :  { %v9142_v56 = vpop.eup %7197  ;;  %7223 = vpow2.f32 %v3559_v57  ;;  %v3536_v57 = vsub.f32 %v10663_v17, %v3472_v38  ;;  %v3581_v40 = vmul.f32 1.442695, %v3535_v49 }
 0xa82   :  { %3704 = vperm.xlu1 %7115, %v9132_v62   ;;  %v9145_v19 = vpop.eup %7199  ;;  %7225 = vpow2.f32 %v3561_v58  ;;  %v10665_v58 = vld [vmem:[#allocation72_spill] sm:$0xff] }
 0xa83   :  { %3707 = vperm.xlu0 %7116, %v9135_v10   ;;  %v9152_v2 = vpop.eup %7201  ;;  %7227 = vpow2.f32 %v3563_v54  ;;  %v3551_v0 = vsub.f32 %v10665_v58, %v3504_v53  ;;  %v3583_v31 = vmul.f32 1.442695, %v3536_v57  ;;  %v10667_v54 = vld [vmem:[#allocation73_spill] sm:$0xff] }
 0xa84   :  { %v9155_v15 = vpop.eup %7203  ;;  %7229 = vpow2.f32 %v3565_v5  ;;  %v3552_v16 = vsub.f32 %v10667_v54, %v3504_v53 }
 0xa85   :  { %v9162_v63 = vpop.eup %7205  ;;  %7231 = vpow2.f32 %v3567_v30  ;;  %v3613_v44 = vmul.f32 1.442695, %v3551_v0 }
 0xa86   :  { %3710 = vperm.xlu1 %7115, %v9142_v56   ;;  %v9165_v43 = vpop.eup %7207  ;;  %7233 = vpow2.f32 %v3569_v34  ;;  %v3615_v35 = vmul.f32 1.442695, %v3552_v16 }
 0xa87   :  { %3713 = vperm.xlu0 %7116, %v9145_v19   ;;  %v9172_v3 = vpop.eup %7209  ;;  %7235 = vpow2.f32 %v3571_v59 }
 0xa88   :  { %v9175_v28 = vpop.eup %7211  ;;  %7237 = vpow2.f32 %v3573_v25 }
 0xa89   :  { %v9182_v39 = vpop.eup %7213  ;;  %7239 = vpow2.f32 %v3575_v22 }
 0xa8a   :  { %3716 = vperm.xlu1 %7115, %v9152_v2   ;;  %v9185_v7 = vpop.eup %7215  ;;  %7241 = vpow2.f32 %v3577_v4 }
 0xa8b   :  { %3719 = vperm.xlu0 %7116, %v9155_v15   ;;  %v9192_v55 = vpop.eup %7217  ;;  %7243 = vpow2.f32 %v3579_v1 }
 0xa8c   :  { %v9195_v61 = vpop.eup %7219  ;;  %7245 = vpow2.f32 %v3581_v40 }
 0xa8d   :  { %v9202_v51 = vpop.eup %7221  ;;  %7247 = vpow2.f32 %v3583_v31 }
 0xa8e   :  { %3722 = vperm.xlu1 %7115, %v9162_v63   ;;  %v9205_v8 = vpop.eup %7223  ;;  %7249 = vpow2.f32 %v3613_v44 }
 0xa8f   :  { %3725 = vperm.xlu0 %7116, %v9165_v43   ;;  %v9212_v45 = vpop.eup %7225  ;;  %7251 = vpow2.f32 %v3615_v35 }
 0xa90   :  { %v9215_v48 = vpop.eup %7227 }
 0xa91   :  { %10664 = vst [vmem:[#allocation63_spill] sm:$0xff] %v9215_v48  ;;  %v9220_v47 = vpop.eup %7229 }
 0xa92   :  { %3728 = vperm.xlu1 %7115, %v9172_v3   ;;  %10666 = vst [vmem:[#allocation64_spill] sm:$0xff] %v9220_v47  ;;  %v9223_v36 = vpop.eup %7231 }
 0xa93   :  { %3731 = vperm.xlu0 %7116, %v9175_v28   ;;  %10668 = vst [vmem:[#allocation66_spill] sm:$0xff] %v9223_v36  ;;  %v9227_v5 = vpop.eup %7233 }
 0xa94   :  { %10669 = vst [vmem:[#allocation61_spill] sm:$0xff] %v9227_v5  ;;  %v9229_v46 = vpop.eup %7235 }
 0xa95   :  { %10670 = vst [vmem:[#allocation62_spill] sm:$0xff] %v9229_v46  ;;  %v9233_v30 = vpop.eup %7237 }
 0xa96   :  { %3734 = vperm.xlu1 %7115, %v9182_v39   ;;  %10671 = vst [vmem:[#allocation65_spill] sm:$0xff] %v9233_v30  ;;  %v9235_v9 = vpop.eup %7239 }
 0xa97   :  { %3737 = vperm.xlu0 %7116, %v9185_v7   ;;  %10672 = vst [vmem:[#allocation67_spill] sm:$0xff] %v9235_v9  ;;  %v9239_v41 = vpop.eup %7241 }
 0xa98   :  { %10673 = vst [vmem:[#allocation68_spill] sm:$0xff] %v9239_v41  ;;  %v9241_v11 = vpop.eup %7243 }
 0xa99   :  { %10674 = vst [vmem:[#allocation69_spill] sm:$0xff] %v9241_v11  ;;  %v9245_v34 = vpop.eup %7245 }
 0xa9a   :  { %3653 = vperm.xlu1 %7115, %v9192_v55   ;;  %10675 = vst [vmem:[#allocation71_spill] sm:$0xff] %v9245_v34  ;;  %v9247_v60 = vpop.eup %7247 }
 0xa9b   :  { %3650 = vperm.xlu0 %7116, %v9195_v61   ;;  %10676 = vst [vmem:[#allocation70_spill] sm:$0xff] %v9247_v60  ;;  %v9251_v52 = vpop.eup %7249 }
 0xa9c   :  { %10677 = vst [vmem:[#allocation72_spill] sm:$0xff] %v9251_v52  ;;  %v9253_v59 = vpop.eup %7251 }
 0xa9d   :  { %10678 = vst [vmem:[#allocation73_spill] sm:$0xff] %v9253_v59 }
 0xa9e   :  { %3656 = vperm.xlu1 %7115, %v9202_v51  }
 0xa9f   :  { %3659 = vperm.xlu0 %7116, %v9205_v8  }
 0xaa2   :  { %3662 = vperm.xlu1 %7115, %v9212_v45  }
 0xaa3   :  { %3665 = vperm.xlu0 %7116, %v9215_v48  }
 0xaa6   :  { %3668 = vperm.xlu1 %7115, %v9220_v47  }
 0xaa7   :  { %3671 = vperm.xlu0 %7116, %v9223_v36  }
 0xaaa   :  { %3674 = vperm.xlu1 %7115, %v9227_v5  }
 0xaab   :  { %3677 = vperm.xlu0 %7116, %v9229_v46  }
 0xaae   :  { %3680 = vperm.xlu1 %7115, %v9233_v30  }
 0xaaf   :  { %3683 = vperm.xlu0 %7116, %v9235_v9  }
 0xab2   :  { %3686 = vperm.xlu1 %7115, %v9239_v41  }
 0xab3   :  { %3689 = vperm.xlu0 %7116, %v9241_v11  }
 0xab6   :  { %3692 = vperm.xlu1 %7115, %v9245_v34  }
 0xab7   :  { %3695 = vperm.xlu0 %7116, %v9247_v60  }
 0xaba   :  { %3740 = vperm.xlu1 %7115, %v9251_v52  }
 0xabb   :  { %3743 = vperm.xlu0 %7116, %v9253_v59  }
 0xaf9   :  { %v9257_v38 = vpop.permute.xlu1 %3698 }
 0xafa   :  { %v9259_v12 = vpop.permute.xlu0 %3701  ;;  %v3820_v46 = vrot.slane %v9257_v38, %v8192_v27 }
 0xafd   :  { %v3705_v50 = vpop.permute.xlu1 %3704 }
 0xafe   :  { %v3708_v25 = vpop.permute.xlu0 %3707  ;;  %v3829_v34 = vrot.slane %v3705_v50, %v8192_v27 }
 0xaff   :  { %v3833_v60 = vrot.slane %v3708_v25, %v8195_v18 }
 0xb01   :  { %v3711_v33 = vpop.permute.xlu1 %3710 }
 0xb02   :  { %v3714_v21 = vpop.permute.xlu0 %3713  ;;  %v3838_v11 = vrot.slane %v3711_v33, %v8192_v27 }
 0xb03   :  { %v3842_v37 = vrot.slane %v3714_v21, %v8195_v18 }
 0xb05   :  { %v9261_v22 = vpop.permute.xlu1 %3716 }
 0xb06   :  { %v9263_v32 = vpop.permute.xlu0 %3719 }
 0xb09   :  { %v9265_v49 = vpop.permute.xlu1 %3722 }
 0xb0a   :  { %v9267_v4 = vpop.permute.xlu0 %3725 }
 0xb0d   :  { %v9269_v53 = vpop.permute.xlu1 %3728 }
 0xb0e   :  { %v9271_v17 = vpop.permute.xlu0 %3731 }
 0xb11   :  { %v9273_v57 = vpop.permute.xlu1 %3734 }
 0xb12   :  { %v9275_v1 = vpop.permute.xlu0 %3737 }
 0xb15   :  { %v3654_v40 = vpop.permute.xlu1 %3653 }
 0xb16   :  { %v3651_v58 = vpop.permute.xlu0 %3650  ;;  %v3752_v50 = vrot.slane %v3654_v40, %v8195_v18 }
 0xb17   :  { %v3748_v25 = vrot.slane %v3651_v58, %v8192_v27 }
 0xb19   :  { %v3657_v0 = vpop.permute.xlu1 %3656 }
 0xb1a   :  { %v3660_v31 = vpop.permute.xlu0 %3659  ;;  %v3757_v9 = vrot.slane %v3657_v0, %v8192_v27  ;;  %v3824_v0 = vrot.slane %v9259_v12, %v8195_v18  ;;  %v3847_v12 = vrot.slane %v9261_v22, %v8192_v27  ;;  %v3874_v22 = vrot.slane %v9273_v57, %v8192_v27 }
 0xb1b   :  { %v3761_v41 = vrot.slane %v3660_v31, %v8195_v18  ;;  %v3834_v31 = vsel %vm1191_vm5, %v3833_v60, %v3829_v34 }
 0xb1d   :  { %v3663_v54 = vpop.permute.xlu1 %3662  ;;  %v3762_v48 = vsel %vm1191_vm5, %v3761_v41, %v3757_v9  ;;  %v3753_v9 = vsel %vm1191_vm5, %v3752_v50, %v3748_v25  ;;  %v3860_v41 = vrot.slane %v9267_v4, %v8195_v18  ;;  %v3878_v4 = vrot.slane %v9275_v1, %v8195_v18 }
 0xb1e   :  { %v3666_v16 = vpop.permute.xlu0 %3665  ;;  %v3766_v36 = vrot.slane %v3663_v54, %v8192_v27  ;;  %v3843_v54 = vsel %vm1191_vm5, %v3842_v37, %v3838_v11  ;;  %v3856_v37 = vrot.slane %v9265_v49, %v8192_v27  ;;  %v3865_v11 = vrot.slane %v9269_v53, %v8192_v27 }
 0xb1f   :  { %v3770_v5 = vrot.slane %v3666_v16, %v8195_v18 }
 0xb21   :  { %v3669_v44 = vpop.permute.xlu1 %3668  ;;  %v3771_v34 = vsel %vm1191_vm5, %v3770_v5, %v3766_v36  ;;  %v3889_v36 = vsel %vm1328_vm6, %v3762_v48, %v3753_v9 }
 0xb22   :  { %v3672_v35 = vpop.permute.xlu0 %3671  ;;  %v3775_v33 = vrot.slane %v3669_v44, %v8192_v27  ;;  %v3851_v44 = vrot.slane %v9263_v32, %v8195_v18  ;;  %v3890_v32 = vsel %vm1330_vm7, %v3771_v34, %v3889_v36 }
 0xb23   :  { %v3779_v21 = vrot.slane %v3672_v35, %v8195_v18 }
 0xb25   :  { %v3675_v59 = vpop.permute.xlu1 %3674 }
 0xb26   :  { %v3678_v52 = vpop.permute.xlu0 %3677  ;;  %v3784_v16 = vrot.slane %v3675_v59, %v8192_v27  ;;  %v3869_v59 = vrot.slane %v9271_v17, %v8195_v18  ;;  %v3825_v17 = vsel %vm1191_vm5, %v3824_v0, %v3820_v46 }
 0xb27   :  { %v3788_v38 = vrot.slane %v3678_v52, %v8195_v18 }
 0xb29   :  { %v3681_v30 = vpop.permute.xlu1 %3680  ;;  %v3789_v5 = vsel %vm1191_vm5, %v3788_v38, %v3784_v16  ;;  %v3896_v16 = vsel %vm1328_vm6, %v3834_v31, %v3825_v17 }
 0xb2a   :  { %v3684_v47 = vpop.permute.xlu0 %3683  ;;  %v3793_v40 = vrot.slane %v3681_v30, %v8192_v27 }
 0xb2b   :  { %v3797_v58 = vrot.slane %v3684_v47, %v8195_v18  ;;  %v3780_v47 = vsel %vm1191_vm5, %v3779_v21, %v3775_v33  ;;  %v3852_v33 = vsel %vm1191_vm5, %v3851_v44, %v3847_v12  ;;  %v3879_v44 = vsel %vm1191_vm5, %v3878_v4, %v3874_v22 }
 0xb2c   :  { %v3891_v53 = vsel %vm1332_vm8, %v3780_v47, %v3890_v32 }
 0xb2d   :  { %v3687_v35 = vpop.permute.xlu1 %3686  ;;  %v3798_v49 = vsel %vm1191_vm5, %v3797_v58, %v3793_v40  ;;  %v3892_v57 = vsel %vm1334_vm9, %v3789_v5, %v3891_v53  ;;  %v3861_v58 = vsel %vm1191_vm5, %v3860_v41, %v3856_v37  ;;  %v3897_v40 = vsel %vm1330_vm7, %v3843_v54, %v3896_v16 }
 0xb2e   :  { %v3690_v60 = vpop.permute.xlu0 %3689  ;;  %v3802_v52 = vrot.slane %v3687_v35, %v8192_v27  ;;  %v3893_v1 = vsel %vm1336_vm10, %v3798_v49, %v3892_v57  ;;  %v3870_v35 = vsel %vm1191_vm5, %v3869_v59, %v3865_v11  ;;  %v3898_v0 = vsel %vm1332_vm8, %v3852_v33, %v3897_v40 }
 0xb2f   :  { %v3806_v30 = vrot.slane %v3690_v60, %v8195_v18  ;;  %v3899_v37 = vsel %vm1334_vm9, %v3861_v58, %v3898_v0 }
 0xb30   :  { %v3900_v47 = vsel %vm1336_vm10, %v3870_v35, %v3899_v37  ;;  %v10679_v35 = vld [vmem:[#allocation63_spill] sm:$0xff] }
 0xb31   :  { %v3693_v25 = vpop.permute.xlu1 %3692  ;;  %v3807_v48 = vsel %vm1191_vm5, %v3806_v30, %v3802_v52  ;;  %v3901_v41 = vsel %vm1338_vm12, %v3879_v44, %v3900_v47 }
 0xb32   :  { %v3696_v50 = vpop.permute.xlu0 %3695  ;;  %v3811_v21 = vrot.slane %v3693_v25, %v8192_v27  ;;  %v3894_v46 = vsel %vm1338_vm12, %v3807_v48, %v3893_v1 }
 0xb33   :  { %v3815_v38 = vrot.slane %v3696_v50, %v8195_v18 }
 0xb35   :  { %v3741_v34 = vpop.permute.xlu1 %3740  ;;  %v3816_v60 = vsel %vm1191_vm5, %v3815_v38, %v3811_v21 }
 0xb36   :  { %v3744_v12 = vpop.permute.xlu0 %3743  ;;  %v3883_v31 = vrot.slane %v3741_v34, %v8192_v27  ;;  %v3895_v52 = vsel %vm1340_vm11, %v3816_v60, %v3894_v46  ;;  %v10681_v46 = vld [vmem:[#allocation66_spill] sm:$0xff] }
 0xb37   :  { %v3887_v54 = vrot.slane %v3744_v12, %v8195_v18  ;;  %v3905_v9 = vsel %vm1351_vm13, %v3895_v52, 0.0  ;;  %v10683_v12 = vld [vmem:[#allocation62_spill] sm:$0xff]  ;;  %v10684_v52 = vld [vmem:[#allocation65_spill] sm:$0xff] }
 0xb38   :  { %3906 = vadd.xlane.f32.xlu1 %v3905_v9 }
 0xb39   :  { %v3888_v30 = vsel %vm1191_vm5, %v3887_v54, %v3883_v31  ;;  %v10685_v54 = vld [vmem:[#allocation67_spill] sm:$0xff] }
 0xb3a   :  { %v3902_v11 = vsel %vm1340_vm11, %v3888_v30, %v3901_v41  ;;  %v10686_v30 = vld [vmem:[#allocation68_spill] sm:$0xff] }
 0xb3b   :  { %v3908_v36 = vsel %vm1351_vm13, %v3902_v11, 0.0  ;;  %v10687_v11 = vld [vmem:[#allocation69_spill] sm:$0xff] }
 0xb3c   :  { %3909 = vadd.xlane.f32.xlu0 %v3908_v36 }
 0xbc1   :  { %v3907_v50 = vpop.xlane.xlu1 %3906 }
 0xbc5   :  { %v3910_v5 = vpop.xlane.xlu0 %3909 }
 0xbc6   :  { %7253 = vrcp.f32 %v3910_v5  ;;  %v10688_v5 = vld [vmem:[#allocation27_spill] sm:$0xff] }
 0xbc7   :  { %7255 = vrcp.f32 %v3907_v50 }
 0xbd3   :  { %v9351_v59 = vpop.eup %7253 }
 0xbd4   :  { %v3950_v22 = vrot.slane %v9351_v59, %v7746_v6  ;;  %v3954_v25 = vrot.slane %v9351_v59, %v7750_v13  ;;  %v3958_v48 = vrot.slane %v9351_v59, %v7753_v14  ;;  %v3962_v21 = vrot.slane %v9351_v59, %v7760_v20  ;;  %v7256_v38 = vpop.eup %7255 }
 0xbd5   :  { %v3966_v17 = vrot.slane %v9351_v59, %v7765_v23  ;;  %v3942_v47 = vrot.slane %v7256_v38, %v7775_v29 }
 0xbd6   :  { %v4012_v32 = vmul.f32 %v9125_v24, %v3950_v22  ;;  %v4011_v49 = vmul.f32 %v9120_v42, %v3950_v22  ;;  %v4014_v4 = vmul.f32 %v9135_v10, %v3954_v25  ;;  %v4013_v53 = vmul.f32 %v9132_v62, %v3954_v25  ;;  %v10690_v25 = vld [vmem:[#allocation70_spill] sm:$0xff] }
 0xbd7   :  { %v4016_v24 = vmul.f32 %v9145_v19, %v3958_v48  ;;  %v4015_v42 = vmul.f32 %v9142_v56, %v3958_v48  ;;  %v4018_v10 = vmul.f32 %v9155_v15, %v3962_v21  ;;  %v4017_v62 = vmul.f32 %v9152_v2, %v3962_v21  ;;  %v10691_v48 = vld [vmem:[#allocation72_spill] sm:$0xff] }
 0xbd8   :  { %4115 = vperm.xlu0 %7116, %v4012_v32   ;;  %4112 = vperm.xlu1 %7115, %v4011_v49   ;;  %v4020_v33 = vmul.f32 %v9165_v43, %v3966_v17  ;;  %v4019_v19 = vmul.f32 %v9162_v63, %v3966_v17  ;;  %v3970_v56 = vrot.slane %v9351_v59, %v7770_v26  ;;  %v10689_v32 = vld [vmem:[#allocation71_spill] sm:$0xff] }
 0xbd9   :  { %v3974_v2 = vrot.slane %v9351_v59, %v7775_v29  ;;  %v3918_v63 = vrot.slane %v7256_v38, %v7746_v6  ;;  %v4007_v41 = vmul.f32 %v10686_v30, %v3942_v47  ;;  %v4008_v36 = vmul.f32 %v10687_v11, %v3942_v47 }
 0xbda   :  { %v4022_v57 = vmul.f32 %v9175_v28, %v3970_v56  ;;  %v4021_v15 = vmul.f32 %v9172_v3, %v3970_v56  ;;  %v3922_v3 = vrot.slane %v7256_v38, %v7750_v13  ;;  %v3946_v22 = vrot.slane %v7256_v38, %v10688_v5 }
 0xbdb   :  { %v4024_v16 = vmul.f32 %v9185_v7, %v3974_v2  ;;  %v4023_v43 = vmul.f32 %v9182_v39, %v3974_v2  ;;  %v3996_v58 = vmul.f32 %v9192_v55, %v3918_v63  ;;  %v3995_v28 = vmul.f32 %v9195_v61, %v3918_v63  ;;  %v10680_v61 = vld [vmem:[#allocation64_spill] sm:$0xff] }
 0xbdc   :  { %4121 = vperm.xlu0 %7116, %v4014_v4   ;;  %4118 = vperm.xlu1 %7115, %v4013_v53   ;;  %v3997_v1 = vmul.f32 %v9202_v51, %v3922_v3  ;;  %v3998_v40 = vmul.f32 %v9205_v8, %v3922_v3  ;;  %v3926_v7 = vrot.slane %v7256_v38, %v7753_v14  ;;  %v10682_v8 = vld [vmem:[#allocation61_spill] sm:$0xff] }
 0xbdd   :  { %v3930_v55 = vrot.slane %v7256_v38, %v7760_v20  ;;  %v3934_v51 = vrot.slane %v7256_v38, %v7765_v23  ;;  %v4009_v49 = vmul.f32 %v10689_v32, %v3946_v22  ;;  %v4010_v4 = vmul.f32 %v10690_v25, %v3946_v22 }
 0xbde   :  { %v3999_v39 = vmul.f32 %v9212_v45, %v3926_v7  ;;  %v4000_v34 = vmul.f32 %v10679_v35, %v3926_v7  ;;  %v3938_v45 = vrot.slane %v7256_v38, %v7770_v26  ;;  %v3978_v53 = vrot.slane %v9351_v59, %v10688_v5 }
 0xbdf   :  { %v4001_v60 = vmul.f32 %v10680_v61, %v3930_v55  ;;  %v4002_v0 = vmul.f32 %v10681_v46, %v3930_v55  ;;  %v4003_v44 = vmul.f32 %v10682_v8, %v3934_v51  ;;  %v4004_v31 = vmul.f32 %v10683_v12, %v3934_v51 }
 0xbe0   :  { %4127 = vperm.xlu0 %7116, %v4016_v24   ;;  %4124 = vperm.xlu1 %7115, %v4015_v42   ;;  %v4005_v37 = vmul.f32 %v10684_v52, %v3938_v45  ;;  %v4006_v9 = vmul.f32 %v10685_v54, %v3938_v45  ;;  %v4025_v50 = vmul.f32 %v10691_v48, %v3978_v53  ;;  %v10692_v24 = vld [vmem:[#allocation73_spill] sm:$0xff] }
 0xbe1   :  { %v4026_v42 = vmul.f32 %v10692_v24, %v3978_v53 }
 0xbe4   :  { %4133 = vperm.xlu0 %7116, %v4018_v10   ;;  %4130 = vperm.xlu1 %7115, %v4017_v62  }
 0xbe8   :  { %4139 = vperm.xlu0 %7116, %v4020_v33   ;;  %4136 = vperm.xlu1 %7115, %v4019_v19  }
 0xbec   :  { %4145 = vperm.xlu0 %7116, %v4022_v57   ;;  %4142 = vperm.xlu1 %7115, %v4021_v15  }
 0xbf0   :  { %4151 = vperm.xlu0 %7116, %v4024_v16   ;;  %4148 = vperm.xlu1 %7115, %v4023_v43  }
 0xbf4   :  { %4067 = vperm.xlu1 %7115, %v3996_v58   ;;  %4064 = vperm.xlu0 %7116, %v3995_v28  }
 0xbf8   :  { %4070 = vperm.xlu1 %7115, %v3997_v1   ;;  %4073 = vperm.xlu0 %7116, %v3998_v40  }
 0xbfc   :  { %4076 = vperm.xlu1 %7115, %v3999_v39   ;;  %4079 = vperm.xlu0 %7116, %v4000_v34  }
 0xc00   :  { %4082 = vperm.xlu1 %7115, %v4001_v60   ;;  %4085 = vperm.xlu0 %7116, %v4002_v0  }
 0xc04   :  { %4088 = vperm.xlu1 %7115, %v4003_v44   ;;  %4091 = vperm.xlu0 %7116, %v4004_v31  }
 0xc08   :  { %4094 = vperm.xlu1 %7115, %v4005_v37   ;;  %4097 = vperm.xlu0 %7116, %v4006_v9  }
 0xc0c   :  { %4100 = vperm.xlu1 %7115, %v4007_v41   ;;  %4103 = vperm.xlu0 %7116, %v4008_v36  }
 0xc10   :  { %4106 = vperm.xlu1 %7115, %v4009_v49   ;;  %4109 = vperm.xlu0 %7116, %v4010_v4  }
 0xc14   :  { %4154 = vperm.xlu1 %7115, %v4025_v50   ;;  %4157 = vperm.xlu0 %7116, %v4026_v42  }
 0xc53   :  { %v4116_v21 = vpop.permute.xlu0 %4115  ;;  %v4113_v10 = vpop.permute.xlu1 %4112 }
 0xc54   :  { %v4238_v55 = vrot.slane %v4116_v21, %v8195_v18  ;;  %v4234_v61 = vrot.slane %v4113_v10, %v8192_v27 }
 0xc56   :  { %v4239_v30 = vsel %vm1191_vm5, %v4238_v55, %v4234_v61 }
 0xc57   :  { %v4122_v62 = vpop.permute.xlu0 %4121  ;;  %v4119_v17 = vpop.permute.xlu1 %4118 }
 0xc58   :  { %v4247_v60 = vrot.slane %v4122_v62, %v8195_v18  ;;  %v4243_v46 = vrot.slane %v4119_v17, %v8192_v27 }
 0xc5a   :  { %v4248_v36 = vsel %vm1191_vm5, %v4247_v60, %v4243_v46 }
 0xc5b   :  { %v4128_v33 = vpop.permute.xlu0 %4127  ;;  %v4125_v19 = vpop.permute.xlu1 %4124 }
 0xc5c   :  { %v4256_v8 = vrot.slane %v4128_v33, %v8195_v18  ;;  %v4252_v44 = vrot.slane %v4125_v19, %v8192_v27 }
 0xc5e   :  { %v4257_v25 = vsel %vm1191_vm5, %v4256_v8, %v4252_v44 }
 0xc5f   :  { %v9409_v56 = vpop.permute.xlu0 %4133  ;;  %v9411_v57 = vpop.permute.xlu1 %4130 }
 0xc60   :  { %v4265_v4 = vrot.slane %v9409_v56, %v8195_v18  ;;  %v4261_v53 = vrot.slane %v9411_v57, %v8192_v27 }
 0xc63   :  { %v9413_v15 = vpop.permute.xlu0 %4139  ;;  %v9415_v59 = vpop.permute.xlu1 %4136 }
 0xc64   :  { %v4274_v17 = vrot.slane %v9413_v15, %v8195_v18  ;;  %v4270_v33 = vrot.slane %v9415_v59, %v8192_v27 }
 0xc67   :  { %v9417_v2 = vpop.permute.xlu0 %4145  ;;  %v9419_v38 = vpop.permute.xlu1 %4142 }
 0xc68   :  { %v4283_v57 = vrot.slane %v9417_v2, %v8195_v18  ;;  %v4266_v2 = vsel %vm1191_vm5, %v4265_v4, %v4261_v53  ;;  %v7336_v53 = vld [vmem:[#allocation7 + $0x8] sm:$0xff] }
 0xc6b   :  { %v9421_v16 = vpop.permute.xlu0 %4151  ;;  %v9423_v43 = vpop.permute.xlu1 %4148 }
 0xc6c   :  { %v4292_v15 = vrot.slane %v9421_v16, %v8195_v18  ;;  %v4288_v59 = vrot.slane %v9423_v43, %v8192_v27  ;;  %v4275_v16 = vsel %vm1191_vm5, %v4274_v17, %v4270_v33 }
 0xc6f   :  { %v4065_v63 = vpop.permute.xlu0 %4064  ;;  %v4068_v58 = vpop.permute.xlu1 %4067 }
 0xc70   :  { %v4162_v37 = vrot.slane %v4065_v63, %v8192_v27  ;;  %v4166_v54 = vrot.slane %v4068_v58, %v8195_v18  ;;  %v4279_v63 = vrot.slane %v9419_v38, %v8192_v27 }
 0xc72   :  { %v4167_v42 = vsel %vm1191_vm5, %v4166_v54, %v4162_v37  ;;  %v4284_v61 = vsel %vm1191_vm5, %v4283_v57, %v4279_v63  ;;  %v4582_v57 = vld [vmem:[#allocation16 + $0x18] sm:$0xff]  ;;  %v4577_v63 = vld [vmem:[#allocation14 + $0x10] sm:$0xff] }
 0xc73   :  { %v4074_v28 = vpop.permute.xlu0 %4073  ;;  %v4071_v3 = vpop.permute.xlu1 %4070 }
 0xc74   :  { %v4175_v0 = vrot.slane %v4074_v28, %v8195_v18  ;;  %v4171_v51 = vrot.slane %v4071_v3, %v8192_v27 }
 0xc76   :  { %v4176_v22 = vsel %vm1191_vm5, %v4175_v0, %v4171_v51  ;;  %v4293_v51 = vsel %vm1191_vm5, %v4292_v15, %v4288_v59  ;;  %v4580_v15 = vld [vmem:[#allocation16 + $0x8] sm:$0xff]  ;;  %v4575_v59 = vld [vmem:[#allocation14] sm:$0xff] }
 0xc77   :  { %v4080_v1 = vpop.permute.xlu0 %4079  ;;  %v4077_v40 = vpop.permute.xlu1 %4076  ;;  %v4303_v19 = vsel %vm1328_vm6, %v4176_v22, %v4167_v42 }
 0xc78   :  { %v4184_v12 = vrot.slane %v4080_v1, %v8195_v18  ;;  %v4180_v31 = vrot.slane %v4077_v40, %v8192_v27 }
 0xc7a   :  { %v4185_v48 = vsel %vm1191_vm5, %v4184_v12, %v4180_v31 }
 0xc7b   :  { %v4086_v7 = vpop.permute.xlu0 %4085  ;;  %v4083_v39 = vpop.permute.xlu1 %4082  ;;  %v4304_v58 = vsel %vm1330_vm7, %v4185_v48, %v4303_v19  ;;  %v4398_v48 = vld [vmem:[%s10355_s14] sm:$0x7] }
 0xc7c   :  { %v4193_v9 = vrot.slane %v4086_v7, %v8195_v18  ;;  %v4189_v47 = vrot.slane %v4083_v39, %v8192_v27 }
 0xc7e   :  { %v4194_v21 = vsel %vm1191_vm5, %v4193_v9, %v4189_v47 }
 0xc7f   :  { %v4092_v35 = vpop.permute.xlu0 %4091  ;;  %v4089_v34 = vpop.permute.xlu1 %4088  ;;  %v4305_v3 = vsel %vm1332_vm8, %v4194_v21, %v4304_v58  ;;  %v4581_v58 = vld [vmem:[#allocation16 + $0x10] sm:$0xff] }
 0xc80   :  { %v4202_v41 = vrot.slane %v4092_v35, %v8195_v18  ;;  %v4198_v11 = vrot.slane %v4089_v34, %v8192_v27  ;;  %v4310_v34 = vsel %vm1328_vm6, %v4248_v36, %v4239_v30  ;;  %v9497_v30 = vld [vmem:[#allocation7] sm:$0xff] }
 0xc81   :  { %v4311_v55 = vsel %vm1330_vm7, %v4257_v25, %v4310_v34 }
 0xc82   :  { %v4203_v56 = vsel %vm1191_vm5, %v4202_v41, %v4198_v11  ;;  %v4312_v0 = vsel %vm1332_vm8, %v4266_v2, %v4311_v55  ;;  %v7335_v41 = vld [vmem:[%s10350_s9] sm:$0xf] }
 0xc83   :  { %v4098_v45 = vpop.permute.xlu0 %4097  ;;  %v4095_v52 = vpop.permute.xlu1 %4094  ;;  %v4306_v38 = vsel %vm1334_vm9, %v4203_v56, %v4305_v3  ;;  %v4313_v31 = vsel %vm1334_vm9, %v4275_v16, %v4312_v0  ;;  %v4030_v11 = vrot.slane %v7335_v41, %v7760_v20  ;;  %v4578_v56 = vld [vmem:[#allocation14 + $0x18] sm:$0xff]  ;;  %v4579_v3 = vld [vmem:[#allocation16] sm:$0xff] }
 0xc84   :  { %v4211_v32 = vrot.slane %v4098_v45, %v8195_v18  ;;  %v4207_v49 = vrot.slane %v4095_v52, %v8192_v27  ;;  %v4314_v37 = vsel %vm1336_vm10, %v4284_v61, %v4313_v31  ;;  %v4583_v0 = vld [vmem:[%s10353_s12] sm:$0xf] }
 0xc85   :  { %v4315_v9 = vsel %vm1338_vm12, %v4293_v51, %v4314_v37  ;;  %v4587_v51 = vrot.slane %v4583_v0, %v7746_v6 }
 0xc86   :  { %v4212_v28 = vsel %vm1191_vm5, %v4211_v32, %v4207_v49 }
 0xc87   :  { %v4104_v50 = vpop.permute.xlu0 %4103  ;;  %v4101_v24 = vpop.permute.xlu1 %4100  ;;  %v4307_v43 = vsel %vm1336_vm10, %v4212_v28, %v4306_v38  ;;  %v4576_v28 = vld [vmem:[#allocation14 + $0x8] sm:$0xff] }
 0xc88   :  { %v4220_v10 = vrot.slane %v4104_v50, %v8195_v18  ;;  %v4216_v62 = vrot.slane %v4101_v24, %v8192_v27  ;;  %v4477_v50 = vrot.slane %v4398_v48, %v7753_v14 }
 0xc8a   :  { %v4221_v1 = vsel %vm1191_vm5, %v4220_v10, %v4216_v62 }
 0xc8b   :  { %v4110_v40 = vpop.permute.xlu0 %4109  ;;  %v4107_v7 = vpop.permute.xlu1 %4106  ;;  %v4308_v46 = vsel %vm1338_vm12, %v4221_v1, %v4307_v43  ;;  %v4572_v43 = vrot.slane %v4398_v48, %v7750_v13 }
 0xc8c   :  { %v4229_v39 = vrot.slane %v4110_v40, %v8195_v18  ;;  %v4225_v35 = vrot.slane %v4107_v7, %v8192_v27 }
 0xc8e   :  { %v4230_v60 = vsel %vm1191_vm5, %v4229_v39, %v4225_v35  ;;  %v4566_v39 = vrot.slane %v4398_v48, %v7746_v6 }
 0xc8f   :  { %v4158_v8 = vpop.permute.xlu0 %4157  ;;  %v4155_v44 = vpop.permute.xlu1 %4154  ;;  %v4309_v12 = vsel %vm1340_vm11, %v4230_v60, %v4308_v46 }
 0xc90   :  { %v4301_v45 = vrot.slane %v4158_v8, %v8195_v18  ;;  %v4297_v52 = vrot.slane %v4155_v44, %v8192_v27  ;;  %7020 = vmatprep.mubr.msk.f32.mxu1 %vm1351_vm13, %v4309_v12  ;;  %v4672_v8 = vrot.slane %v4583_v0, %v7750_v13 }
 0xc92   :  { %v4302_v54 = vsel %vm1191_vm5, %v4301_v45, %v4297_v52 }
 0xc93   :  { %v4316_v47 = vsel %vm1340_vm11, %v4302_v54, %v4315_v9  ;;  %v10693_v9 = vld [vmem:[#allocation28_spill] sm:$0xff] }
 0xc94   :  { %7021 = vmatmul.mubr.msk.f32.vlgmr.msra.gmra.mxu1 %vm1351_vm13, %v4316_v47 }
 0xc95   :  { %7034 = vmatprep.mubr.msk.f32.mxu1 %vm1351_vm13, %v9497_v30 }
 0xd54   :  { %v7022_v36 = vpop.f32.mrf.mxu1 }
 0xd55   :  { %v4393_v22 = vadd.f32 %v7022_v36, %v4030_v11 }
 0xd56   :  { %v4387_v32 = vpop.f32.mrf.mxu1 }
 0xd57   :  { %v4397_v49 = vmax.f32 %v4393_v22, 0.0  ;;  %v4388_v25 = vadd.f32 %v4387_v32, %v4030_v11 }
 0xd59   :  { %v4396_v4 = vmax.f32 %v4388_v25, 0.0  ;;  %7023 = vmatprep.subr.mxu0 %v4397_v49 }
 0xd5a   :  { %7024 = vmatpush3.msra.mxu0 %v4397_v49 }
 0xd5b   :  { %7025 = vmatprep.subr.mxu0 %v4396_v4 }
 0xd5c   :  { %7026 = vmatpush3.msra.mxu0 %v4396_v4 }
 0xd5d   :  { %7028 = vmatmul.mubr.msk.f32.vlgmr.msra.gmra.mxu0 %vm1351_vm13, %v7336_v53  ;;  %7037 = vmatprep.subr.mxu0 %v4578_v56 }
 0xd5e   :  { %7038 = vmatpush3.msra.mxu0 %v4578_v56 }
 0xd5f   :  { %7039 = vmatprep.subr.mxu0 %v4577_v63 }
 0xd60   :  { %7040 = vmatpush3.msra.mxu0 %v4577_v63 }
 0xd61   :  { %7041 = vmatprep.subr.mxu0 %v4576_v28 }
 0xd62   :  { %7042 = vmatpush3.msra.mxu0 %v4576_v28 }
 0xd63   :  { %7043 = vmatprep.subr.mxu0 %v4575_v59 }
 0xd64   :  { %7044 = vmatpush3.msra.mxu0 %v4575_v59 }
 0xe1d   :  { %v7029_v24 = vpop.f32.mrf.mxu0 }
 0xe1e   :  { %v4479_v42 = vmul.f32 %v7029_v24, %v4477_v50 }
 0xe1f   :  { %v4465_v21 = vpop.f32.mrf.mxu0 }
 0xe20   :  { %v4481_v10 = vsub.f32 %v4397_v49, %v4479_v42  ;;  %v4478_v62 = vmul.f32 %v4477_v50, %v4465_v21 }
 0xe22   :  { %v4480_v17 = vsub.f32 %v4396_v4, %v4478_v62  ;;  %v4483_v33 = vmul.f32 %v4481_v10, %v4481_v10  ;;  %v9549_v62 = vrot.slane %v4583_v0, %v7753_v14 }
 0xe24   :  { %7030 = vmatprep.subr.mxu1 %v4483_v33  ;;  %v4482_v19 = vmul.f32 %v4480_v17, %v4480_v17 }
 0xe25   :  { %7031 = vmatpush3.msra.mxu1 %v4483_v33 }
 0xe26   :  { %7032 = vmatprep.subr.mxu1 %v4482_v19 }
 0xe27   :  { %7033 = vmatpush3.msra.mxu1 %v4482_v19 }
 0xe28   :  { %7035 = vmatmul.mubr.msk.f32.vlgmr.msra.gmra.mxu1 %vm1351_vm13, %v7336_v53  ;;  %7048 = vmatprep.subr.mxu1 %v4582_v57 }
 0xe29   :  { %7049 = vmatpush3.msra.mxu1 %v4582_v57 }
 0xe2a   :  { %7050 = vmatprep.subr.mxu1 %v4581_v58 }
 0xe2b   :  { %7051 = vmatpush3.msra.mxu1 %v4581_v58 }
 0xe2c   :  { %7052 = vmatprep.subr.mxu1 %v4580_v15 }
 0xe2d   :  { %7053 = vmatpush3.msra.mxu1 %v4580_v15 }
 0xe2e   :  { %7054 = vmatprep.subr.mxu1 %v4579_v3 }
 0xe2f   :  { %7055 = vmatpush3.msra.mxu1 %v4579_v3 }
 0xee8   :  { %v7036_v1 = vpop.f32.mrf.mxu1 }
 0xee9   :  { %v4556_v40 = vadd.f32 1e-05, %v7036_v1 }
 0xeea   :  { %v4550_v7 = vpop.f32.mrf.mxu1 }
 0xeeb   :  { %7257 = vrsqrt.f32 %v4556_v40  ;;  %v4551_v2 = vadd.f32 1e-05, %v4550_v7 }
 0xeed   :  { %7259 = vrsqrt.f32 %v4551_v2 }
 0xef8   :  { %v7258_v38 = vpop.eup %7257 }
 0xef9   :  { %v4562_v35 = vmul.f32 %v7258_v38, %v4481_v10 }
 0xefa   :  { %v7260_v34 = vpop.eup %7259 }
 0xefb   :  { %v4561_v16 = vmul.f32 %v7260_v34, %v4480_v17  ;;  %v4568_v55 = vmul.f32 %v4566_v39, %v4562_v35 }
 0xefd   :  { %v4567_v61 = vmul.f32 %v4566_v39, %v4561_v16  ;;  %v4574_v46 = vadd.f32 %v4572_v43, %v4568_v55 }
 0xeff   :  { %v4573_v60 = vadd.f32 %v4572_v43, %v4567_v61 }
 0xf01   :  { %7045 = vmatprep.mubr.msk.f32.mxu0 %vm713_vm2, %v4573_v60  ;;  %7056 = vmatprep.mubr.msk.f32.mxu1 %vm713_vm2, %v4573_v60 }
 0xf02   :  { %7046 = vmatmul.mubr.msk.f32.vlgmr.msra.gmra.mxu0 %vm713_vm2, %v4574_v46  ;;  %7057 = vmatmul.mubr.msk.f32.vlgmr.msra.gmra.mxu1 %vm713_vm2, %v4574_v46 }
 0xf03   :  { %7070 = vmatprep.mubr.msk.f32.mxu1 %vm1351_vm13, %v9497_v30 }
 0xfc2   :  { %v7047_v44 = vpop.f32.mrf.mxu0  ;;  %v7058_v12 = vpop.f32.mrf.mxu1 }
 0xfc3   :  { %v9524_v31 = vadd.f32 %v7047_v44, %v4587_v51  ;;  %v4745_v45 = vadd.f32 %v7058_v12, %v4672_v8 }
 0xfc4   :  { %v4660_v52 = vpop.f32.mrf.mxu0  ;;  %v4739_v37 = vpop.f32.mrf.mxu1 }
 0xfc5   :  { %v4799_v54 = vcombine.high %v4745_v45, %v4745_v45  ;;  %v4806_v47 = vrot.slane %v4745_v45, %v10693_v9  ;;  %v9527_v41 = vadd.f32 %v4660_v52, %v4587_v51  ;;  %v4740_v30 = vadd.f32 %v4739_v37, %v4672_v8  ;;  %7059 = vmatprep.subr.mxu0 %v9524_v31 }
 0xfc6   :  { %7060 = vmatpush3.msra.mxu0 %v9524_v31 }
 0xfc7   :  { %v4822_v11 = vrot.slane %v4806_v47, %v10693_v9  ;;  %7061 = vmatprep.subr.mxu0 %v9527_v41  ;;  %v4813_v36 = vrot.slane %v4799_v54, %v10693_v9  ;;  %v4814_v22 = vcombine.high %v4806_v47, %v4806_v47  ;;  %v4757_v32 = vrot.slane %v4740_v30, %v10693_v9 }
 0xfc8   :  { %7062 = vmatpush3.msra.mxu0 %v9527_v41  ;;  %v4750_v49 = vcombine.high %v4740_v30, %v4740_v30 }
 0xfc9   :  { %v4883_v25 = vrot.slane %v4822_v11, %v7746_v6  ;;  %v4765_v4 = vcombine.high %v4757_v32, %v4757_v32  ;;  %v4773_v53 = vrot.slane %v4757_v32, %v10693_v9  ;;  %v4815_v48 = vcombine.high %v4813_v36, %v4813_v36 }
 0xfca   :  { %v9539_v50 = vrot.slane %v4814_v22, %v10693_v9  ;;  %v9543_v42 = vrot.slane %v4813_v36, %v10693_v9  ;;  %v4844_v21 = vcombine.high %v4822_v11, %v4822_v11  ;;  %v9546_v10 = vrot.slane %v4750_v49, %v10693_v9 }
 0xfcb   :  { %v4945_v24 = vadd.f32 %v4883_v25, %v9524_v31  ;;  %v9552_v17 = vrot.slane %v4765_v4, %v10693_v9  ;;  %v4851_v33 = vrot.slane %v4773_v53, %v7746_v6  ;;  %v4944_v56 = vadd.f32 %v4883_v25, %v9527_v41 }
 0xfcc   :  { %v9557_v57 = vrot.slane %v4815_v48, %v10693_v9  ;;  %v4846_v63 = vcombine.high %v9539_v50, %v9539_v50  ;;  %v4887_v58 = vrot.slane %v9539_v50, %v7746_v6  ;;  %v4891_v28 = vrot.slane %v4844_v21, %v7746_v6 }
 0xfcd   :  { %vm4977_vm0 = vcmp.gt.f32.partialorder %v4945_v24, 0.0  ;;  %v5009_v19 = vmul.f32 0.2, %v4945_v24  ;;  %v4899_v15 = vrot.slane %v9543_v42, %v7746_v6  ;;  %v9568_v59 = vrot.slane %v9546_v10, %v10693_v9 }
 0xfce   :  { %v4928_v3 = vadd.f32 %v4851_v33, %v9527_v41  ;;  %v4795_v1 = vcombine.high %v4773_v53, %v4773_v53  ;;  %v4855_v40 = vrot.slane %v9552_v17, %v7746_v6  ;;  %v4929_v7 = vadd.f32 %v4851_v33, %v9524_v31 }
 0xfcf   :  { %v5041_v2 = vsel %vm4977_vm0, %v4945_v24, %v5009_v19  ;;  %vm4976_vm1 = vcmp.gt.f32.partialorder %v4944_v56, 0.0  ;;  %v5008_v39 = vmul.f32 0.2, %v4944_v56  ;;  %v4947_v16 = vadd.f32 %v4887_v58, %v9524_v31 }
 0xfd0   :  { %v5077_v38 = vmul.f32 %v9549_v62, %v5041_v2  ;;  %vm4960_vm3 = vcmp.gt.f32.partialorder %v4928_v3, 0.0  ;;  %vm4961_vm4 = vcmp.gt.f32.partialorder %v4929_v7, 0.0  ;;  %v4993_v35 = vmul.f32 0.2, %v4929_v7 }
 0xfd1   :  { %v4992_v34 = vmul.f32 0.2, %v4928_v3  ;;  %v5040_v55 = vsel %vm4976_vm1, %v4944_v56, %v5008_v39  ;;  %v4946_v61 = vadd.f32 %v4887_v58, %v9527_v41  ;;  %v4949_v60 = vadd.f32 %v4891_v28, %v9524_v31 }
 0xfd2   :  { %v5143_v43 = vsel %vm713_vm2, %v5077_v38, 0.0  ;;  %v5076_v46 = vmul.f32 %v9549_v62, %v5040_v55  ;;  %v5025_v0 = vsel %vm4961_vm4, %v4929_v7, %v4993_v35  ;;  %vm4979_vm14 = vcmp.gt.f32.partialorder %v4947_v16, 0.0 }
 0xfd3   :  { %5144 = vadd.xlane.f32.xlu0 %v5143_v43  ;;  %v5024_v51 = vsel %vm4960_vm3, %v4928_v3, %v4992_v34  ;;  %v5061_v8 = vmul.f32 %v9549_v62, %v5025_v0  ;;  %v5011_v12 = vmul.f32 0.2, %v4947_v16  ;;  %vm4978_vm15 = vcmp.gt.f32.partialorder %v4946_v61, 0.0 }
 0xfd4   :  { %v5060_v44 = vmul.f32 %v9549_v62, %v5024_v51  ;;  %v5140_v45 = vsel %vm713_vm2, %v5076_v46, 0.0  ;;  %v5010_v52 = vmul.f32 0.2, %v4946_v61  ;;  %vm4981_vm0 = vcmp.gt.f32.partialorder %v4949_v60, 0.0 }
 0xfd5   :  { %v5013_v37 = vmul.f32 0.2, %v4949_v60  ;;  %v4859_v54 = vrot.slane %v4795_v1, %v7746_v6  ;;  %5141 = vadd.xlane.f32.xlu1 %v5140_v45  ;;  %v5095_v47 = vsel %vm713_vm2, %v5061_v8, 0.0  ;;  %v5043_v30 = vsel %vm4979_vm14, %v4947_v16, %v5011_v12 }
 0xfd6   :  { %v4948_v11 = vadd.f32 %v4891_v28, %v9527_v41  ;;  %v5079_v36 = vmul.f32 %v9549_v62, %v5043_v30  ;;  %v5042_v22 = vsel %vm4978_vm15, %v4946_v61, %v5010_v52  ;;  %v4953_v49 = vadd.f32 %v4899_v15, %v9524_v31 }
 0xfd7   :  { %5096 = vadd.xlane.f32.xlu0 %v5095_v47  ;;  %v5045_v32 = vsel %vm4981_vm0, %v4949_v60, %v5013_v37  ;;  %v4867_v25 = vrot.slane %v9568_v59, %v7746_v6  ;;  %v5092_v4 = vsel %vm713_vm2, %v5060_v44, 0.0  ;;  %v5078_v48 = vmul.f32 %v9549_v62, %v5042_v22 }
 0xfd8   :  { %vm4980_vm1 = vcmp.gt.f32.partialorder %v4948_v11, 0.0  ;;  %v5012_v53 = vmul.f32 0.2, %v4948_v11  ;;  %vm4985_vm3 = vcmp.gt.f32.partialorder %v4953_v49, 0.0  ;;  %v5017_v24 = vmul.f32 0.2, %v4953_v49 }
 0xfd9   :  { %v4952_v21 = vadd.f32 %v4899_v15, %v9527_v41  ;;  %5093 = vadd.xlane.f32.xlu1 %v5092_v4  ;;  %v5149_v33 = vsel %vm713_vm2, %v5079_v36, 0.0  ;;  %v5081_v19 = vmul.f32 %v9549_v62, %v5045_v32  ;;  %v4930_v58 = vadd.f32 %v4855_v40, %v9527_v41 }
 0xfda   :  { %v5044_v56 = vsel %vm4980_vm1, %v4948_v11, %v5012_v53  ;;  %v4845_v28 = vcombine.high %v9543_v42, %v9543_v42  ;;  %v5049_v3 = vsel %vm4985_vm3, %v4953_v49, %v5017_v24  ;;  %v4895_v15 = vrot.slane %v4846_v63, %v7746_v6 }
 0xfdb   :  { %5150 = vadd.xlane.f32.xlu0 %v5149_v33  ;;  %vm4984_vm4 = vcmp.gt.f32.partialorder %v4952_v21, 0.0  ;;  %v5016_v1 = vmul.f32 0.2, %v4952_v21  ;;  %vm4962_vm14 = vcmp.gt.f32.partialorder %v4930_v58, 0.0  ;;  %v4994_v7 = vmul.f32 0.2, %v4930_v58 }
 0xfdc   :  { %v4932_v2 = vadd.f32 %v4859_v54, %v9527_v41  ;;  %v5146_v38 = vsel %vm713_vm2, %v5078_v48, 0.0  ;;  %v5080_v39 = vmul.f32 %v9549_v62, %v5044_v56  ;;  %v4931_v35 = vadd.f32 %v4855_v40, %v9524_v31 }
 0xfdd   :  { %v4936_v42 = vadd.f32 %v4867_v25, %v9527_v41  ;;  %5147 = vadd.xlane.f32.xlu1 %v5146_v38  ;;  %v5155_v34 = vsel %vm713_vm2, %v5081_v19, 0.0  ;;  %v5085_v16 = vmul.f32 %v9549_v62, %v5049_v3  ;;  %v5048_v43 = vsel %vm4984_vm4, %v4952_v21, %v5016_v1 }
 0xfde   :  { %vm4964_vm15 = vcmp.gt.f32.partialorder %v4932_v2, 0.0  ;;  %v4903_v50 = vrot.slane %v9557_v57, %v7746_v6  ;;  %v5026_v63 = vsel %vm4962_vm14, %v4930_v58, %v4994_v7  ;;  %v4996_v55 = vmul.f32 0.2, %v4932_v2 }
 0xfdf   :  { %5156 = vadd.xlane.f32.xlu0 %v5155_v34  ;;  %v4995_v61 = vmul.f32 0.2, %v4931_v35  ;;  %vm4963_vm0 = vcmp.gt.f32.partialorder %v4931_v35, 0.0  ;;  %vm4968_vm1 = vcmp.gt.f32.partialorder %v4936_v42, 0.0  ;;  %v5000_v60 = vmul.f32 0.2, %v4936_v42 }
 0xfe0   :  { %v4933_v40 = vadd.f32 %v4859_v54, %v9524_v31  ;;  %v5152_v46 = vsel %vm713_vm2, %v5080_v39, 0.0  ;;  %v5084_v0 = vmul.f32 %v9549_v62, %v5048_v43  ;;  %v5028_v51 = vsel %vm4964_vm15, %v4932_v2, %v4996_v55 }
 0xfe1   :  { %v4950_v8 = vadd.f32 %v4895_v15, %v9527_v41  ;;  %v4766_v44 = vcombine.high %v9546_v10, %v9546_v10  ;;  %v4797_v12 = vcombine.high %v9552_v17, %v9552_v17  ;;  %5153 = vadd.xlane.f32.xlu1 %v5152_v46  ;;  %v5167_v45 = vsel %vm713_vm2, %v5085_v16, 0.0 }
 0xfe2   :  { %v5062_v52 = vmul.f32 %v9549_v62, %v5026_v63  ;;  %v5064_v37 = vmul.f32 %v9549_v62, %v5028_v51  ;;  %v5027_v54 = vsel %vm4963_vm0, %v4931_v35, %v4995_v61  ;;  %v5032_v47 = vsel %vm4968_vm1, %v4936_v42, %v5000_v60 }
 0xfe3   :  { %5168 = vadd.xlane.f32.xlu0 %v5167_v45  ;;  %v4997_v30 = vmul.f32 0.2, %v4933_v40  ;;  %vm4965_vm3 = vcmp.gt.f32.partialorder %v4933_v40, 0.0  ;;  %v5014_v11 = vmul.f32 0.2, %v4950_v8  ;;  %v4937_v36 = vadd.f32 %v4867_v25, %v9524_v31 }
 0xfe4   :  { %v4954_v10 = vadd.f32 %v4903_v50, %v9527_v41  ;;  %v4907_v22 = vrot.slane %v4845_v28, %v7746_v6  ;;  %v5164_v17 = vsel %vm713_vm2, %v5084_v0, 0.0  ;;  %vm4982_vm4 = vcmp.gt.f32.partialorder %v4950_v8, 0.0 }
 0xfe5   :  { %v4951_v32 = vadd.f32 %v4895_v15, %v9524_v31  ;;  %5165 = vadd.xlane.f32.xlu1 %v5164_v17  ;;  %v5098_v49 = vsel %vm713_vm2, %v5062_v52, 0.0  ;;  %v5063_v4 = vmul.f32 %v9549_v62, %v5027_v54  ;;  %vm4969_vm14 = vcmp.gt.f32.partialorder %v4937_v36, 0.0 }
 0xfe6   :  { %v5001_v53 = vmul.f32 0.2, %v4937_v36  ;;  %v4863_v48 = vrot.slane %v4797_v12, %v7746_v6  ;;  %v5104_v25 = vsel %vm713_vm2, %v5064_v37, 0.0  ;;  %v5068_v24 = vmul.f32 %v9549_v62, %v5032_v47 }
 0xfe7   :  { %5099 = vadd.xlane.f32.xlu0 %v5098_v49  ;;  %v5029_v21 = vsel %vm4965_vm3, %v4933_v40, %v4997_v30  ;;  %v5046_v33 = vsel %vm4982_vm4, %v4950_v8, %v5014_v11  ;;  %vm4986_vm15 = vcmp.gt.f32.partialorder %v4954_v10, 0.0  ;;  %v5018_v19 = vmul.f32 0.2, %v4954_v10 }
 0xfe8   :  { %v5015_v56 = vmul.f32 0.2, %v4951_v32  ;;  %v5033_v58 = vsel %vm4969_vm14, %v4937_v36, %v5001_v53  ;;  %vm4983_vm0 = vcmp.gt.f32.partialorder %v4951_v32, 0.0  ;;  %v4956_v28 = vadd.f32 %v4907_v22, %v9527_v41 }
 0xfe9   :  { %v4955_v3 = vadd.f32 %v4903_v50, %v9524_v31  ;;  %v4794_v1 = vrot.slane %v4766_v44, %v10693_v9  ;;  %5105 = vadd.xlane.f32.xlu1 %v5104_v25  ;;  %v5101_v15 = vsel %vm713_vm2, %v5063_v4, 0.0  ;;  %v5065_v7 = vmul.f32 %v9549_v62, %v5029_v21 }
 0xfea   :  { %v4796_v2 = vcombine.high %v9568_v59, %v9568_v59  ;;  %v5116_v38 = vsel %vm713_vm2, %v5068_v24, 0.0  ;;  %v5082_v39 = vmul.f32 %v9549_v62, %v5046_v33  ;;  %v5069_v35 = vmul.f32 %v9549_v62, %v5033_v58 }
 0xfeb   :  { %5102 = vadd.xlane.f32.xlu0 %v5101_v15  ;;  %v5050_v42 = vsel %vm4986_vm15, %v4954_v10, %v5018_v19  ;;  %v5047_v34 = vsel %vm4983_vm0, %v4951_v32, %v5015_v56  ;;  %v5020_v16 = vmul.f32 0.2, %v4956_v28  ;;  %v5019_v9 = vmul.f32 0.2, %v4955_v3 }
 0xfec   :  { %v4934_v43 = vadd.f32 %v4863_v48, %v9527_v41  ;;  %v4957_v50 = vadd.f32 %v4907_v22, %v9524_v31  ;;  %v4871_v63 = vrot.slane %v4794_v1, %v7746_v6  ;;  %v5107_v59 = vsel %vm713_vm2, %v5065_v7, 0.0 }
 0xfed   :  { %5117 = vadd.xlane.f32.xlu1 %v5116_v38  ;;  %vm4988_vm1 = vcmp.gt.f32.partialorder %v4956_v28, 0.0  ;;  %vm4987_vm3 = vcmp.gt.f32.partialorder %v4955_v3, 0.0  ;;  %v4847_v55 = vcombine.high %v9557_v57, %v9557_v57  ;;  %v4798_v61 = vcombine.high %v4794_v1, %v4794_v1 }
 0xfee   :  { %v4875_v60 = vrot.slane %v4796_v2, %v7746_v6  ;;  %v5158_v40 = vsel %vm713_vm2, %v5082_v39, 0.0  ;;  %v5119_v46 = vsel %vm713_vm2, %v5069_v35, 0.0  ;;  %v5086_v0 = vmul.f32 %v9549_v62, %v5050_v42 }
 0xfef   :  { %5108 = vadd.xlane.f32.xlu0 %v5107_v59  ;;  %v5083_v51 = vmul.f32 %v9549_v62, %v5047_v34  ;;  %v5052_v8 = vsel %vm4988_vm1, %v4956_v28, %v5020_v16  ;;  %v5051_v44 = vsel %vm4987_vm3, %v4955_v3, %v5019_v9  ;;  %v4998_v12 = vmul.f32 0.2, %v4934_v43 }
 0xff0   :  { %v5021_v45 = vmul.f32 0.2, %v4957_v50  ;;  %vm4966_vm4 = vcmp.gt.f32.partialorder %v4934_v43, 0.0  ;;  %vm4989_vm14 = vcmp.gt.f32.partialorder %v4957_v50, 0.0  ;;  %v4938_v57 = vadd.f32 %v4871_v63, %v9527_v41 }
 0xff1   :  { %5159 = vadd.xlane.f32.xlu1 %v5158_v40  ;;  %v4935_v52 = vadd.f32 %v4863_v48, %v9524_v31  ;;  %v5170_v37 = vsel %vm713_vm2, %v5086_v0, 0.0  ;;  %v5161_v54 = vsel %vm713_vm2, %v5083_v51, 0.0  ;;  %v5088_v47 = vmul.f32 %v9549_v62, %v5052_v8 }
 0xff2   :  { %v5087_v30 = vmul.f32 %v9549_v62, %v5051_v44  ;;  %v5030_v11 = vsel %vm4966_vm4, %v4934_v43, %v4998_v12  ;;  %v5053_v36 = vsel %vm4989_vm14, %v4957_v50, %v5021_v45  ;;  %v4940_v10 = vadd.f32 %v4875_v60, %v9527_v41 }
 0xff3   :  { %5120 = vadd.xlane.f32.xlu0 %v5119_v46  ;;  %v5002_v22 = vmul.f32 0.2, %v4938_v57  ;;  %v4999_v17 = vmul.f32 0.2, %v4935_v52  ;;  %v4911_v32 = vrot.slane %v4847_v55, %v7746_v6  ;;  %v4879_v49 = vrot.slane %v4798_v61, %v7746_v6 }
 0xff4   :  { %vm4970_vm15 = vcmp.gt.f32.partialorder %v4938_v57, 0.0  ;;  %vm4967_vm0 = vcmp.gt.f32.partialorder %v4935_v52, 0.0  ;;  %v4939_v4 = vadd.f32 %v4871_v63, %v9524_v31  ;;  %v5176_v53 = vsel %vm713_vm2, %v5088_v47, 0.0 }
 0xff5   :  { %5171 = vadd.xlane.f32.xlu1 %v5170_v37  ;;  %v5066_v48 = vmul.f32 %v9549_v62, %v5030_v11  ;;  %v5173_v25 = vsel %vm713_vm2, %v5087_v30, 0.0  ;;  %v5089_v24 = vmul.f32 %v9549_v62, %v5053_v36  ;;  %v5004_v21 = vmul.f32 0.2, %v4940_v10  ;;  %v10694_v36 = vld [vmem:[#allocation35_spill] sm:$0xff] }
 0xff6   :  { %v4943_v33 = vadd.f32 %v4879_v49, %v9524_v31  ;;  %v5034_v19 = vsel %vm4970_vm15, %v4938_v57, %v5002_v22  ;;  %v5031_v56 = vsel %vm4967_vm0, %v4935_v52, %v4999_v17  ;;  %vm4972_vm1 = vcmp.gt.f32.partialorder %v4940_v10, 0.0  ;;  %v10695_v17 = vld [vmem:[#allocation36_spill] sm:$0xff] }
 0xff7   :  { %5162 = vadd.xlane.f32.xlu0 %v5161_v54  ;;  %v4958_v58 = vadd.f32 %v4911_v32, %v9527_v41  ;;  %v5003_v28 = vmul.f32 0.2, %v4939_v4  ;;  %v4941_v3 = vadd.f32 %v4875_v60, %v9524_v31  ;;  %v5110_v1 = vsel %vm713_vm2, %v5066_v48, 0.0  ;;  %v10697_v48 = vld [vmem:[#allocation32_spill] sm:$0xff] }
 0xff8   :  { %vm4975_vm3 = vcmp.gt.f32.partialorder %v4943_v33, 0.0  ;;  %vm4971_vm4 = vcmp.gt.f32.partialorder %v4939_v4, 0.0  ;;  %v5007_v15 = vmul.f32 0.2, %v4943_v33  ;;  %v5179_v7 = vsel %vm713_vm2, %v5089_v24, 0.0 }
 0xff9   :  { %5177 = vadd.xlane.f32.xlu1 %v5176_v53  ;;  %v5070_v2 = vmul.f32 %v9549_v62, %v5034_v19  ;;  %v5067_v38 = vmul.f32 %v9549_v62, %v5031_v56  ;;  %v5036_v39 = vsel %vm4972_vm1, %v4940_v10, %v5004_v21  ;;  %v5022_v35 = vmul.f32 0.2, %v4958_v58  ;;  %v10698_v21 = vld [vmem:[#allocation37_spill] sm:$0xff]  ;;  %v10699_v56 = vld [vmem:[#allocation38_spill] sm:$0xff] }
 0xffa   :  { %v4942_v42 = vadd.f32 %v4879_v49, %v9527_v41  ;;  %v4959_v34 = vadd.f32 %v4911_v32, %v9524_v31  ;;  %v5039_v16 = vsel %vm4975_vm3, %v4943_v33, %v5007_v15  ;;  %v5035_v9 = vsel %vm4971_vm4, %v4939_v4, %v5003_v28  ;;  %v10696_v49 = vld [vmem:[#allocation29_spill] sm:$0xff] }
 0xffb   :  { %5174 = vadd.xlane.f32.xlu0 %v5173_v25  ;;  %vm4990_vm14 = vcmp.gt.f32.partialorder %v4958_v58, 0.0  ;;  %v5005_v43 = vmul.f32 0.2, %v4941_v3  ;;  %v5075_v50 = vmul.f32 %v9549_v62, %v5039_v16  ;;  %vm4973_vm15 = vcmp.gt.f32.partialorder %v4941_v3, 0.0 }
 0xffc   :  { %v5122_v63 = vsel %vm713_vm2, %v5070_v2, 0.0  ;;  %v5072_v59 = vmul.f32 %v9549_v62, %v5036_v39  ;;  %v5113_v55 = vsel %vm713_vm2, %v5067_v38, 0.0  ;;  %v5071_v61 = vmul.f32 %v9549_v62, %v5035_v9  ;;  %v10702_v39 = vld [vmem:[#allocation49_spill] sm:$0xff] }
 0xffd   :  { %5111 = vadd.xlane.f32.xlu1 %v5110_v1  ;;  %v5054_v41 = vsel %vm4990_vm14, %v4958_v58, %v5022_v35  ;;  %v5006_v60 = vmul.f32 0.2, %v4942_v42  ;;  %v5037_v31 = vsel %vm4973_vm15, %v4941_v3, %v5005_v43  ;;  %vm4974_vm0 = vcmp.gt.f32.partialorder %v4942_v42, 0.0  ;;  %v10700_v3 = vld [vmem:[#allocation41_spill] sm:$0xff]  ;;  %v10704_v43 = vld [vmem:[#allocation30_spill] sm:$0xff] }
 0xffe   :  { %v5023_v40 = vmul.f32 0.2, %v4959_v34  ;;  %vm4991_vm1 = vcmp.gt.f32.partialorder %v4959_v34, 0.0  ;;  %v5128_v46 = vsel %vm713_vm2, %v5072_v59, 0.0  ;;  %v5090_v0 = vmul.f32 %v9549_v62, %v5054_v41 }
 0xfff   :  { %5180 = vadd.xlane.f32.xlu0 %v5179_v7  ;;  %v5125_v51 = vsel %vm713_vm2, %v5071_v61, 0.0  ;;  %v5073_v8 = vmul.f32 %v9549_v62, %v5037_v31  ;;  %v5038_v44 = vsel %vm4974_vm0, %v4942_v42, %v5006_v60  ;;  %v5137_v30 = vsel %vm713_vm2, %v5075_v50, 0.0  ;;  %v10701_v7 = vld [vmem:[#allocation42_spill] sm:$0xff]  ;;  %v10706_v31 = vld [vmem:[#allocation33_spill] sm:$0xff] }
0x1000   :  { %v5055_v12 = vsel %vm4991_vm1, %v4959_v34, %v5023_v40  ;;  %v5182_v45 = vsel %vm713_vm2, %v5090_v0, 0.0  ;;  %v5074_v57 = vmul.f32 %v9549_v62, %v5038_v44  ;;  %v10703_v34 = vld [vmem:[#allocation50_spill] sm:$0xff]  ;;  %v10709_v44 = vld [vmem:[#allocation43_spill] sm:$0xff] }
0x1001   :  { %5123 = vadd.xlane.f32.xlu1 %v5122_v63  ;;  %v5131_v52 = vsel %vm713_vm2, %v5073_v8, 0.0  ;;  %v5091_v37 = vmul.f32 %v9549_v62, %v5055_v12  ;;  %v10708_v0 = vld [vmem:[#allocation34_spill] sm:$0xff] }
0x1002   :  { %v5134_v54 = vsel %vm713_vm2, %v5074_v57, 0.0  ;;  %v10711_v57 = vld [vmem:[#allocation44_spill] sm:$0xff] }
0x1003   :  { %5114 = vadd.xlane.f32.xlu0 %v5113_v55  ;;  %v5185_v47 = vsel %vm713_vm2, %v5091_v37, 0.0  ;;  %v10705_v55 = vld [vmem:[#allocation31_spill] sm:$0xff] }
0x1005   :  { %5129 = vadd.xlane.f32.xlu1 %v5128_v46 }
0x1007   :  { %5126 = vadd.xlane.f32.xlu0 %v5125_v51 }
0x1009   :  { %5183 = vadd.xlane.f32.xlu1 %v5182_v45 }
0x100b   :  { %5132 = vadd.xlane.f32.xlu0 %v5131_v52 }
0x100d   :  { %5135 = vadd.xlane.f32.xlu1 %v5134_v54  ;;  %v10713_v54 = vld [vmem:[#allocation45_spill] sm:$0xff] }
0x100f   :  { %5186 = vadd.xlane.f32.xlu0 %v5185_v47 }
0x1013   :  { %5138 = vadd.xlane.f32.xlu0 %v5137_v30 }
0x105c   :  { %v5145_v11 = vpop.xlane.xlu0 %5144 }
0x105d   :  { %v9695_v10 = vadd.f32 %v5145_v11, %v10694_v36  ;;  %v10714_v11 = vld [vmem:[#allocation46_spill] sm:$0xff] }
0x105e   :  { %v5142_v22 = vpop.xlane.xlu1 %5141 }
0x105f   :  { %5304 = vperm.xlu0 %7116, %v9695_v10   ;;  %v9699_v32 = vadd.f32 %v5142_v22, %v10695_v17  ;;  %v10715_v17 = vld [vmem:[#allocation53_spill] sm:$0xff] }
0x1060   :  { %v5097_v62 = vpop.xlane.xlu0 %5096 }
0x1061   :  { %v9702_v4 = vadd.f32 %v5097_v62, %v10696_v49  ;;  %5301 = vperm.xlu1 %7115, %v9699_v32  }
0x1062   :  { %v5094_v53 = vpop.xlane.xlu1 %5093 }
0x1063   :  { %5256 = vperm.xlu0 %7116, %v9702_v4   ;;  %v9707_v25 = vadd.f32 %v5094_v53, %v10697_v48  ;;  %v10716_v53 = vld [vmem:[#allocation54_spill] sm:$0xff] }
0x1064   :  { %v5151_v24 = vpop.xlane.xlu0 %5150 }
0x1065   :  { %v9710_v33 = vadd.f32 %v5151_v24, %v10698_v21  ;;  %5253 = vperm.xlu1 %7115, %v9707_v25   ;;  %v10717_v21 = vld [vmem:[#allocation57_spill] sm:$0xff] }
0x1066   :  { %v5148_v19 = vpop.xlane.xlu1 %5147 }
0x1067   :  { %5310 = vperm.xlu0 %7116, %v9710_v33   ;;  %v9715_v58 = vadd.f32 %v5148_v19, %v10699_v56 }
0x1068   :  { %v5157_v28 = vpop.xlane.xlu0 %5156 }
0x1069   :  { %v9718_v1 = vadd.f32 %v5157_v28, %v10700_v3  ;;  %5307 = vperm.xlu1 %7115, %v9715_v58   ;;  %v10718_v28 = vld [vmem:[#allocation58_spill] sm:$0xff] }
0x106a   :  { %v5154_v15 = vpop.xlane.xlu1 %5153 }
0x106b   :  { %5316 = vperm.xlu0 %7116, %v9718_v1   ;;  %v9723_v2 = vadd.f32 %v5154_v15, %v10701_v7  ;;  %v10719_v7 = vld [vmem:[#allocation39_spill] sm:$0xff] }
0x106c   :  { %v5169_v38 = vpop.xlane.xlu0 %5168 }
0x106d   :  { %v9726_v35 = vadd.f32 %v5169_v38, %v10702_v39  ;;  %5313 = vperm.xlu1 %7115, %v9723_v2  }
0x106e   :  { %v5166_v42 = vpop.xlane.xlu1 %5165 }
0x106f   :  { %5328 = vperm.xlu0 %7116, %v9726_v35   ;;  %v9731_v16 = vadd.f32 %v5166_v42, %v10703_v34  ;;  %v10721_v42 = vld [vmem:[#allocation40_spill] sm:$0xff] }
0x1070   :  { %v5100_v9 = vpop.xlane.xlu0 %5099 }
0x1071   :  { %5325 = vperm.xlu1 %7115, %v9731_v16   ;;  %v9735_v50 = vadd.f32 %v5100_v9, %v10704_v43  ;;  %v10723_v43 = vld [vmem:[#allocation47_spill] sm:$0xff] }
0x1072   :  { %v5106_v63 = vpop.xlane.xlu1 %5105 }
0x1073   :  { %v9747_v51 = vadd.f32 %v5106_v63, %v10708_v0  ;;  %v10729_v0 = vld [vmem:[#allocation52_spill] sm:$0xff] }
0x1074   :  { %v5103_v59 = vpop.xlane.xlu0 %5102 }
0x1075   :  { %5259 = vperm.xlu1 %7115, %v9735_v50   ;;  %v9739_v61 = vadd.f32 %v5103_v59, %v10705_v55  ;;  %v10725_v55 = vld [vmem:[#allocation48_spill] sm:$0xff] }
0x1076   :  { %v5118_v41 = vpop.xlane.xlu1 %5117 }
0x1077   :  { %v9755_v52 = vadd.f32 %v5118_v41, %v10711_v57  ;;  %v10731_v57 = vld [vmem:[#allocation56_spill] sm:$0xff] }
0x1078   :  { %v5109_v60 = vpop.xlane.xlu0 %5108 }
0x1079   :  { %v9742_v40 = vadd.f32 %v5109_v60, %v10706_v31  ;;  %5262 = vperm.xlu1 %7115, %v9739_v61   ;;  %10712 = vst [vmem:[#allocation66_spill] sm:$0xff] %v9755_v52  ;;  %v10727_v31 = vld [vmem:[#allocation51_spill] sm:$0xff] }
0x107a   :  { %v5160_v46 = vpop.xlane.xlu1 %5159 }
0x107b   :  { %10707 = vst [vmem:[#allocation63_spill] sm:$0xff] %v9742_v40  ;;  %5268 = vperm.xlu0 %7116, %v9742_v40   ;;  %v9763_v36 = vadd.f32 %v5160_v46, %v10714_v11 }
0x107c   :  { %v5121_v8 = vpop.xlane.xlu0 %5120 }
0x107d   :  { %v9750_v12 = vadd.f32 %v5121_v8, %v10709_v44  ;;  %5265 = vperm.xlu1 %7115, %v9747_v51  }
0x107e   :  { %v5172_v45 = vpop.xlane.xlu1 %5171 }
0x107f   :  { %10710 = vst [vmem:[#allocation64_spill] sm:$0xff] %v9750_v12  ;;  %5280 = vperm.xlu0 %7116, %v9750_v12   ;;  %v9771_v48 = vadd.f32 %v5172_v45, %v10716_v53 }
0x1080   :  { %v5163_v37 = vpop.xlane.xlu0 %5162 }
0x1081   :  { %v9758_v47 = vadd.f32 %v5163_v37, %v10713_v54  ;;  %5277 = vperm.xlu1 %7115, %v9755_v52  }
0x1082   :  { %v5178_v30 = vpop.xlane.xlu1 %5177 }
0x1083   :  { %5322 = vperm.xlu0 %7116, %v9758_v47   ;;  %v9779_v3 = vadd.f32 %v5178_v30, %v10718_v28  ;;  %v10733_v30 = vld [vmem:[#allocation55_spill] sm:$0xff] }
0x1084   :  { %v5175_v22 = vpop.xlane.xlu0 %5174 }
0x1085   :  { %v9766_v62 = vadd.f32 %v5175_v22, %v10715_v17  ;;  %5319 = vperm.xlu1 %7115, %v9763_v36   ;;  %v10735_v22 = vld [vmem:[#allocation60_spill] sm:$0xff] }
0x1086   :  { %v5112_v49 = vpop.xlane.xlu1 %5111 }
0x1087   :  { %5334 = vperm.xlu0 %7116, %v9766_v62   ;;  %v9787_v34 = vadd.f32 %v5112_v49, %v10721_v42  ;;  %v10737_v49 = vld [vmem:[#allocation59_spill] sm:$0xff] }
0x1088   :  { %v5181_v24 = vpop.xlane.xlu0 %5180 }
0x1089   :  { %v9774_v19 = vadd.f32 %v5181_v24, %v10717_v21  ;;  %5331 = vperm.xlu1 %7115, %v9771_v48   ;;  %10722 = vst [vmem:[#allocation62_spill] sm:$0xff] %v9787_v34 }
0x108a   :  { %v5124_v56 = vpop.xlane.xlu1 %5123 }
0x108b   :  { %5340 = vperm.xlu0 %7116, %v9774_v19   ;;  %v9795_v41 = vadd.f32 %v5124_v56, %v10725_v55 }
0x108c   :  { %v5115_v15 = vpop.xlane.xlu0 %5114 }
0x108d   :  { %v9782_v38 = vadd.f32 %v5115_v15, %v10719_v7  ;;  %5337 = vperm.xlu1 %7115, %v9779_v3   ;;  %10726 = vst [vmem:[#allocation67_spill] sm:$0xff] %v9795_v41 }
0x108e   :  { %v5130_v39 = vpop.xlane.xlu1 %5129 }
0x108f   :  { %10720 = vst [vmem:[#allocation61_spill] sm:$0xff] %v9782_v38  ;;  %5274 = vperm.xlu0 %7116, %v9782_v38   ;;  %v9803_v8 = vadd.f32 %v5130_v39, %v10729_v0 }
0x1090   :  { %v5127_v9 = vpop.xlane.xlu0 %5126 }
0x1091   :  { %v9790_v63 = vadd.f32 %v5127_v9, %v10723_v43  ;;  %5271 = vperm.xlu1 %7115, %v9787_v34   ;;  %10730 = vst [vmem:[#allocation69_spill] sm:$0xff] %v9803_v8 }
0x1092   :  { %v5184_v59 = vpop.xlane.xlu1 %5183 }
0x1093   :  { %10724 = vst [vmem:[#allocation65_spill] sm:$0xff] %v9790_v63  ;;  %5286 = vperm.xlu0 %7116, %v9790_v63   ;;  %v9815_v17 = vadd.f32 %v5184_v59, %v10735_v22 }
0x1094   :  { %v5133_v60 = vpop.xlane.xlu0 %5132 }
0x1095   :  { %v9798_v46 = vadd.f32 %v5133_v60, %v10727_v31  ;;  %5283 = vperm.xlu1 %7115, %v9795_v41   ;;  %10736 = vst [vmem:[#allocation72_spill] sm:$0xff] %v9815_v17 }
0x1096   :  { %v5136_v45 = vpop.xlane.xlu1 %5135 }
0x1097   :  { %10728 = vst [vmem:[#allocation68_spill] sm:$0xff] %v9798_v46  ;;  %5292 = vperm.xlu0 %7116, %v9798_v46   ;;  %v9807_v37 = vadd.f32 %v5136_v45, %v10731_v57 }
0x1098   :  { %v5187_v44 = vpop.xlane.xlu0 %5186 }
0x1099   :  { %5289 = vperm.xlu1 %7115, %v9803_v8   ;;  %10732 = vst [vmem:[#allocation71_spill] sm:$0xff] %v9807_v37  ;;  %v9818_v53 = vadd.f32 %v5187_v44, %v10737_v49 }
0x109b   :  { %10738 = vst [vmem:[#allocation73_spill] sm:$0xff] %v9818_v53 }
0x109c   :  { %v5139_v54 = vpop.xlane.xlu0 %5138 }
0x109d   :  { %v9810_v11 = vadd.f32 %v5139_v54, %v10733_v30  ;;  %5295 = vperm.xlu1 %7115, %v9807_v37  }
0x109f   :  { %10734 = vst [vmem:[#allocation70_spill] sm:$0xff] %v9810_v11  ;;  %5298 = vperm.xlu0 %7116, %v9810_v11  }
0x10a1   :  { %5343 = vperm.xlu1 %7115, %v9815_v17  }
0x10a3   :  { %5346 = vperm.xlu0 %7116, %v9818_v53  }
0x10da   :  { %v5305_v24 = vpop.permute.xlu0 %5304 }
0x10db   :  { %v5427_v37 = vrot.slane %v5305_v24, %v8195_v18 }
0x10dc   :  { %v5302_v21 = vpop.permute.xlu1 %5301 }
0x10dd   :  { %v5423_v46 = vrot.slane %v5302_v21, %v8192_v27 }
0x10de   :  { %v5257_v56 = vpop.permute.xlu0 %5256 }
0x10df   :  { %v5355_v8 = vrot.slane %v5257_v56, %v8195_v18  ;;  %v5428_v40 = vsel %vm1191_vm5, %v5427_v37, %v5423_v46 }
0x10e0   :  { %v5254_v28 = vpop.permute.xlu1 %5253 }
0x10e1   :  { %v5351_v63 = vrot.slane %v5254_v28, %v8192_v27 }
0x10e2   :  { %v5311_v7 = vpop.permute.xlu0 %5310 }
0x10e3   :  { %v5436_v41 = vrot.slane %v5311_v7, %v8195_v18  ;;  %v5356_v28 = vsel %vm1191_vm5, %v5355_v8, %v5351_v63 }
0x10e4   :  { %v5308_v15 = vpop.permute.xlu1 %5307 }
0x10e5   :  { %v5432_v12 = vrot.slane %v5308_v15, %v8192_v27 }
0x10e6   :  { %v5317_v42 = vpop.permute.xlu0 %5316 }
0x10e7   :  { %v5437_v7 = vsel %vm1191_vm5, %v5436_v41, %v5432_v12  ;;  %v5445_v15 = vrot.slane %v5317_v42, %v8195_v18 }
0x10e8   :  { %v5314_v39 = vpop.permute.xlu1 %5313 }
0x10ea   :  { %v9824_v59 = vpop.permute.xlu0 %5328 }
0x10ec   :  { %v9822_v9 = vpop.permute.xlu1 %5325 }
0x10f0   :  { %v5260_v43 = vpop.permute.xlu1 %5259 }
0x10f1   :  { %v5360_v52 = vrot.slane %v5260_v43, %v8192_v27 }
0x10f4   :  { %v5263_v55 = vpop.permute.xlu1 %5262 }
0x10f5   :  { %v5364_v17 = vrot.slane %v5263_v55, %v8195_v18 }
0x10f6   :  { %v5269_v60 = vpop.permute.xlu0 %5268 }
0x10f7   :  { %v5373_v38 = vrot.slane %v5269_v60, %v8195_v18  ;;  %v5365_v34 = vsel %vm1191_vm5, %v5364_v17, %v5360_v52  ;;  %v5441_v60 = vrot.slane %v5314_v39, %v8192_v27 }
0x10f8   :  { %v5266_v31 = vpop.permute.xlu1 %5265 }
0x10f9   :  { %v5369_v55 = vrot.slane %v5266_v31, %v8192_v27  ;;  %v5492_v31 = vsel %vm1328_vm6, %v5365_v34, %v5356_v28  ;;  %v5446_v42 = vsel %vm1191_vm5, %v5445_v15, %v5441_v60 }
0x10fa   :  { %v5281_v0 = vpop.permute.xlu0 %5280 }
0x10fb   :  { %v5374_v52 = vsel %vm1191_vm5, %v5373_v38, %v5369_v55  ;;  %v5391_v41 = vrot.slane %v5281_v0, %v8195_v18  ;;  %v5499_v38 = vsel %vm1328_vm6, %v5437_v7, %v5428_v40 }
0x10fc   :  { %v5278_v44 = vpop.permute.xlu1 %5277  ;;  %v5493_v39 = vsel %vm1330_vm7, %v5374_v52, %v5492_v31  ;;  %v5500_v7 = vsel %vm1330_vm7, %v5446_v42, %v5499_v38 }
0x10fd   :  { %v5387_v8 = vrot.slane %v5278_v44, %v8192_v27 }
0x10fe   :  { %v5323_v45 = vpop.permute.xlu0 %5322 }
0x10ff   :  { %v5454_v17 = vrot.slane %v5323_v45, %v8195_v18  ;;  %v5459_v45 = vrot.slane %v9822_v9, %v8192_v27 }
0x1100   :  { %v5320_v57 = vpop.permute.xlu1 %5319 }
0x1102   :  { %v9826_v54 = vpop.permute.xlu0 %5334 }
0x1104   :  { %v5332_v30 = vpop.permute.xlu1 %5331 }
0x1105   :  { %v5468_v55 = vrot.slane %v5332_v30, %v8192_v27 }
0x1106   :  { %v9828_v22 = vpop.permute.xlu0 %5340 }
0x1108   :  { %v9830_v49 = vpop.permute.xlu1 %5337 }
0x1109   :  { %v5477_v9 = vrot.slane %v9830_v49, %v8192_v27 }
0x110a   :  { %v5275_v53 = vpop.permute.xlu0 %5274 }
0x110b   :  { %v5382_v24 = vrot.slane %v5275_v53, %v8195_v18 }
0x110c   :  { %v5272_v11 = vpop.permute.xlu1 %5271 }
0x110d   :  { %v5378_v21 = vrot.slane %v5272_v11, %v8192_v27  ;;  %v5450_v11 = vrot.slane %v5320_v57, %v8192_v27  ;;  %v5472_v57 = vrot.slane %v9826_v54, %v8195_v18 }
0x110e   :  { %v5287_v5 = vpop.permute.xlu0 %5286 }
0x110f   :  { %v5383_v53 = vsel %vm1191_vm5, %v5382_v24, %v5378_v21  ;;  %v5400_v46 = vrot.slane %v5287_v5, %v8195_v18  ;;  %v5463_v5 = vrot.slane %v9824_v59, %v8195_v18  ;;  %v5455_v44 = vsel %vm1191_vm5, %v5454_v17, %v5450_v11 }
0x1110   :  { %v5284_v56 = vpop.permute.xlu1 %5283  ;;  %v5494_v0 = vsel %vm1332_vm8, %v5383_v53, %v5493_v39  ;;  %v5392_v21 = vsel %vm1191_vm5, %v5391_v41, %v5387_v8  ;;  %v5481_v59 = vrot.slane %v9828_v22, %v8195_v18  ;;  %v5473_v22 = vsel %vm1191_vm5, %v5472_v57, %v5468_v55 }
0x1111   :  { %v5396_v63 = vrot.slane %v5284_v56, %v8192_v27  ;;  %v5495_v15 = vsel %vm1334_vm9, %v5392_v21, %v5494_v0  ;;  %v5464_v17 = vsel %vm1191_vm5, %v5463_v5, %v5459_v45 }
0x1112   :  { %v5293_v43 = vpop.permute.xlu0 %5292  ;;  %v5482_v11 = vsel %vm1191_vm5, %v5481_v59, %v5477_v9 }
0x1113   :  { %v5409_v37 = vrot.slane %v5293_v43, %v8195_v18  ;;  %v5401_v40 = vsel %vm1191_vm5, %v5400_v46, %v5396_v63  ;;  %v5501_v43 = vsel %vm1332_vm8, %v5455_v44, %v5500_v7 }
0x1114   :  { %v5290_v12 = vpop.permute.xlu1 %5289  ;;  %v5496_v60 = vsel %vm1336_vm10, %v5401_v40, %v5495_v15  ;;  %v5502_v8 = vsel %vm1334_vm9, %v5464_v17, %v5501_v43 }
0x1115   :  { %v5405_v34 = vrot.slane %v5290_v12, %v8192_v27 }
0x1117   :  { %v5410_v56 = vsel %vm1191_vm5, %v5409_v37, %v5405_v34  ;;  %v5503_v37 = vsel %vm1336_vm10, %v5473_v22, %v5502_v8 }
0x1118   :  { %v5296_v24 = vpop.permute.xlu1 %5295  ;;  %v5497_v52 = vsel %vm1338_vm12, %v5410_v56, %v5496_v60  ;;  %v5504_v38 = vsel %vm1338_vm12, %v5482_v11, %v5503_v37 }
0x1119   :  { %v5414_v54 = vrot.slane %v5296_v24, %v8192_v27 }
0x111a   :  { %v5299_v28 = vpop.permute.xlu0 %5298 }
0x111b   :  { %v5418_v30 = vrot.slane %v5299_v28, %v8195_v18 }
0x111c   :  { %v5344_v31 = vpop.permute.xlu1 %5343 }
0x111d   :  { %v5419_v49 = vsel %vm1191_vm5, %v5418_v30, %v5414_v54  ;;  %v5486_v63 = vrot.slane %v5344_v31, %v8192_v27 }
0x111e   :  { %v5347_v53 = vpop.permute.xlu0 %5346  ;;  %v5498_v46 = vsel %vm1340_vm11, %v5419_v49, %v5497_v52 }
0x111f   :  { %v5490_v12 = vrot.slane %v5347_v53, %v8195_v18  ;;  %v5508_v41 = vsel %vm1351_vm13, %v5498_v46, -inf }
0x1120   :  { %5509 = vmax.xlane.f32.xlu1 %v5508_v41 }
0x1121   :  { %v5491_v34 = vsel %vm1191_vm5, %v5490_v12, %v5486_v63 }
0x1122   :  { %v5505_v39 = vsel %vm1340_vm11, %v5491_v34, %v5504_v38 }
0x1123   :  { %v5511_v42 = vsel %vm1351_vm13, %v5505_v39, -inf }
0x1124   :  { %5512 = vmax.xlane.f32.xlu0 %v5511_v42 }
0x11a9   :  { %v9930_v49 = vpop.xlane.xlu1 %5509 }
0x11aa   :  { %v5523_v12 = vrot.slane %v9930_v49, %v7750_v13  ;;  %v5527_v38 = vrot.slane %v9930_v49, %v7753_v14 }
0x11ac   :  { %v5598_v39 = vsub.f32 %v9735_v50, %v5523_v12 }
0x11ad   :  { %v9901_v5 = vpop.xlane.xlu0 %5512 }
0x11ae   :  { %v5551_v45 = vrot.slane %v9901_v5, %v7746_v6  ;;  %v5555_v0 = vrot.slane %v9901_v5, %v7750_v13  ;;  %v5559_v55 = vrot.slane %v9901_v5, %v7753_v14  ;;  %v5563_v9 = vrot.slane %v9901_v5, %v7760_v20 }
0x11af   :  { %v5567_v7 = vrot.slane %v9901_v5, %v7765_v23  ;;  %v5632_v50 = vmul.f32 1.442695, %v5598_v39  ;;  %v10748_v39 = vld [vmem:[#allocation68_spill] sm:$0xff] }
0x11b0   :  { %v5612_v44 = vsub.f32 %v9699_v32, %v5551_v45  ;;  %v5613_v57 = vsub.f32 %v9695_v10, %v5551_v45  ;;  %v5614_v40 = vsub.f32 %v9715_v58, %v5555_v0  ;;  %v5615_v21 = vsub.f32 %v9710_v33, %v5555_v0 }
0x11b1   :  { %v5616_v56 = vsub.f32 %v9723_v2, %v5559_v55  ;;  %v5617_v32 = vsub.f32 %v9718_v1, %v5559_v55  ;;  %v5618_v58 = vsub.f32 %v9763_v36, %v5563_v9  ;;  %v5619_v33 = vsub.f32 %v9758_v47, %v5563_v9  ;;  %v10740_v9 = vld [vmem:[#allocation62_spill] sm:$0xff] }
0x11b2   :  { %v5660_v24 = vmul.f32 1.442695, %v5612_v44  ;;  %v5662_v59 = vmul.f32 1.442695, %v5613_v57  ;;  %v5664_v28 = vmul.f32 1.442695, %v5614_v40  ;;  %v5571_v2 = vrot.slane %v9901_v5, %v7770_v26 }
0x11b3   :  { %v5666_v10 = vmul.f32 1.442695, %v5615_v21  ;;  %v5668_v54 = vmul.f32 1.442695, %v5616_v56  ;;  %v5670_v30 = vmul.f32 1.442695, %v5617_v32  ;;  %v5620_v15 = vsub.f32 %v9731_v16, %v5567_v7 }
0x11b4   :  { %7261 = vpow2.f32 %v5660_v24  ;;  %v5672_v1 = vmul.f32 1.442695, %v5618_v58  ;;  %v5621_v43 = vsub.f32 %v9726_v35, %v5567_v7  ;;  %v5674_v60 = vmul.f32 1.442695, %v5619_v33  ;;  %v10739_v40 = vld [vmem:[#allocation63_spill] sm:$0xff]  ;;  %v10741_v32 = vld [vmem:[#allocation61_spill] sm:$0xff] }
0x11b5   :  { %7263 = vpow2.f32 %v5662_v59  ;;  %v5575_v36 = vrot.slane %v9901_v5, %v7775_v29  ;;  %v5622_v22 = vsub.f32 %v9771_v48, %v5571_v2  ;;  %v5676_v47 = vmul.f32 1.442695, %v5620_v15  ;;  %v10742_v33 = vld [vmem:[#allocation66_spill] sm:$0xff] }
0x11b6   :  { %7265 = vpow2.f32 %v5664_v28  ;;  %v5623_v52 = vsub.f32 %v9766_v62, %v5571_v2  ;;  %v5678_v16 = vmul.f32 1.442695, %v5621_v43  ;;  %v5519_v35 = vrot.slane %v9930_v49, %v7746_v6 }
0x11b7   :  { %7267 = vpow2.f32 %v5666_v10  ;;  %v5624_v48 = vsub.f32 %v9779_v3, %v5575_v36  ;;  %v5680_v11 = vmul.f32 1.442695, %v5622_v22  ;;  %v5625_v46 = vsub.f32 %v9774_v19, %v5575_v36 }
0x11b8   :  { %7269 = vpow2.f32 %v5668_v54  ;;  %v5682_v62 = vmul.f32 1.442695, %v5623_v52  ;;  %v5597_v41 = vsub.f32 %v9702_v4, %v5519_v35  ;;  %v5596_v37 = vsub.f32 %v9707_v25, %v5519_v35 }
0x11b9   :  { %7271 = vpow2.f32 %v5670_v30  ;;  %v5684_v3 = vmul.f32 1.442695, %v5624_v48  ;;  %v5686_v19 = vmul.f32 1.442695, %v5625_v46  ;;  %v5599_v45 = vsub.f32 %v9739_v61, %v5523_v12  ;;  %v10745_v48 = vld [vmem:[#allocation65_spill] sm:$0xff]  ;;  %v10746_v12 = vld [vmem:[#allocation27_spill] sm:$0xff] }
0x11ba   :  { %7273 = vpow2.f32 %v5672_v1  ;;  %v5630_v4 = vmul.f32 1.442695, %v5597_v41  ;;  %v5628_v25 = vmul.f32 1.442695, %v5596_v37  ;;  %v5531_v44 = vrot.slane %v9930_v49, %v7760_v20  ;;  %v10743_v1 = vld [vmem:[#allocation64_spill] sm:$0xff] }
0x11bb   :  { %7275 = vpow2.f32 %v5674_v60  ;;  %v5600_v57 = vsub.f32 %v9747_v51, %v5527_v38  ;;  %v5601_v24 = vsub.f32 %v10739_v40, %v5527_v38  ;;  %v5634_v61 = vmul.f32 1.442695, %v5599_v45 }
0x11bc   :  { %7277 = vpow2.f32 %v5676_v47  ;;  %v5535_v59 = vrot.slane %v9930_v49, %v7765_v23  ;;  %v5602_v56 = vsub.f32 %v10740_v9, %v5531_v44  ;;  %v5603_v10 = vsub.f32 %v10741_v32, %v5531_v44  ;;  %v10744_v47 = vld [vmem:[#allocation67_spill] sm:$0xff] }
0x11bd   :  { %7279 = vpow2.f32 %v5678_v16  ;;  %v5636_v51 = vmul.f32 1.442695, %v5600_v57  ;;  %v5638_v7 = vmul.f32 1.442695, %v5601_v24  ;;  %v5539_v54 = vrot.slane %v9930_v49, %v7770_v26  ;;  %v10749_v44 = vld [vmem:[#allocation71_spill] sm:$0xff]  ;;  %v10750_v24 = vld [vmem:[#allocation70_spill] sm:$0xff] }
0x11be   :  { %7281 = vpow2.f32 %v5680_v11  ;;  %v5604_v30 = vsub.f32 %v10742_v33, %v5535_v59  ;;  %v5640_v2 = vmul.f32 1.442695, %v5602_v56  ;;  %v5605_v43 = vsub.f32 %v10743_v1, %v5535_v59 }
0x11bf   :  { %7283 = vpow2.f32 %v5682_v62  ;;  %v5642_v60 = vmul.f32 1.442695, %v5603_v10  ;;  %v5543_v22 = vrot.slane %v9930_v49, %v7775_v29  ;;  %v5606_v52 = vsub.f32 %v10744_v47, %v5539_v54 }
0x11c0   :  { %7285 = vpow2.f32 %v5684_v3  ;;  %v5644_v16 = vmul.f32 1.442695, %v5604_v30  ;;  %v5607_v11 = vsub.f32 %v10745_v48, %v5539_v54  ;;  %v5646_v46 = vmul.f32 1.442695, %v5605_v43  ;;  %v10747_v3 = vld [vmem:[#allocation69_spill] sm:$0xff] }
0x11c1   :  { %v9928_v31 = vpop.eup %7261  ;;  %7287 = vpow2.f32 %v5686_v19  ;;  %v5547_v41 = vrot.slane %v9930_v49, %v10746_v12  ;;  %v5608_v37 = vsub.f32 %v10747_v3, %v5543_v22  ;;  %v5648_v19 = vmul.f32 1.442695, %v5606_v52 }
0x11c2   :  { %v9933_v17 = vpop.eup %7263  ;;  %5773 = vperm.xlu1 %7115, %v9928_v31   ;;  %7289 = vpow2.f32 %v5630_v4  ;;  %v5609_v4 = vsub.f32 %v10748_v39, %v5543_v22  ;;  %v5650_v45 = vmul.f32 1.442695, %v5607_v11 }
0x11c3   :  { %5776 = vperm.xlu0 %7116, %v9933_v17   ;;  %v9940_v53 = vpop.eup %7265  ;;  %7291 = vpow2.f32 %v5628_v25  ;;  %v5610_v57 = vsub.f32 %v10749_v44, %v5547_v41  ;;  %v5652_v49 = vmul.f32 1.442695, %v5608_v37 }
0x11c4   :  { %v9943_v63 = vpop.eup %7267  ;;  %7293 = vpow2.f32 %v5632_v50  ;;  %v5579_v50 = vrot.slane %v9901_v5, %v10746_v12  ;;  %v5654_v59 = vmul.f32 1.442695, %v5609_v4 }
0x11c5   :  { %v9950_v8 = vpop.eup %7269  ;;  %7295 = vpow2.f32 %v5634_v61  ;;  %v5611_v61 = vsub.f32 %v10750_v24, %v5547_v41  ;;  %v5656_v56 = vmul.f32 1.442695, %v5610_v57 }
0x11c6   :  { %5779 = vperm.xlu1 %7115, %v9940_v53   ;;  %v9953_v34 = vpop.eup %7271  ;;  %7297 = vpow2.f32 %v5636_v51  ;;  %v10752_v51 = vld [vmem:[#allocation72_spill] sm:$0xff] }
0x11c7   :  { %5782 = vperm.xlu0 %7116, %v9943_v63   ;;  %v9960_v42 = vpop.eup %7273  ;;  %7299 = vpow2.f32 %v5638_v7  ;;  %v5626_v32 = vsub.f32 %v10752_v51, %v5579_v50  ;;  %v5658_v5 = vmul.f32 1.442695, %v5611_v61  ;;  %v10754_v7 = vld [vmem:[#allocation73_spill] sm:$0xff] }
0x11c8   :  { %v9963_v0 = vpop.eup %7275  ;;  %7301 = vpow2.f32 %v5640_v2  ;;  %v5627_v54 = vsub.f32 %v10754_v7, %v5579_v50 }
0x11c9   :  { %v9970_v55 = vpop.eup %7277  ;;  %7303 = vpow2.f32 %v5642_v60  ;;  %v5688_v30 = vmul.f32 1.442695, %v5626_v32 }
0x11ca   :  { %5785 = vperm.xlu1 %7115, %v9950_v8   ;;  %v9973_v21 = vpop.eup %7279  ;;  %7305 = vpow2.f32 %v5644_v16  ;;  %v5690_v1 = vmul.f32 1.442695, %v5627_v54 }
0x11cb   :  { %5788 = vperm.xlu0 %7116, %v9953_v34   ;;  %v9980_v28 = vpop.eup %7281  ;;  %7307 = vpow2.f32 %v5646_v46 }
0x11cc   :  { %v9983_v58 = vpop.eup %7283  ;;  %7309 = vpow2.f32 %v5648_v19 }
0x11cd   :  { %v9990_v15 = vpop.eup %7285  ;;  %7311 = vpow2.f32 %v5650_v45 }
0x11ce   :  { %5791 = vperm.xlu1 %7115, %v9960_v42   ;;  %v9993_v36 = vpop.eup %7287  ;;  %7313 = vpow2.f32 %v5652_v49 }
0x11cf   :  { %5794 = vperm.xlu0 %7116, %v9963_v0   ;;  %v10000_v35 = vpop.eup %7289  ;;  %7315 = vpow2.f32 %v5654_v59 }
0x11d0   :  { %v10003_v62 = vpop.eup %7291  ;;  %7317 = vpow2.f32 %v5656_v56 }
0x11d1   :  { %v10010_v38 = vpop.eup %7293  ;;  %7319 = vpow2.f32 %v5658_v5 }
0x11d2   :  { %5797 = vperm.xlu1 %7115, %v9970_v55   ;;  %v10013_v25 = vpop.eup %7295  ;;  %7321 = vpow2.f32 %v5688_v30 }
0x11d3   :  { %5800 = vperm.xlu0 %7116, %v9973_v21   ;;  %v10020_v40 = vpop.eup %7297  ;;  %7323 = vpow2.f32 %v5690_v1 }
0x11d4   :  { %v10023_v9 = vpop.eup %7299 }
0x11d5   :  { %10751 = vst [vmem:[#allocation28_spill] sm:$0xff] %v10023_v9  ;;  %v10028_v10 = vpop.eup %7301 }
0x11d6   :  { %5803 = vperm.xlu1 %7115, %v9980_v28   ;;  %10753 = vst [vmem:[#allocation35_spill] sm:$0xff] %v10028_v10  ;;  %v10031_v33 = vpop.eup %7303 }
0x11d7   :  { %5806 = vperm.xlu0 %7116, %v9983_v58   ;;  %10755 = vst [vmem:[#allocation36_spill] sm:$0xff] %v10031_v33  ;;  %v10035_v2 = vpop.eup %7305 }
0x11d8   :  { %10756 = vst [vmem:[#allocation29_spill] sm:$0xff] %v10035_v2  ;;  %v10037_v43 = vpop.eup %7307 }
0x11d9   :  { %10757 = vst [vmem:[#allocation32_spill] sm:$0xff] %v10037_v43  ;;  %v10041_v60 = vpop.eup %7309 }
0x11da   :  { %5809 = vperm.xlu1 %7115, %v9990_v15   ;;  %10758 = vst [vmem:[#allocation37_spill] sm:$0xff] %v10041_v60  ;;  %v10043_v22 = vpop.eup %7311 }
0x11db   :  { %5812 = vperm.xlu0 %7116, %v9993_v36   ;;  %10759 = vst [vmem:[#allocation38_spill] sm:$0xff] %v10043_v22  ;;  %v10047_v47 = vpop.eup %7313 }
0x11dc   :  { %10760 = vst [vmem:[#allocation41_spill] sm:$0xff] %v10047_v47  ;;  %v10049_v52 = vpop.eup %7315 }
0x11dd   :  { %10761 = vst [vmem:[#allocation42_spill] sm:$0xff] %v10049_v52  ;;  %v10053_v16 = vpop.eup %7317 }
0x11de   :  { %5728 = vperm.xlu1 %7115, %v10000_v35   ;;  %10762 = vst [vmem:[#allocation49_spill] sm:$0xff] %v10053_v16  ;;  %v10055_v48 = vpop.eup %7319 }
0x11df   :  { %5725 = vperm.xlu0 %7116, %v10003_v62   ;;  %10763 = vst [vmem:[#allocation50_spill] sm:$0xff] %v10055_v48  ;;  %v10059_v11 = vpop.eup %7321 }
0x11e0   :  { %10764 = vst [vmem:[#allocation30_spill] sm:$0xff] %v10059_v11  ;;  %v10061_v46 = vpop.eup %7323 }
0x11e1   :  { %10765 = vst [vmem:[#allocation31_spill] sm:$0xff] %v10061_v46 }
0x11e2   :  { %5731 = vperm.xlu1 %7115, %v10010_v38  }
0x11e3   :  { %5734 = vperm.xlu0 %7116, %v10013_v25  }
0x11e6   :  { %5737 = vperm.xlu1 %7115, %v10020_v40  }
0x11e7   :  { %5740 = vperm.xlu0 %7116, %v10023_v9  }
0x11ea   :  { %5743 = vperm.xlu1 %7115, %v10028_v10  }
0x11eb   :  { %5746 = vperm.xlu0 %7116, %v10031_v33  }
0x11ee   :  { %5749 = vperm.xlu1 %7115, %v10035_v2  }
0x11ef   :  { %5752 = vperm.xlu0 %7116, %v10037_v43  }
0x11f2   :  { %5755 = vperm.xlu1 %7115, %v10041_v60  }
0x11f3   :  { %5758 = vperm.xlu0 %7116, %v10043_v22  }
0x11f6   :  { %5761 = vperm.xlu1 %7115, %v10047_v47  }
0x11f7   :  { %5764 = vperm.xlu0 %7116, %v10049_v52  }
0x11fa   :  { %5767 = vperm.xlu1 %7115, %v10053_v16  }
0x11fb   :  { %5770 = vperm.xlu0 %7116, %v10055_v48  }
0x11fe   :  { %5815 = vperm.xlu1 %7115, %v10059_v11  }
0x11ff   :  { %5818 = vperm.xlu0 %7116, %v10061_v46  }
0x123d   :  { %v10065_v41 = vpop.permute.xlu1 %5773 }
0x123e   :  { %v10067_v3 = vpop.permute.xlu0 %5776  ;;  %v5895_v43 = vrot.slane %v10065_v41, %v8192_v27 }
0x1241   :  { %v5780_v37 = vpop.permute.xlu1 %5779 }
0x1242   :  { %v5783_v19 = vpop.permute.xlu0 %5782  ;;  %v5904_v16 = vrot.slane %v5780_v37, %v8192_v27 }
0x1243   :  { %v5908_v48 = vrot.slane %v5783_v19, %v8195_v18 }
0x1245   :  { %v5786_v39 = vpop.permute.xlu1 %5785 }
0x1246   :  { %v5789_v4 = vpop.permute.xlu0 %5788  ;;  %v5913_v52 = vrot.slane %v5786_v39, %v8192_v27 }
0x1247   :  { %v5917_v12 = vrot.slane %v5789_v4, %v8195_v18 }
0x1249   :  { %v10069_v45 = vpop.permute.xlu1 %5791 }
0x124a   :  { %v10071_v44 = vpop.permute.xlu0 %5794 }
0x124d   :  { %v10073_v57 = vpop.permute.xlu1 %5797 }
0x124e   :  { %v10075_v49 = vpop.permute.xlu0 %5800 }
0x1251   :  { %v10077_v50 = vpop.permute.xlu1 %5803 }
0x1252   :  { %v10079_v24 = vpop.permute.xlu0 %5806 }
0x1255   :  { %v10081_v61 = vpop.permute.xlu1 %5809 }
0x1256   :  { %v10083_v59 = vpop.permute.xlu0 %5812 }
0x1259   :  { %v5729_v56 = vpop.permute.xlu1 %5728 }
0x125a   :  { %v5726_v51 = vpop.permute.xlu0 %5725  ;;  %v5827_v37 = vrot.slane %v5729_v56, %v8195_v18 }
0x125b   :  { %v5823_v19 = vrot.slane %v5726_v51, %v8192_v27 }
0x125d   :  { %v5732_v32 = vpop.permute.xlu1 %5731 }
0x125e   :  { %v5735_v5 = vpop.permute.xlu0 %5734  ;;  %v5832_v22 = vrot.slane %v5732_v32, %v8192_v27  ;;  %v5899_v32 = vrot.slane %v10067_v3, %v8195_v18  ;;  %v5922_v3 = vrot.slane %v10069_v45, %v8192_v27  ;;  %v5949_v45 = vrot.slane %v10081_v61, %v8192_v27 }
0x125f   :  { %v5836_v47 = vrot.slane %v5735_v5, %v8195_v18  ;;  %v5909_v5 = vsel %vm1191_vm5, %v5908_v48, %v5904_v16 }
0x1261   :  { %v5738_v7 = vpop.permute.xlu1 %5737  ;;  %v5837_v9 = vsel %vm1191_vm5, %v5836_v47, %v5832_v22  ;;  %v5828_v22 = vsel %vm1191_vm5, %v5827_v37, %v5823_v19  ;;  %v5935_v47 = vrot.slane %v10075_v49, %v8195_v18  ;;  %v5953_v49 = vrot.slane %v10083_v59, %v8195_v18 }
0x1262   :  { %v5741_v54 = vpop.permute.xlu0 %5740  ;;  %v5841_v33 = vrot.slane %v5738_v7, %v8192_v27  ;;  %v5918_v7 = vsel %vm1191_vm5, %v5917_v12, %v5913_v52  ;;  %v5931_v12 = vrot.slane %v10073_v57, %v8192_v27  ;;  %v5940_v52 = vrot.slane %v10077_v50, %v8192_v27 }
0x1263   :  { %v5845_v2 = vrot.slane %v5741_v54, %v8195_v18 }
0x1265   :  { %v5744_v30 = vpop.permute.xlu1 %5743  ;;  %v5846_v16 = vsel %vm1191_vm5, %v5845_v2, %v5841_v33  ;;  %v5964_v33 = vsel %vm1328_vm6, %v5837_v9, %v5828_v22 }
0x1266   :  { %v5747_v1 = vpop.permute.xlu0 %5746  ;;  %v5850_v39 = vrot.slane %v5744_v30, %v8192_v27  ;;  %v5926_v30 = vrot.slane %v10071_v44, %v8195_v18  ;;  %v5965_v44 = vsel %vm1330_vm7, %v5846_v16, %v5964_v33 }
0x1267   :  { %v5854_v4 = vrot.slane %v5747_v1, %v8195_v18 }
0x1269   :  { %v5750_v46 = vpop.permute.xlu1 %5749 }
0x126a   :  { %v5753_v11 = vpop.permute.xlu0 %5752  ;;  %v5859_v54 = vrot.slane %v5750_v46, %v8192_v27  ;;  %v5944_v46 = vrot.slane %v10079_v24, %v8195_v18  ;;  %v5900_v24 = vsel %vm1191_vm5, %v5899_v32, %v5895_v43 }
0x126b   :  { %v5863_v41 = vrot.slane %v5753_v11, %v8195_v18 }
0x126d   :  { %v5756_v60 = vpop.permute.xlu1 %5755  ;;  %v5864_v2 = vsel %vm1191_vm5, %v5863_v41, %v5859_v54  ;;  %v5971_v54 = vsel %vm1328_vm6, %v5909_v5, %v5900_v24 }
0x126e   :  { %v5759_v10 = vpop.permute.xlu0 %5758  ;;  %v5868_v56 = vrot.slane %v5756_v60, %v8192_v27 }
0x126f   :  { %v5872_v51 = vrot.slane %v5759_v10, %v8195_v18  ;;  %v5855_v10 = vsel %vm1191_vm5, %v5854_v4, %v5850_v39  ;;  %v5927_v39 = vsel %vm1191_vm5, %v5926_v30, %v5922_v3  ;;  %v5954_v30 = vsel %vm1191_vm5, %v5953_v49, %v5949_v45 }
0x1270   :  { %v5966_v50 = vsel %vm1332_vm8, %v5855_v10, %v5965_v44 }
0x1271   :  { %v5762_v1 = vpop.permute.xlu1 %5761  ;;  %v5873_v57 = vsel %vm1191_vm5, %v5872_v51, %v5868_v56  ;;  %v5967_v61 = vsel %vm1334_vm9, %v5864_v2, %v5966_v50  ;;  %v5936_v51 = vsel %vm1191_vm5, %v5935_v47, %v5931_v12  ;;  %v5972_v56 = vsel %vm1330_vm7, %v5918_v7, %v5971_v54 }
0x1272   :  { %v5765_v48 = vpop.permute.xlu0 %5764  ;;  %v5877_v11 = vrot.slane %v5762_v1, %v8192_v27  ;;  %v5968_v59 = vsel %vm1336_vm10, %v5873_v57, %v5967_v61  ;;  %v5945_v1 = vsel %vm1191_vm5, %v5944_v46, %v5940_v52  ;;  %v5973_v32 = vsel %vm1332_vm8, %v5927_v39, %v5972_v56 }
0x1273   :  { %v5881_v60 = vrot.slane %v5765_v48, %v8195_v18  ;;  %v5974_v12 = vsel %vm1334_vm9, %v5936_v51, %v5973_v32 }
0x1274   :  { %v5975_v10 = vsel %vm1336_vm10, %v5945_v1, %v5974_v12  ;;  %v10766_v1 = vld [vmem:[#allocation28_spill] sm:$0xff] }
0x1275   :  { %v5768_v19 = vpop.permute.xlu1 %5767  ;;  %v5882_v9 = vsel %vm1191_vm5, %v5881_v60, %v5877_v11  ;;  %v5976_v47 = vsel %vm1338_vm12, %v5954_v30, %v5975_v10 }
0x1276   :  { %v5771_v37 = vpop.permute.xlu0 %5770  ;;  %v5886_v4 = vrot.slane %v5768_v19, %v8192_v27  ;;  %v5969_v43 = vsel %vm1338_vm12, %v5882_v9, %v5968_v59 }
0x1277   :  { %v5890_v41 = vrot.slane %v5771_v37, %v8195_v18 }
0x1279   :  { %v5816_v16 = vpop.permute.xlu1 %5815  ;;  %v5891_v48 = vsel %vm1191_vm5, %v5890_v41, %v5886_v4 }
0x127a   :  { %v5819_v3 = vpop.permute.xlu0 %5818  ;;  %v5958_v5 = vrot.slane %v5816_v16, %v8192_v27  ;;  %v5970_v11 = vsel %vm1340_vm11, %v5891_v48, %v5969_v43  ;;  %v10768_v43 = vld [vmem:[#allocation36_spill] sm:$0xff] }
0x127b   :  { %v5962_v7 = vrot.slane %v5819_v3, %v8195_v18  ;;  %v5980_v22 = vsel %vm1351_vm13, %v5970_v11, 0.0  ;;  %v10770_v3 = vld [vmem:[#allocation32_spill] sm:$0xff]  ;;  %v10771_v11 = vld [vmem:[#allocation37_spill] sm:$0xff] }
0x127c   :  { %5981 = vadd.xlane.f32.xlu1 %v5980_v22 }
0x127d   :  { %v5963_v60 = vsel %vm1191_vm5, %v5962_v7, %v5958_v5  ;;  %v10772_v7 = vld [vmem:[#allocation38_spill] sm:$0xff] }
0x127e   :  { %v5977_v52 = vsel %vm1340_vm11, %v5963_v60, %v5976_v47  ;;  %v10773_v60 = vld [vmem:[#allocation41_spill] sm:$0xff]  ;;  %v10774_v47 = vld [vmem:[#allocation42_spill] sm:$0xff] }
0x127f   :  { %v5983_v33 = vsel %vm1351_vm13, %v5977_v52, 0.0 }
0x1280   :  { %5984 = vadd.xlane.f32.xlu0 %v5983_v33  ;;  %v10775_v33 = vld [vmem:[#allocation27_spill] sm:$0xff] }
0x1305   :  { %v5982_v37 = vpop.xlane.xlu1 %5981 }
0x1309   :  { %v5985_v2 = vpop.xlane.xlu0 %5984 }
0x130a   :  { %7325 = vrcp.f32 %v5985_v2 }
0x130b   :  { %7327 = vrcp.f32 %v5982_v37 }
0x1317   :  { %v10159_v46 = vpop.eup %7325 }
0x1318   :  { %v6025_v45 = vrot.slane %v10159_v46, %v7746_v6  ;;  %v6029_v19 = vrot.slane %v10159_v46, %v7750_v13  ;;  %v6033_v9 = vrot.slane %v10159_v46, %v7753_v14  ;;  %v6037_v4 = vrot.slane %v10159_v46, %v7760_v20  ;;  %v7328_v41 = vpop.eup %7327 }
0x1319   :  { %v6041_v24 = vrot.slane %v10159_v46, %v7765_v23  ;;  %v6017_v10 = vrot.slane %v7328_v41, %v7775_v29  ;;  %v6021_v2 = vrot.slane %v7328_v41, %v10775_v33 }
0x131a   :  { %v6087_v44 = vmul.f32 %v9933_v17, %v6025_v45  ;;  %v6086_v57 = vmul.f32 %v9928_v31, %v6025_v45  ;;  %v6089_v49 = vmul.f32 %v9943_v63, %v6029_v19  ;;  %v6088_v50 = vmul.f32 %v9940_v53, %v6029_v19  ;;  %v10776_v45 = vld [vmem:[#allocation49_spill] sm:$0xff] }
0x131b   :  { %v6091_v17 = vmul.f32 %v9953_v34, %v6033_v9  ;;  %v6090_v31 = vmul.f32 %v9950_v8, %v6033_v9  ;;  %v6093_v63 = vmul.f32 %v9963_v0, %v6037_v4  ;;  %v6092_v53 = vmul.f32 %v9960_v42, %v6037_v4 }
0x131c   :  { %6190 = vperm.xlu0 %7116, %v6087_v44   ;;  %6187 = vperm.xlu1 %7115, %v6086_v57   ;;  %v6095_v39 = vmul.f32 %v9973_v21, %v6041_v24  ;;  %v6094_v34 = vmul.f32 %v9970_v55, %v6041_v24  ;;  %v6045_v8 = vrot.slane %v10159_v46, %v7770_v26  ;;  %v10777_v44 = vld [vmem:[#allocation50_spill] sm:$0xff] }
0x131d   :  { %v6049_v42 = vrot.slane %v10159_v46, %v7775_v29  ;;  %v5993_v55 = vrot.slane %v7328_v41, %v7746_v6  ;;  %v6083_v52 = vmul.f32 %v10774_v47, %v6017_v10  ;;  %v6085_v57 = vmul.f32 %v10777_v44, %v6021_v2  ;;  %v10778_v29 = vld [vmem:[#allocation30_spill] sm:$0xff] }
0x131e   :  { %v6097_v61 = vmul.f32 %v9983_v58, %v6045_v8  ;;  %v6096_v0 = vmul.f32 %v9980_v28, %v6045_v8  ;;  %v5997_v28 = vrot.slane %v7328_v41, %v7750_v13  ;;  %v6053_v19 = vrot.slane %v10159_v46, %v10775_v33 }
0x131f   :  { %v6099_v54 = vmul.f32 %v9993_v36, %v6049_v42  ;;  %v6098_v21 = vmul.f32 %v9990_v15, %v6049_v42  ;;  %v6071_v51 = vmul.f32 %v10000_v35, %v5993_v55  ;;  %v6070_v58 = vmul.f32 %v10003_v62, %v5993_v55  ;;  %v10767_v62 = vld [vmem:[#allocation35_spill] sm:$0xff] }
0x1320   :  { %6196 = vperm.xlu0 %7116, %v6089_v49   ;;  %6193 = vperm.xlu1 %7115, %v6088_v50   ;;  %v6072_v59 = vmul.f32 %v10010_v38, %v5997_v28  ;;  %v6073_v56 = vmul.f32 %v10013_v25, %v5997_v28  ;;  %v6001_v36 = vrot.slane %v7328_v41, %v7753_v14  ;;  %v10769_v25 = vld [vmem:[#allocation29_spill] sm:$0xff]  ;;  %v10779_v50 = vld [vmem:[#allocation31_spill] sm:$0xff] }
0x1321   :  { %v6005_v35 = vrot.slane %v7328_v41, %v7760_v20  ;;  %v6009_v38 = vrot.slane %v7328_v41, %v7765_v23  ;;  %v6082_v23 = vmul.f32 %v10773_v60, %v6017_v10  ;;  %v6100_v49 = vmul.f32 %v10778_v29, %v6053_v19 }
0x1322   :  { %v6074_v15 = vmul.f32 %v10020_v40, %v6001_v36  ;;  %v6075_v16 = vmul.f32 %v10766_v1, %v6001_v36  ;;  %v6013_v40 = vrot.slane %v7328_v41, %v7770_v26  ;;  %v6084_v26 = vmul.f32 %v10776_v45, %v6021_v2 }
0x1323   :  { %v6076_v48 = vmul.f32 %v10767_v62, %v6005_v35  ;;  %v6077_v32 = vmul.f32 %v10768_v43, %v6005_v35  ;;  %v6078_v30 = vmul.f32 %v10769_v25, %v6009_v38  ;;  %v6079_v5 = vmul.f32 %v10770_v3, %v6009_v38 }
0x1324   :  { %6202 = vperm.xlu0 %7116, %v6091_v17   ;;  %6199 = vperm.xlu1 %7115, %v6090_v31   ;;  %v6080_v12 = vmul.f32 %v10771_v11, %v6013_v40  ;;  %v6081_v22 = vmul.f32 %v10772_v7, %v6013_v40  ;;  %v6101_v9 = vmul.f32 %v10779_v50, %v6053_v19 }
0x1328   :  { %6208 = vperm.xlu0 %7116, %v6093_v63   ;;  %6205 = vperm.xlu1 %7115, %v6092_v53  }
0x132c   :  { %6214 = vperm.xlu0 %7116, %v6095_v39   ;;  %6211 = vperm.xlu1 %7115, %v6094_v34  }
0x1330   :  { %6220 = vperm.xlu0 %7116, %v6097_v61   ;;  %6217 = vperm.xlu1 %7115, %v6096_v0  }
0x1334   :  { %6226 = vperm.xlu0 %7116, %v6099_v54   ;;  %6223 = vperm.xlu1 %7115, %v6098_v21  }
0x1338   :  { %6142 = vperm.xlu1 %7115, %v6071_v51   ;;  %6139 = vperm.xlu0 %7116, %v6070_v58  }
0x133c   :  { %6145 = vperm.xlu1 %7115, %v6072_v59   ;;  %6148 = vperm.xlu0 %7116, %v6073_v56  }
0x1340   :  { %6151 = vperm.xlu1 %7115, %v6074_v15   ;;  %6154 = vperm.xlu0 %7116, %v6075_v16  }
0x1344   :  { %6157 = vperm.xlu1 %7115, %v6076_v48   ;;  %6160 = vperm.xlu0 %7116, %v6077_v32  }
0x1348   :  { %6163 = vperm.xlu1 %7115, %v6078_v30   ;;  %6166 = vperm.xlu0 %7116, %v6079_v5  }
0x134c   :  { %6169 = vperm.xlu1 %7115, %v6080_v12   ;;  %6172 = vperm.xlu0 %7116, %v6081_v22  }
0x1350   :  { %6175 = vperm.xlu1 %7115, %v6082_v23   ;;  %6178 = vperm.xlu0 %7116, %v6083_v52  }
0x1354   :  { %6181 = vperm.xlu1 %7115, %v6084_v26   ;;  %6184 = vperm.xlu0 %7116, %v6085_v57  }
0x1358   :  { %6229 = vperm.xlu1 %7115, %v6100_v49   ;;  %6232 = vperm.xlu0 %7116, %v6101_v9  }
0x1397   :  { %v6191_v37 = vpop.permute.xlu0 %6190  ;;  %v6188_v17 = vpop.permute.xlu1 %6187 }
0x1398   :  { %v6313_v15 = vrot.slane %v6191_v37, %v8195_v18  ;;  %v6309_v1 = vrot.slane %v6188_v17, %v8192_v27 }
0x139a   :  { %v6314_v7 = vsel %vm1191_vm5, %v6313_v15, %v6309_v1 }
0x139b   :  { %v6197_v31 = vpop.permute.xlu0 %6196  ;;  %v6194_v4 = vpop.permute.xlu1 %6193 }
0x139c   :  { %v6322_v16 = vrot.slane %v6197_v31, %v8195_v18  ;;  %v6318_v35 = vrot.slane %v6194_v4, %v8192_v27 }
0x139e   :  { %v6323_v60 = vsel %vm1191_vm5, %v6322_v16, %v6318_v35 }
0x139f   :  { %v6203_v63 = vpop.permute.xlu0 %6202  ;;  %v6200_v53 = vpop.permute.xlu1 %6199 }
0x13a0   :  { %v6331_v43 = vrot.slane %v6203_v63, %v8195_v18  ;;  %v6327_v32 = vrot.slane %v6200_v53, %v8192_v27 }
0x13a2   :  { %v6332_v33 = vsel %vm1191_vm5, %v6331_v43, %v6327_v32 }
0x13a3   :  { %v10217_v24 = vpop.permute.xlu0 %6208  ;;  %v10219_v39 = vpop.permute.xlu1 %6205 }
0x13a4   :  { %v6340_v2 = vrot.slane %v10217_v24, %v8195_v18  ;;  %v6336_v45 = vrot.slane %v10219_v39, %v8192_v27 }
0x13a7   :  { %v10221_v34 = vpop.permute.xlu0 %6214  ;;  %v10223_v46 = vpop.permute.xlu1 %6211 }
0x13a8   :  { %v6349_v9 = vrot.slane %v10221_v34, %v8195_v18  ;;  %v6345_v37 = vrot.slane %v10223_v46, %v8192_v27 }
0x13ab   :  { %v10225_v8 = vpop.permute.xlu0 %6220  ;;  %v10227_v61 = vpop.permute.xlu1 %6217 }
0x13ac   :  { %v6358_v4 = vrot.slane %v10225_v8, %v8195_v18  ;;  %v6354_v63 = vrot.slane %v10227_v61, %v8192_v27  ;;  %v6341_v8 = vsel %vm1191_vm5, %v6340_v2, %v6336_v45 }
0x13af   :  { %v10229_v0 = vpop.permute.xlu0 %6226  ;;  %v10231_v42 = vpop.permute.xlu1 %6223 }
0x13b0   :  { %v6367_v39 = vrot.slane %v10229_v0, %v8195_v18  ;;  %v6363_v34 = vrot.slane %v10231_v42, %v8192_v27  ;;  %v6350_v0 = vsel %vm1191_vm5, %v6349_v9, %v6345_v37 }
0x13b2   :  { %v6368_v1 = vsel %vm1191_vm5, %v6367_v39, %v6363_v34 }
0x13b3   :  { %v6140_v41 = vpop.permute.xlu0 %6139  ;;  %v6143_v54 = vpop.permute.xlu1 %6142 }
0x13b4   :  { %v6237_v5 = vrot.slane %v6140_v41, %v8192_v27  ;;  %v6241_v40 = vrot.slane %v6143_v54, %v8195_v18 }
0x13b6   :  { %v6242_v19 = vsel %vm1191_vm5, %v6241_v40, %v6237_v5  ;;  %v7337_v5 = vld [vmem:[#allocation7] sm:$0xff] }
0x13b7   :  { %v6149_v21 = vpop.permute.xlu0 %6148  ;;  %v6146_v55 = vpop.permute.xlu1 %6145 }
0x13b8   :  { %v6250_v62 = vrot.slane %v6149_v21, %v8195_v18  ;;  %v6246_v48 = vrot.slane %v6146_v55, %v8192_v27 }
0x13ba   :  { %v6251_v23 = vsel %vm1191_vm5, %v6250_v62, %v6246_v48 }
0x13bb   :  { %v6155_v51 = vpop.permute.xlu0 %6154  ;;  %v6152_v58 = vpop.permute.xlu1 %6151  ;;  %v6378_v17 = vsel %vm1328_vm6, %v6251_v23, %v6242_v19  ;;  %v6722_v19 = vld [vmem:[%s10357_s16 + $0x8] sm:$0xff] }
0x13bc   :  { %v6259_v38 = vrot.slane %v6155_v51, %v8195_v18  ;;  %v6255_v25 = vrot.slane %v6152_v58, %v8192_v27  ;;  %v6385_v58 = vsel %vm1328_vm6, %v6323_v60, %v6314_v7  ;;  %vm6807_vm6 = vcmask 254976  }
0x13be   :  { %v6260_v26 = vsel %vm1191_vm5, %v6259_v38, %v6255_v25 }
0x13bf   :  { %v6161_v28 = vpop.permute.xlu0 %6160  ;;  %v6158_v59 = vpop.permute.xlu1 %6157  ;;  %v6379_v53 = vsel %vm1330_vm7, %v6260_v26, %v6378_v17 }
0x13c0   :  { %v6268_v11 = vrot.slane %v6161_v28, %v8195_v18  ;;  %v6264_v12 = vrot.slane %v6158_v59, %v8192_v27  ;;  %v6386_v28 = vsel %vm1330_vm7, %v6332_v33, %v6385_v58  ;;  %v6359_v59 = vsel %vm1191_vm5, %v6358_v4, %v6354_v63 }
0x13c1   :  { %v6387_v15 = vsel %vm1332_vm8, %v6341_v8, %v6386_v28 }
0x13c2   :  { %v6269_v29 = vsel %vm1191_vm5, %v6268_v11, %v6264_v12  ;;  %v6388_v48 = vsel %vm1334_vm9, %v6350_v0, %v6387_v15 }
0x13c3   :  { %v6167_v56 = vpop.permute.xlu0 %6166  ;;  %v6164_v36 = vpop.permute.xlu1 %6163  ;;  %v6380_v46 = vsel %vm1332_vm8, %v6269_v29, %v6379_v53  ;;  %v6389_v38 = vsel %vm1336_vm10, %v6359_v59, %v6388_v48 }
0x13c4   :  { %v6277_v22 = vrot.slane %v6167_v56, %v8195_v18  ;;  %v6273_v10 = vrot.slane %v6164_v36, %v8192_v27  ;;  %v6390_v25 = vsel %vm1338_vm12, %v6368_v1, %v6389_v38 }
0x13c6   :  { %v6278_v31 = vsel %vm1191_vm5, %v6277_v22, %v6273_v10  ;;  %v7339_v22 = vld [vmem:[#allocation7 + $0x8] sm:$0xff]  ;;  %v6471_v10 = vld [vmem:[%s10356_s15] sm:$0x7] }
0x13c7   :  { %v6173_v30 = vpop.permute.xlu0 %6172  ;;  %v6170_v3 = vpop.permute.xlu1 %6169  ;;  %v6381_v61 = vsel %vm1334_vm9, %v6278_v31, %v6380_v46  ;;  %v6550_v60 = vrot.slane %v6471_v10, %v7753_v14  ;;  %v6724_v14 = vld [vmem:[%s10357_s16 + $0x18] sm:$0xff]  ;;  %v6639_v37 = vrot.slane %v6471_v10, %v7746_v6  ;;  %v6645_v31 = vrot.slane %v6471_v10, %v7750_v13  ;;  %v6721_v6 = vld [vmem:[%s10357_s16] sm:$0xff] }
0x13c8   :  { %v6286_v47 = vrot.slane %v6173_v30, %v8195_v18  ;;  %v6282_v52 = vrot.slane %v6170_v3, %v8192_v27 }
0x13ca   :  { %v6287_v24 = vsel %vm1191_vm5, %v6286_v47, %v6282_v52 }
0x13cb   :  { %v6179_v44 = vpop.permute.xlu0 %6178  ;;  %v6176_v57 = vpop.permute.xlu1 %6175  ;;  %v6382_v42 = vsel %vm1336_vm10, %v6287_v24, %v6381_v61 }
0x13cc   :  { %v6295_v49 = vrot.slane %v6179_v44, %v8195_v18  ;;  %v6291_v50 = vrot.slane %v6176_v57, %v8192_v27  ;;  %v7587_v44 = vmov 0.0   ;;  %v6723_v57 = vld [vmem:[%s10357_s16 + $0x10] sm:$0xff] }
0x13ce   :  { %v6296_v41 = vsel %vm1191_vm5, %v6295_v49, %v6291_v50 }
0x13cf   :  { %v6185_v54 = vpop.permute.xlu0 %6184  ;;  %v6182_v21 = vpop.permute.xlu1 %6181  ;;  %v6383_v36 = vsel %vm1338_vm12, %v6296_v41, %v6382_v42  ;;  %v189_v41 = vld [vmem:[#allocation8] sm:$0x3] }
0x13d0   :  { %v6304_v55 = vrot.slane %v6185_v54, %v8195_v18  ;;  %v6300_v51 = vrot.slane %v6182_v21, %v8192_v27 }
0x13d2   :  { %v6305_v56 = vsel %vm1191_vm5, %v6304_v55, %v6300_v51 }
0x13d3   :  { %v6233_v16 = vpop.permute.xlu0 %6232  ;;  %v6230_v35 = vpop.permute.xlu1 %6229  ;;  %v6384_v62 = vsel %vm1340_vm11, %v6305_v56, %v6383_v36 }
0x13d4   :  { %v6376_v43 = vrot.slane %v6233_v16, %v8195_v18  ;;  %v6372_v32 = vrot.slane %v6230_v35, %v8192_v27  ;;  %7063 = vmatprep.mubr.msk.f32.mxu0 %vm1351_vm13, %v6384_v62  ;;  %v7338_v18 = vld [vmem:[%s10353_s12] sm:$0xf] }
0x13d5   :  { %v6105_v27 = vrot.slane %v7338_v18, %v7760_v20 }
0x13d6   :  { %v6377_v30 = vsel %vm1191_vm5, %v6376_v43, %v6372_v32  ;;  %vm7588_vm5 = vmmov 0  }
0x13d7   :  { %v6391_v3 = vsel %vm1340_vm11, %v6377_v30, %v6390_v25 }
0x13d8   :  { %7064 = vmatmul.mubr.msk.f32.vlgmr.msra.gmra.mxu0 %vm1351_vm13, %v6391_v3 }
0x13d9   :  { %7077 = vmatprep.mubr.msk.f32.mxu0 %vm1351_vm13, %v7337_v5 }
0x1498   :  { %v7065_v40 = vpop.f32.mrf.mxu0 }
0x1499   :  { %v6468_v11 = vadd.f32 %v7065_v40, %v6105_v27 }
0x149a   :  { %v6462_v12 = vpop.f32.mrf.mxu0 }
0x149b   :  { %v6463_v7 = vadd.f32 %v6462_v12, %v6105_v27  ;;  %7066 = vmatprep.subr.mxu1 %v6468_v11 }
0x149c   :  { %7067 = vmatpush3.msra.mxu1 %v6468_v11 }
0x149d   :  { %7068 = vmatprep.subr.mxu1 %v6463_v7 }
0x149e   :  { %7069 = vmatpush3.msra.mxu1 %v6463_v7 }
0x149f   :  { %7071 = vmatmul.mubr.msk.f32.vlgmr.msra.gmra.mxu1 %vm1351_vm13, %v7339_v22  ;;  %7080 = vmatprep.subr.mxu1 %v7587_v44 }
0x14a0   :  { %7084 = vmatprep.mubr.msk.f32.mxu1 %vm7588_vm5, %v7587_v44 }
0x155f   :  { %v7072_v23 = vpop.f32.mrf.mxu1 }
0x1560   :  { %v6552_v47 = vmul.f32 %v7072_v23, %v6550_v60 }
0x1561   :  { %v6538_v20 = vpop.f32.mrf.mxu1 }
0x1562   :  { %v6554_v52 = vsub.f32 %v6468_v11, %v6552_v47  ;;  %v6551_v33 = vmul.f32 %v6550_v60, %v6538_v20 }
0x1564   :  { %v6553_v2 = vsub.f32 %v6463_v7, %v6551_v33  ;;  %v6556_v45 = vmul.f32 %v6554_v52, %v6554_v52 }
0x1566   :  { %7073 = vmatprep.subr.mxu0 %v6556_v45  ;;  %v6555_v26 = vmul.f32 %v6553_v2, %v6553_v2 }
0x1567   :  { %7074 = vmatpush3.msra.mxu0 %v6556_v45 }
0x1568   :  { %7075 = vmatprep.subr.mxu0 %v6555_v26 }
0x1569   :  { %7076 = vmatpush3.msra.mxu0 %v6555_v26 }
0x156a   :  { %7078 = vmatmul.mubr.msk.f32.vlgmr.msra.gmra.mxu0 %vm1351_vm13, %v7339_v22  ;;  %7087 = vmatprep.subr.mxu0 %v7587_v44 }
0x156b   :  { %7095 = vmatprep.mubr.msk.f32.mxu0 %vm7588_vm5, %v7587_v44  ;;  %7088 = vmatpush3.msra.mxu0 %v6724_v14 }
0x156c   :  { %7089 = vmatprep.subr.mxu0 %v7587_v44 }
0x156d   :  { %7090 = vmatpush3.msra.mxu0 %v6723_v57 }
0x156e   :  { %7091 = vmatprep.subr.mxu0 %v7587_v44 }
0x156f   :  { %7092 = vmatpush3.msra.mxu0 %v6722_v19 }
0x1570   :  { %7093 = vmatprep.subr.mxu0 %v7587_v44 }
0x1571   :  { %7094 = vmatpush3.msra.mxu0 %v6721_v6 }
0x162a   :  { %v7079_v29 = vpop.f32.mrf.mxu0 }
0x162b   :  { %v6629_v49 = vadd.f32 1e-05, %v7079_v29 }
0x162c   :  { %v6623_v50 = vpop.f32.mrf.mxu0 }
0x162d   :  { %7329 = vrsqrt.f32 %v6629_v49  ;;  %v6624_v9 = vadd.f32 1e-05, %v6623_v50 }
0x162f   :  { %7331 = vrsqrt.f32 %v6624_v9 }
0x163a   :  { %v7330_v17 = vpop.eup %7329 }
0x163b   :  { %v6635_v4 = vmul.f32 %v7330_v17, %v6554_v52 }
0x163c   :  { %v7332_v63 = vpop.eup %7331 }
0x163d   :  { %v6641_v53 = vmul.f32 %v6639_v37, %v6635_v4  ;;  %v6634_v24 = vmul.f32 %v7332_v63, %v6553_v2 }
0x163f   :  { %v6647_v39 = vadd.f32 %v6645_v31, %v6641_v53  ;;  %v6640_v34 = vmul.f32 %v6639_v37, %v6634_v24 }
0x1641   :  { %7081 = vmatpush3.msra.mxu1 %v6647_v39  ;;  %v6646_v46 = vadd.f32 %v6645_v31, %v6640_v34 }
0x1642   :  { %7082 = vmatprep.subr.mxu1 %v7587_v44 }
0x1643   :  { %7083 = vmatpush3.msra.mxu1 %v6646_v46 }
0x1644   :  { %7085 = vmatmul.mubr.msk.f32.vlgmr.msra.gmra.mxu1 %vm1351_vm13, %v189_v41 }
0x1704   :  { %v6717_v13 = vpop.f32.mrf.mxu1 }
0x1705   :  { %7096 = vmatmul.mubr.msk.f32.vlgmr.msra.gmra.mxu0 %vm713_vm2, %v6717_v13  ;;  %6808 = vst.msk [vmem:[#allocation18] sm:$0x3] %vm6807_vm6, %v6717_v13 }
0x1706   :  { %v7086_v54 = vpop.f32.mrf.mxu1 }
0x1707   :  { %7531 = shalt.err (!%p7528_p7)
}
0x1708   :  { %6828 = dma.vmem_to_hbm [thread:$0]  %s6826_s23, 32, %s10360_s19, [#allocation19]   ;;  %v6875_v21 = vld [vmem:[%s10358_s17] ss:$0 sm:$0xff]  ;;  %vm6805_vm2 = vcmask 9216  }
0x1709   :  { %s7590_s25 = smov [#allocation17]  }
0x170a   :  { %s6815_s3 = sshll.u32 %s7590_s25, 4  ;;  %s6816_s3 = int_to_ptr.vmem [resolvable:$true] %s6815_s3 }
0x170b   :  { %s7540_s7 = scalar_lea.vmem %s6816_s3, 32  ;;  %p7545_p9 = scmp.lt.s32.totalorder %s6816_s3, %s6816_s3 }
0x170c   :  { %p7541_p8 = scmp.ne.s32.totalorder %s6816_s3, %s7540_s7  ;;  %p7546_p10 = scmp.lt.s32.totalorder %s7540_s7, %s7540_s7 }
0x170e   :  { %p7547_p11 = por %p7546_p10, %p7545_p9 }
0x1710   :  { %p7548_p12 = pnand %p7547_p11, %p7541_p8 }
0x17c5   :  { %v6801_v8 = vpop.f32.mrf.mxu0 }
0x17c6   :  { %v6802_v61 = vadd.f32 %v6875_v21, %v6801_v8 }
0x17c7   :  { %v7097_v55 = vpop.f32.mrf.mxu0 }
0x17c8   :  { %6806 = vst.msk [vmem:[#allocation17] sm:$0x3] %vm6805_vm2, %v6802_v61 }
0x17c9   :  { %7551 = shalt.err (!%p7548_p12)
}
0x17ca   :  { %s10780_s27 = sld [smem:[#allocation78_spill]] }
0x17d0   :  { %6818 = dma.vmem_to_hbm [thread:$0]  %s6816_s3, 32, %s10780_s27, [#allocation4]  }
0x17d1   :  { %7570 = dma.done.wait [#allocation4], 32  }
0x17d2   :  { %7571 = vsyncadd [#allocation4], 4294967264 }
0x17d3   :  { %7572 = dma.done.wait [#allocation19], 32  }
0x17d4   :  { %7573 = vsyncadd [#allocation19], 4294967264 }
0x17d5   :  { %6835 = vsyncpa [#allocation3], 1 }
0x17d6   :  { %6836 = vsyncpa [#allocation6], 1 }
0x17d7   :  { %6837 = vsyncpa [#allocation9], 1 }
0x17d8   :  { %6838 = vsyncpa [#allocation12], 1 }
0x17d9   :  { %6839 = vsyncpa [#allocation15], 1 }
0x17da   :  { %6840 = vsyncpa [#allocation4], 1 }
0x17db   :  { %6841 = vsyncpa [#allocation19], 1 }

</bundles_post_ra>
